<compile_context>
chip_gen: v6e
topology: v6e:2x2x1
jax: 0.10.0
libtpu: 0.0.40
codegen_flags: <defaults>
</compile_context>

<pallas_src>
import functools

import jax
import jax.numpy as jnp
from jax import lax
from jax.experimental import pallas as pl
from jax.experimental.pallas import tpu as pltpu


# ----------------------------------------------------------------------------
# Fused Pallas kernel: whole BasicBlock, whole batch, single invocation
# ----------------------------------------------------------------------------
def _basic_block_kernel(xp_ref, w1_ref, b1_ref, w2_ref, b2_ref, o_ref,
                        col_ref, hpad_ref):
    """Fused BasicBlock forward.

    xp_ref   : (N, H+2, W+2, C) f32   zero-padded input (VMEM)
    w1_ref   : (9*C, C) bf16          conv1 weight, BN1 scale folded, im2col order
    b1_ref   : (1, C) f32             folded BN1 bias
    w2_ref   : (9*C, C) bf16          conv2 weight, BN2 scale folded
    b2_ref   : (1, C) f32             folded BN2 bias
    o_ref    : (N, H, W, C) f32       block output
    col_ref  : (N*H*W, 9*C) bf16      VMEM scratch: im2col slab (reused by both convs)
    hpad_ref : (N, H+2, W+2, C) f32   VMEM scratch: padded intermediate h
    """
    n, hp2, wp2, c = xp_ref.shape
    hh, ww = hp2 - 2, wp2 - 2
    m = n * hh * ww

    def fill_im2col(src_ref):
        # Build the (M, 9*C) im2col slab once: each 3x3 tap is a shifted
        # (N, H, W, C) window of the padded source, stored lane-contiguously.
        for k, (dy, dx) in enumerate(
                [(dy, dx) for dy in range(3) for dx in range(3)]):
            tap = src_ref[:, dy:dy + hh, dx:dx + ww, :]
            col_ref[:, k * c:(k + 1) * c] = (
                tap.reshape(m, c).astype(col_ref.dtype))

    # ---- conv1 + folded BN1 + ReLU : one deep-K (9*C) MXU matmul ----
    fill_im2col(xp_ref)
    h = jnp.dot(col_ref[...], w1_ref[...], preferred_element_type=jnp.float32)
    h = jnp.maximum(h + b1_ref[...], 0.0)

    # Stage h with a zero halo in VMEM; it never round-trips through HBM.
    hpad_ref[...] = jnp.zeros_like(hpad_ref)
    hpad_ref[:, 1:hh + 1, 1:ww + 1, :] = h.reshape(n, hh, ww, c)

    # ---- conv2 + folded BN2 + residual + ReLU ----
    fill_im2col(hpad_ref)
    y = jnp.dot(col_ref[...], w2_ref[...], preferred_element_type=jnp.float32)
    res = xp_ref[:, 1:hh + 1, 1:ww + 1, :].reshape(m, c)
    y = jnp.maximum(y + b2_ref[...] + res, 0.0)

    o_ref[...] = y.reshape(n, hh, ww, c).astype(o_ref.dtype)


# ----------------------------------------------------------------------------
# Wrapper: layout glue + single pallas_call
# ----------------------------------------------------------------------------
def basic_block_forward(x_nchw, params):
    """vLayer65 forward. Input/output are NCHW float32, like the PyTorch module."""
    x = jnp.transpose(x_nchw, (0, 2, 3, 1))                      # NCHW -> NHWC
    n, h, w, c = x.shape
    xp = jnp.pad(x, ((0, 0), (1, 1), (1, 1), (0, 0)))

    vmem = functools.partial(pl.BlockSpec, memory_space=pltpu.MemorySpace.VMEM)
    out = pl.pallas_call(
        _basic_block_kernel,
        out_shape=jax.ShapeDtypeStruct((n, h, w, c), x.dtype),
        in_specs=[vmem(), vmem(), vmem(), vmem(), vmem()],
        out_specs=vmem(),
        scratch_shapes=[
            pltpu.VMEM((n * h * w, 9 * c), jnp.bfloat16),   # im2col slab
            pltpu.VMEM((n, h + 2, w + 2, c), jnp.float32),  # padded intermediate
        ],
    )(xp, params["w1f"], params["b1"], params["w2f"], params["b2"])
    return jnp.transpose(out, (0, 3, 1, 2))                      # NHWC -> NCHW


# ----------------------------------------------------------------------------
# Deterministic parameter initialization (matches __init__ semantics)
# ----------------------------------------------------------------------------
def init_params(key, c=64, eps=1e-5):
    k1, k2 = jax.random.split(key)
    # kaiming_normal_(mode='fan_out', nonlinearity='relu'): std = sqrt(2/fan_out)
    fan_out = c * 3 * 3
    std = (2.0 / fan_out) ** 0.5
    # HWIO layout: (kh, kw, Cin, Cout)
    w1 = jax.random.normal(k1, (3, 3, c, c), jnp.float32) * std
    w2 = jax.random.normal(k2, (3, 3, c, c), jnp.float32) * std
    # BN (inference mode): gamma=1, beta=0, running_mean=0, running_var=1
    gamma = jnp.ones((c,), jnp.float32)
    beta = jnp.zeros((c,), jnp.float32)
    mean = jnp.zeros((c,), jnp.float32)
    var = jnp.ones((c,), jnp.float32)
    scale = gamma * lax.rsqrt(var + eps)
    bias = beta - mean * scale
    # Fold BN scale into the conv weights (per output channel), reshape HWIO to
    # im2col order (9*Cin, Cout), cast to bf16 for the MXU.
    w1f = (w1 * scale).reshape(9 * c, c).astype(jnp.bfloat16)
    w2f = (w2 * scale).reshape(9 * c, c).astype(jnp.bfloat16)
    return {
        # kernel params (pre-folded)
        "w1f": w1f, "w2f": w2f,
        "b1": bias.reshape(1, c), "b2": bias.reshape(1, c),
        # raw params (for the f32 reference)
        "w1": w1, "w2": w2, "scale": scale, "bias": bias,
    }


# ----------------------------------------------------------------------------
# Pure-JAX f32 reference (for correctness check)
# ----------------------------------------------------------------------------
def _reference(x_nchw, params):
    x = jnp.transpose(x_nchw, (0, 2, 3, 1))

    def conv(z, w):
        return lax.conv_general_dilated(
            z, w, window_strides=(1, 1), padding=((1, 1), (1, 1)),
            dimension_numbers=("NHWC", "HWIO", "NHWC"))

    s, b = params["scale"], params["bias"]
    h = jnp.maximum(conv(x, params["w1"]) * s + b, 0.0)
    y = jnp.maximum(conv(h, params["w2"]) * s + b + x, 0.0)
    return jnp.transpose(y, (0, 3, 1, 2))


if __name__ == "__main__":
    key = jax.random.PRNGKey(0)
    kp, kx = jax.random.split(key)

    C = 64                  # BasicBlock(inplanes=64, planes=64) requires 64 channels
    N, H, W = 2, 8, 8
    params = init_params(kp, c=C)
    x = jax.random.normal(kx, (N, C, H, W), jnp.float32)

    fwd = jax.jit(functools.partial(basic_block_forward, params=params))
    out = fwd(x)
    jax.block_until_ready(out)

    ref = _reference(x, params)
    assert out.shape == (N, C, H, W)
    # Tolerance relaxed vs. the pure-f32 reference because the conv matmuls use
    # bf16 MXU inputs (f32 accumulation), as recommended by the perf review.
    assert jnp.allclose(out, ref, rtol=4e-2, atol=4e-2), "mismatch vs reference"

    print("KERNEL_OK")
</pallas_src>

<mosaic_0001>
module attributes {stable_mosaic.version = 11 : i64} {
  func.func @_basic_block_kernel(%arg0: memref<2x10x10x64xf32, #tpu.memory_space<vmem>>, %arg1: memref<576x64xbf16, #tpu.memory_space<vmem>>, %arg2: memref<1x64xf32, #tpu.memory_space<vmem>>, %arg3: memref<576x64xbf16, #tpu.memory_space<vmem>>, %arg4: memref<1x64xf32, #tpu.memory_space<vmem>>, %arg5: memref<2x8x8x64xf32, #tpu.memory_space<vmem>>, %arg6: memref<128x576xbf16, #tpu.memory_space<vmem>>, %arg7: memref<2x10x10x64xf32, #tpu.memory_space<vmem>>) attributes {dimension_semantics = [], scalar_prefetch = 0 : i64, scratch_operands = 2 : i64, tpu.core_type = #tpu.core_type<tc>} {
    %c0 = arith.constant 0 : index
    %c0_0 = arith.constant 0 : index
    %c0_1 = arith.constant 0 : index
    %c0_2 = arith.constant 0 : index
    %0 = vector.load %arg0[%c0, %c0_0, %c0_1, %c0_2] : memref<2x10x10x64xf32, #tpu.memory_space<vmem>>, vector<2x8x8x64xf32>
    %1 = vector.shape_cast %0 : vector<2x8x8x64xf32> to vector<128x64xf32>
    %2 = arith.truncf %1 : vector<128x64xf32> to vector<128x64xbf16>
    %c0_3 = arith.constant 0 : index
    %c0_4 = arith.constant 0 : index
    %3 = vector.load %arg6[%c0_3, %c0_4] : memref<128x576xbf16, #tpu.memory_space<vmem>>, vector<128x64xbf16>
    tpu.vector_store %arg6[%c0_3, %c0_4], %2 {strides = array<i32>} : memref<128x576xbf16, #tpu.memory_space<vmem>>, vector<128x64xbf16>,
    %c0_5 = arith.constant 0 : index
    %c0_6 = arith.constant 0 : index
    %c1 = arith.constant 1 : index
    %c0_7 = arith.constant 0 : index
    %4 = vector.load %arg0[%c0_5, %c0_6, %c1, %c0_7] : memref<2x10x10x64xf32, #tpu.memory_space<vmem>>, vector<2x8x8x64xf32>
    %5 = vector.shape_cast %4 : vector<2x8x8x64xf32> to vector<128x64xf32>
    %6 = arith.truncf %5 : vector<128x64xf32> to vector<128x64xbf16>
    %c0_8 = arith.constant 0 : index
    %c64 = arith.constant 64 : index
    %7 = vector.load %arg6[%c0_8, %c64] : memref<128x576xbf16, #tpu.memory_space<vmem>>, vector<128x64xbf16>
    tpu.vector_store %arg6[%c0_8, %c64], %6 {strides = array<i32>} : memref<128x576xbf16, #tpu.memory_space<vmem>>, vector<128x64xbf16>,
    %c0_9 = arith.constant 0 : index
    %c0_10 = arith.constant 0 : index
    %c2 = arith.constant 2 : index
    %c0_11 = arith.constant 0 : index
    %8 = vector.load %arg0[%c0_9, %c0_10, %c2, %c0_11] : memref<2x10x10x64xf32, #tpu.memory_space<vmem>>, vector<2x8x8x64xf32>
    %9 = vector.shape_cast %8 : vector<2x8x8x64xf32> to vector<128x64xf32>
    %10 = arith.truncf %9 : vector<128x64xf32> to vector<128x64xbf16>
    %c0_12 = arith.constant 0 : index
    %c128 = arith.constant 128 : index
    %11 = vector.load %arg6[%c0_12, %c128] : memref<128x576xbf16, #tpu.memory_space<vmem>>, vector<128x64xbf16>
    tpu.vector_store %arg6[%c0_12, %c128], %10 {strides = array<i32>} : memref<128x576xbf16, #tpu.memory_space<vmem>>, vector<128x64xbf16>,
    %c0_13 = arith.constant 0 : index
    %c1_14 = arith.constant 1 : index
    %c0_15 = arith.constant 0 : index
    %c0_16 = arith.constant 0 : index
    %12 = vector.load %arg0[%c0_13, %c1_14, %c0_15, %c0_16] : memref<2x10x10x64xf32, #tpu.memory_space<vmem>>, vector<2x8x8x64xf32>
    %13 = vector.shape_cast %12 : vector<2x8x8x64xf32> to vector<128x64xf32>
    %14 = arith.truncf %13 : vector<128x64xf32> to vector<128x64xbf16>
    %c0_17 = arith.constant 0 : index
    %c192 = arith.constant 192 : index
    %15 = vector.load %arg6[%c0_17, %c192] : memref<128x576xbf16, #tpu.memory_space<vmem>>, vector<128x64xbf16>
    tpu.vector_store %arg6[%c0_17, %c192], %14 {strides = array<i32>} : memref<128x576xbf16, #tpu.memory_space<vmem>>, vector<128x64xbf16>,
    %c0_18 = arith.constant 0 : index
    %c1_19 = arith.constant 1 : index
    %c1_20 = arith.constant 1 : index
    %c0_21 = arith.constant 0 : index
    %16 = vector.load %arg0[%c0_18, %c1_19, %c1_20, %c0_21] : memref<2x10x10x64xf32, #tpu.memory_space<vmem>>, vector<2x8x8x64xf32>
    %17 = vector.shape_cast %16 : vector<2x8x8x64xf32> to vector<128x64xf32>
    %18 = arith.truncf %17 : vector<128x64xf32> to vector<128x64xbf16>
    %c0_22 = arith.constant 0 : index
    %c256 = arith.constant 256 : index
    %19 = vector.load %arg6[%c0_22, %c256] : memref<128x576xbf16, #tpu.memory_space<vmem>>, vector<128x64xbf16>
    tpu.vector_store %arg6[%c0_22, %c256], %18 {strides = array<i32>} : memref<128x576xbf16, #tpu.memory_space<vmem>>, vector<128x64xbf16>,
    %c0_23 = arith.constant 0 : index
    %c1_24 = arith.constant 1 : index
    %c2_25 = arith.constant 2 : index
    %c0_26 = arith.constant 0 : index
    %20 = vector.load %arg0[%c0_23, %c1_24, %c2_25, %c0_26] : memref<2x10x10x64xf32, #tpu.memory_space<vmem>>, vector<2x8x8x64xf32>
    %21 = vector.shape_cast %20 : vector<2x8x8x64xf32> to vector<128x64xf32>
    %22 = arith.truncf %21 : vector<128x64xf32> to vector<128x64xbf16>
    %c0_27 = arith.constant 0 : index
    %c320 = arith.constant 320 : index
    %23 = vector.load %arg6[%c0_27, %c320] : memref<128x576xbf16, #tpu.memory_space<vmem>>, vector<128x64xbf16>
    tpu.vector_store %arg6[%c0_27, %c320], %22 {strides = array<i32>} : memref<128x576xbf16, #tpu.memory_space<vmem>>, vector<128x64xbf16>,
    %c0_28 = arith.constant 0 : index
    %c2_29 = arith.constant 2 : index
    %c0_30 = arith.constant 0 : index
    %c0_31 = arith.constant 0 : index
    %24 = vector.load %arg0[%c0_28, %c2_29, %c0_30, %c0_31] : memref<2x10x10x64xf32, #tpu.memory_space<vmem>>, vector<2x8x8x64xf32>
    %25 = vector.shape_cast %24 : vector<2x8x8x64xf32> to vector<128x64xf32>
    %26 = arith.truncf %25 : vector<128x64xf32> to vector<128x64xbf16>
    %c0_32 = arith.constant 0 : index
    %c384 = arith.constant 384 : index
    %27 = vector.load %arg6[%c0_32, %c384] : memref<128x576xbf16, #tpu.memory_space<vmem>>, vector<128x64xbf16>
    tpu.vector_store %arg6[%c0_32, %c384], %26 {strides = array<i32>} : memref<128x576xbf16, #tpu.memory_space<vmem>>, vector<128x64xbf16>,
    %c0_33 = arith.constant 0 : index
    %c2_34 = arith.constant 2 : index
    %c1_35 = arith.constant 1 : index
    %c0_36 = arith.constant 0 : index
    %28 = vector.load %arg0[%c0_33, %c2_34, %c1_35, %c0_36] : memref<2x10x10x64xf32, #tpu.memory_space<vmem>>, vector<2x8x8x64xf32>
    %29 = vector.shape_cast %28 : vector<2x8x8x64xf32> to vector<128x64xf32>
    %30 = arith.truncf %29 : vector<128x64xf32> to vector<128x64xbf16>
    %c0_37 = arith.constant 0 : index
    %c448 = arith.constant 448 : index
    %31 = vector.load %arg6[%c0_37, %c448] : memref<128x576xbf16, #tpu.memory_space<vmem>>, vector<128x64xbf16>
    tpu.vector_store %arg6[%c0_37, %c448], %30 {strides = array<i32>} : memref<128x576xbf16, #tpu.memory_space<vmem>>, vector<128x64xbf16>,
    %c0_38 = arith.constant 0 : index
    %c2_39 = arith.constant 2 : index
    %c2_40 = arith.constant 2 : index
    %c0_41 = arith.constant 0 : index
    %32 = vector.load %arg0[%c0_38, %c2_39, %c2_40, %c0_41] : memref<2x10x10x64xf32, #tpu.memory_space<vmem>>, vector<2x8x8x64xf32>
    %33 = vector.shape_cast %32 : vector<2x8x8x64xf32> to vector<128x64xf32>
    %34 = arith.truncf %33 : vector<128x64xf32> to vector<128x64xbf16>
    %c0_42 = arith.constant 0 : index
    %c512 = arith.constant 512 : index
    %35 = vector.load %arg6[%c0_42, %c512] : memref<128x576xbf16, #tpu.memory_space<vmem>>, vector<128x64xbf16>
    tpu.vector_store %arg6[%c0_42, %c512], %34 {strides = array<i32>} : memref<128x576xbf16, #tpu.memory_space<vmem>>, vector<128x64xbf16>,
    %c0_43 = arith.constant 0 : index
    %c0_44 = arith.constant 0 : index
    %36 = vector.load %arg6[%c0_43, %c0_44] : memref<128x576xbf16, #tpu.memory_space<vmem>>, vector<128x576xbf16>
    %c0_45 = arith.constant 0 : index
    %c0_46 = arith.constant 0 : index
    %37 = vector.load %arg1[%c0_45, %c0_46] : memref<576x64xbf16, #tpu.memory_space<vmem>>, vector<576x64xbf16>
    %cst = arith.constant dense<0.000000e+00> : vector<128x64xf32>
    %38 = tpu.matmul %36, %37, %cst {dimension_numbers = #tpu.dot_dimension_numbers<[1], [0], [0], [1], [0, 0, 1, 1], [], []>} : vector<128x576xbf16>, vector<576x64xbf16>, vector<128x64xf32> -> vector<128x64xf32>
    %c0_47 = arith.constant 0 : index
    %c0_48 = arith.constant 0 : index
    %39 = vector.load %arg2[%c0_47, %c0_48] : memref<1x64xf32, #tpu.memory_space<vmem>>, vector<1x64xf32>
    %40 = vector.broadcast %39 : vector<1x64xf32> to vector<128x64xf32>
    %41 = arith.addf %38, %40 : vector<128x64xf32>
    %cst_49 = arith.constant 0.000000e+00 : f32
    %42 = vector.broadcast %cst_49 : f32 to vector<128x64xf32>
    %43 = arith.maximumf %41, %42 : vector<128x64xf32>
    %cst_50 = arith.constant 0.000000e+00 : f32
    %44 = vector.broadcast %cst_50 : f32 to vector<2x10x10x64xf32>
    %c0_51 = arith.constant 0 : index
    %c0_52 = arith.constant 0 : index
    %c0_53 = arith.constant 0 : index
    %c0_54 = arith.constant 0 : index
    %45 = vector.load %arg7[%c0_51, %c0_52, %c0_53, %c0_54] : memref<2x10x10x64xf32, #tpu.memory_space<vmem>>, vector<2x10x10x64xf32>
    tpu.vector_store %arg7[%c0_51, %c0_52, %c0_53, %c0_54], %44 {strides = array<i32>} : memref<2x10x10x64xf32, #tpu.memory_space<vmem>>, vector<2x10x10x64xf32>,
    %46 = vector.shape_cast %43 : vector<128x64xf32> to vector<2x8x8x64xf32>
    %c0_55 = arith.constant 0 : index
    %c1_56 = arith.constant 1 : index
    %c1_57 = arith.constant 1 : index
    %c0_58 = arith.constant 0 : index
    %47 = vector.load %arg7[%c0_55, %c1_56, %c1_57, %c0_58] : memref<2x10x10x64xf32, #tpu.memory_space<vmem>>, vector<2x8x8x64xf32>
    tpu.vector_store %arg7[%c0_55, %c1_56, %c1_57, %c0_58], %46 {strides = array<i32>} : memref<2x10x10x64xf32, #tpu.memory_space<vmem>>, vector<2x8x8x64xf32>,
    %c0_59 = arith.constant 0 : index
    %c0_60 = arith.constant 0 : index
    %c0_61 = arith.constant 0 : index
    %c0_62 = arith.constant 0 : index
    %48 = vector.load %arg7[%c0_59, %c0_60, %c0_61, %c0_62] : memref<2x10x10x64xf32, #tpu.memory_space<vmem>>, vector<2x8x8x64xf32>
    %49 = vector.shape_cast %48 : vector<2x8x8x64xf32> to vector<128x64xf32>
    %50 = arith.truncf %49 : vector<128x64xf32> to vector<128x64xbf16>
    %c0_63 = arith.constant 0 : index
    %c0_64 = arith.constant 0 : index
    %51 = vector.load %arg6[%c0_63, %c0_64] : memref<128x576xbf16, #tpu.memory_space<vmem>>, vector<128x64xbf16>
    tpu.vector_store %arg6[%c0_63, %c0_64], %50 {strides = array<i32>} : memref<128x576xbf16, #tpu.memory_space<vmem>>, vector<128x64xbf16>,
    %c0_65 = arith.constant 0 : index
    %c0_66 = arith.constant 0 : index
    %c1_67 = arith.constant 1 : index
    %c0_68 = arith.constant 0 : index
    %52 = vector.load %arg7[%c0_65, %c0_66, %c1_67, %c0_68] : memref<2x10x10x64xf32, #tpu.memory_space<vmem>>, vector<2x8x8x64xf32>
    %53 = vector.shape_cast %52 : vector<2x8x8x64xf32> to vector<128x64xf32>
    %54 = arith.truncf %53 : vector<128x64xf32> to vector<128x64xbf16>
    %c0_69 = arith.constant 0 : index
    %c64_70 = arith.constant 64 : index
    %55 = vector.load %arg6[%c0_69, %c64_70] : memref<128x576xbf16, #tpu.memory_space<vmem>>, vector<128x64xbf16>
    tpu.vector_store %arg6[%c0_69, %c64_70], %54 {strides = array<i32>} : memref<128x576xbf16, #tpu.memory_space<vmem>>, vector<128x64xbf16>,
    %c0_71 = arith.constant 0 : index
    %c0_72 = arith.constant 0 : index
    %c2_73 = arith.constant 2 : index
    %c0_74 = arith.constant 0 : index
    %56 = vector.load %arg7[%c0_71, %c0_72, %c2_73, %c0_74] : memref<2x10x10x64xf32, #tpu.memory_space<vmem>>, vector<2x8x8x64xf32>
    %57 = vector.shape_cast %56 : vector<2x8x8x64xf32> to vector<128x64xf32>
    %58 = arith.truncf %57 : vector<128x64xf32> to vector<128x64xbf16>
    %c0_75 = arith.constant 0 : index
    %c128_76 = arith.constant 128 : index
    %59 = vector.load %arg6[%c0_75, %c128_76] : memref<128x576xbf16, #tpu.memory_space<vmem>>, vector<128x64xbf16>
    tpu.vector_store %arg6[%c0_75, %c128_76], %58 {strides = array<i32>} : memref<128x576xbf16, #tpu.memory_space<vmem>>, vector<128x64xbf16>,
    %c0_77 = arith.constant 0 : index
    %c1_78 = arith.constant 1 : index
    %c0_79 = arith.constant 0 : index
    %c0_80 = arith.constant 0 : index
    %60 = vector.load %arg7[%c0_77, %c1_78, %c0_79, %c0_80] : memref<2x10x10x64xf32, #tpu.memory_space<vmem>>, vector<2x8x8x64xf32>
    %61 = vector.shape_cast %60 : vector<2x8x8x64xf32> to vector<128x64xf32>
    %62 = arith.truncf %61 : vector<128x64xf32> to vector<128x64xbf16>
    %c0_81 = arith.constant 0 : index
    %c192_82 = arith.constant 192 : index
    %63 = vector.load %arg6[%c0_81, %c192_82] : memref<128x576xbf16, #tpu.memory_space<vmem>>, vector<128x64xbf16>
    tpu.vector_store %arg6[%c0_81, %c192_82], %62 {strides = array<i32>} : memref<128x576xbf16, #tpu.memory_space<vmem>>, vector<128x64xbf16>,
    %c0_83 = arith.constant 0 : index
    %c1_84 = arith.constant 1 : index
    %c1_85 = arith.constant 1 : index
    %c0_86 = arith.constant 0 : index
    %64 = vector.load %arg7[%c0_83, %c1_84, %c1_85, %c0_86] : memref<2x10x10x64xf32, #tpu.memory_space<vmem>>, vector<2x8x8x64xf32>
    %65 = vector.shape_cast %64 : vector<2x8x8x64xf32> to vector<128x64xf32>
    %66 = arith.truncf %65 : vector<128x64xf32> to vector<128x64xbf16>
    %c0_87 = arith.constant 0 : index
    %c256_88 = arith.constant 256 : index
    %67 = vector.load %arg6[%c0_87, %c256_88] : memref<128x576xbf16, #tpu.memory_space<vmem>>, vector<128x64xbf16>
    tpu.vector_store %arg6[%c0_87, %c256_88], %66 {strides = array<i32>} : memref<128x576xbf16, #tpu.memory_space<vmem>>, vector<128x64xbf16>,
    %c0_89 = arith.constant 0 : index
    %c1_90 = arith.constant 1 : index
    %c2_91 = arith.constant 2 : index
    %c0_92 = arith.constant 0 : index
    %68 = vector.load %arg7[%c0_89, %c1_90, %c2_91, %c0_92] : memref<2x10x10x64xf32, #tpu.memory_space<vmem>>, vector<2x8x8x64xf32>
    %69 = vector.shape_cast %68 : vector<2x8x8x64xf32> to vector<128x64xf32>
    %70 = arith.truncf %69 : vector<128x64xf32> to vector<128x64xbf16>
    %c0_93 = arith.constant 0 : index
    %c320_94 = arith.constant 320 : index
    %71 = vector.load %arg6[%c0_93, %c320_94] : memref<128x576xbf16, #tpu.memory_space<vmem>>, vector<128x64xbf16>
    tpu.vector_store %arg6[%c0_93, %c320_94], %70 {strides = array<i32>} : memref<128x576xbf16, #tpu.memory_space<vmem>>, vector<128x64xbf16>,
    %c0_95 = arith.constant 0 : index
    %c2_96 = arith.constant 2 : index
    %c0_97 = arith.constant 0 : index
    %c0_98 = arith.constant 0 : index
    %72 = vector.load %arg7[%c0_95, %c2_96, %c0_97, %c0_98] : memref<2x10x10x64xf32, #tpu.memory_space<vmem>>, vector<2x8x8x64xf32>
    %73 = vector.shape_cast %72 : vector<2x8x8x64xf32> to vector<128x64xf32>
    %74 = arith.truncf %73 : vector<128x64xf32> to vector<128x64xbf16>
    %c0_99 = arith.constant 0 : index
    %c384_100 = arith.constant 384 : index
    %75 = vector.load %arg6[%c0_99, %c384_100] : memref<128x576xbf16, #tpu.memory_space<vmem>>, vector<128x64xbf16>
    tpu.vector_store %arg6[%c0_99, %c384_100], %74 {strides = array<i32>} : memref<128x576xbf16, #tpu.memory_space<vmem>>, vector<128x64xbf16>,
    %c0_101 = arith.constant 0 : index
    %c2_102 = arith.constant 2 : index
    %c1_103 = arith.constant 1 : index
    %c0_104 = arith.constant 0 : index
    %76 = vector.load %arg7[%c0_101, %c2_102, %c1_103, %c0_104] : memref<2x10x10x64xf32, #tpu.memory_space<vmem>>, vector<2x8x8x64xf32>
    %77 = vector.shape_cast %76 : vector<2x8x8x64xf32> to vector<128x64xf32>
    %78 = arith.truncf %77 : vector<128x64xf32> to vector<128x64xbf16>
    %c0_105 = arith.constant 0 : index
    %c448_106 = arith.constant 448 : index
    %79 = vector.load %arg6[%c0_105, %c448_106] : memref<128x576xbf16, #tpu.memory_space<vmem>>, vector<128x64xbf16>
    tpu.vector_store %arg6[%c0_105, %c448_106], %78 {strides = array<i32>} : memref<128x576xbf16, #tpu.memory_space<vmem>>, vector<128x64xbf16>,
    %c0_107 = arith.constant 0 : index
    %c2_108 = arith.constant 2 : index
    %c2_109 = arith.constant 2 : index
    %c0_110 = arith.constant 0 : index
    %80 = vector.load %arg7[%c0_107, %c2_108, %c2_109, %c0_110] : memref<2x10x10x64xf32, #tpu.memory_space<vmem>>, vector<2x8x8x64xf32>
    %81 = vector.shape_cast %80 : vector<2x8x8x64xf32> to vector<128x64xf32>
    %82 = arith.truncf %81 : vector<128x64xf32> to vector<128x64xbf16>
    %c0_111 = arith.constant 0 : index
    %c512_112 = arith.constant 512 : index
    %83 = vector.load %arg6[%c0_111, %c512_112] : memref<128x576xbf16, #tpu.memory_space<vmem>>, vector<128x64xbf16>
    tpu.vector_store %arg6[%c0_111, %c512_112], %82 {strides = array<i32>} : memref<128x576xbf16, #tpu.memory_space<vmem>>, vector<128x64xbf16>,
    %c0_113 = arith.constant 0 : index
    %c0_114 = arith.constant 0 : index
    %84 = vector.load %arg6[%c0_113, %c0_114] : memref<128x576xbf16, #tpu.memory_space<vmem>>, vector<128x576xbf16>
    %c0_115 = arith.constant 0 : index
    %c0_116 = arith.constant 0 : index
    %85 = vector.load %arg3[%c0_115, %c0_116] : memref<576x64xbf16, #tpu.memory_space<vmem>>, vector<576x64xbf16>
    %cst_117 = arith.constant dense<0.000000e+00> : vector<128x64xf32>
    %86 = tpu.matmul %84, %85, %cst_117 {dimension_numbers = #tpu.dot_dimension_numbers<[1], [0], [0], [1], [0, 0, 1, 1], [], []>} : vector<128x576xbf16>, vector<576x64xbf16>, vector<128x64xf32> -> vector<128x64xf32>
    %c0_118 = arith.constant 0 : index
    %c1_119 = arith.constant 1 : index
    %c1_120 = arith.constant 1 : index
    %c0_121 = arith.constant 0 : index
    %87 = vector.load %arg0[%c0_118, %c1_119, %c1_120, %c0_121] : memref<2x10x10x64xf32, #tpu.memory_space<vmem>>, vector<2x8x8x64xf32>
    %88 = vector.shape_cast %87 : vector<2x8x8x64xf32> to vector<128x64xf32>
    %c0_122 = arith.constant 0 : index
    %c0_123 = arith.constant 0 : index
    %89 = vector.load %arg4[%c0_122, %c0_123] : memref<1x64xf32, #tpu.memory_space<vmem>>, vector<1x64xf32>
    %90 = vector.broadcast %89 : vector<1x64xf32> to vector<128x64xf32>
    %91 = arith.addf %86, %90 : vector<128x64xf32>
    %92 = arith.addf %91, %88 : vector<128x64xf32>
    %cst_124 = arith.constant 0.000000e+00 : f32
    %93 = vector.broadcast %cst_124 : f32 to vector<128x64xf32>
    %94 = arith.maximumf %92, %93 : vector<128x64xf32>
    %95 = vector.shape_cast %94 : vector<128x64xf32> to vector<2x8x8x64xf32>
    %c0_125 = arith.constant 0 : index
    %c0_126 = arith.constant 0 : index
    %c0_127 = arith.constant 0 : index
    %c0_128 = arith.constant 0 : index
    %96 = vector.load %arg5[%c0_125, %c0_126, %c0_127, %c0_128] : memref<2x8x8x64xf32, #tpu.memory_space<vmem>>, vector<2x8x8x64xf32>
    tpu.vector_store %arg5[%c0_125, %c0_126, %c0_127, %c0_128], %95 {strides = array<i32>} : memref<2x8x8x64xf32, #tpu.memory_space<vmem>>, vector<2x8x8x64xf32>,
    return
  }
}

</mosaic_0001>

<bundles_post_ra>
// kernel: basic_block_forward.1
= control target key start
LH: loop header
LB: loop body
LE: loop exit
PB: predicated region body
PF: predicated region fallthrough
CT: control target
= control target key end

     0   :  { %10 = vsyncpa [#allocation5], 0  ;;  %s6837_s0 = inlined_call_operand.vmem [shape: f32[2,10,10,64], index: 0, kind: input, shape index: {}]   ;;  %s6838_s1 = inlined_call_operand.hbm [shape: bf16[576,64], index: 1, kind: input, shape index: {}]   ;;  %s6839_s2 = inlined_call_operand.vmem [shape: f32[1,64], index: 2, kind: input, shape index: {}, may-alias: {2,4}]   ;;  %s6840_s3 = inlined_call_operand.vmem [shape: bf16[576,64], index: 3, kind: input, shape index: {}]   ;;  %s6841_s4 = inlined_call_operand.vmem [shape: f32[1,64], index: 4, kind: input, shape index: {}, may-alias: {2,4}]   ;;  %s6842_s5 = inlined_call_operand.hbm [shape: f32[2,8,8,64], index: 5, kind: output, shape index: {}]  }
   0x1   :  { %11 = vsyncpa [#allocation6], 0  ;;  %s5286_s18 = smov [#allocation4]  }
   0x2   :  { %s19_s19 = sshll.u32 %s5286_s18, 4  ;;  %s20_s19 = int_to_ptr.vmem [resolvable:$true] %s19_s19 }
   0x3   :  { %s5250_s20 = scalar_lea.vmem %s20_s19, 4608  ;;  %p5255_p1 = scmp.lt.s32.totalorder %s20_s19, %s20_s19 }
   0x4   :  { %p5251_p0 = scmp.ne.s32.totalorder %s20_s19, %s5250_s20  ;;  %p5256_p2 = scmp.lt.s32.totalorder %s5250_s20, %s5250_s20 }
   0x6   :  { %p5257_p3 = por %p5256_p2, %p5255_p1 }
   0x8   :  { %p5258_p4 = pnand %p5257_p3, %p5251_p0 }
   0xa   :  { %5261 = shalt.err (!%p5258_p4)
}
   0xb   :  { %s5287_s21 = smov 64   ;;  %s5288_s22 = smov 4  }
   0xc   :  { %25 = dma.hbm_to_vmem [thread:$0]  %s6838_s1, 4608, %s20_s19, [#allocation5], %s5287_s21, %s5287_s21, %s5288_s22  }
   0xd   :  { %5282 = dma.done.wait [#allocation5], 4608  }
   0xe   :  { %5283 = vsyncadd [#allocation5], 4294962688  ;;  %v3945_v0 = vld [vmem:[%s6837_s0 + $0x10] sm:$0xff]  ;;  %v133_v1 = vld [vmem:[%s6837_s0 + $0x1] sm:$0xff]  ;;  %vm116_vm0 = vcmask 519168   ;;  %vm1575_vm1 = vcmask 523264  }
   0xf   :  { %v3946_v2 = vld [vmem:[%s6837_s0 + $0x20] sm:$0xff]  ;;  %v4515_v3 = vpack.c.bf16 %v3945_v0, %v3945_v0  ;;  %v4483_v4 = vpack.c.bf16 %v133_v1, %v133_v1  ;;  %v134_v6 = vld [vmem:[%s6837_s0 + $0x11] sm:$0xff]  ;;  %vm1908_vm2 = vcmask 517120   ;;  %vm245_vm3 = vcmask 1043968   ;;  %s5290_s6 = smov [#allocation7]  }
  0x10   :  { %v4516_v5 = vpack.c.bf16 %v3946_v2, %v3946_v2  ;;  %v3948_v7 = vld [vmem:[%s6837_s0 + $0x40] sm:$0xff]  ;;  %v3947_v8 = vld [vmem:[%s6837_s0 + $0x30] sm:$0xff]  ;;  %v4484_v9 = vpack.c.bf16 %v134_v6, %v134_v6  ;;  %v5090_v38 = vld [vmem:[#allocation4 + $0x78] sm:$0xff]   ;;  %s3885_s7 = sshll.u32 %s5290_s6, 4  ;;  %s3886_s7 = int_to_ptr.vmem [resolvable:$true] %s3885_s7 }
  0x11   :  { %423 = vrot.lane.b32.xlu1 %v4515_v3, %s5287_s21  ;;  %197 = vrot.lane.b32.xlu0 %v4483_v4, %s5287_s21  ;;  %v136_v10 = vld [vmem:[%s6837_s0 + $0x31] sm:$0xff]  ;;  %v4518_v11 = vpack.c.bf16 %v3948_v7, %v3948_v7  ;;  %v4517_v12 = vpack.c.bf16 %v3947_v8, %v3947_v8  ;;  %v3950_v13 = vld [vmem:[%s6837_s0 + $0x60] sm:$0xff]  ;;  %118 = vst.msk [vmem:[#allocation2 + $0x14] sm:$0xf] %vm116_vm0, %v4515_v3  ;;  %v5094_v4 = vld [vmem:[#allocation4 + $0x68] sm:$0xff]   ;;  %p5267_p6 = scmp.lt.s32.totalorder %s3886_s7, %s3886_s7 }
  0x12   :  { %119 = vst.msk [vmem:[#allocation2 + $0x28] sm:$0xf] %vm116_vm0, %v4516_v5  ;;  %v135_v14 = vld [vmem:[%s6837_s0 + $0x21] sm:$0xff]  ;;  %v5359_v15 = vpack.c.bf16 %v3950_v13, %v3950_v13  ;;  %v3949_v16 = vld [vmem:[%s6837_s0 + $0x50] sm:$0xff]  ;;  %v5371_v19 = vpack.c.bf16 %v136_v10, %v136_v10  ;;  %4755 = vmatprep.subr.bf16.mxu0 %v5090_v38  ;;  %v5091_v59 = vld [vmem:[#allocation4 + $0x38] sm:$0xff]  }
  0x13   :  { %v5364_v17 = vpack.c.bf16 %v3949_v16, %v3949_v16  ;;  %v3951_v18 = vld [vmem:[%s6837_s0 + $0x70] sm:$0xff]  ;;  %120 = vst.msk [vmem:[#allocation2 + $0x3c] sm:$0xf] %vm116_vm0, %v4517_v12  ;;  %121 = vst.msk [vmem:[#allocation2 + $0x50] sm:$0xf] %vm116_vm0, %v4518_v11  ;;  %v3954_v21 = vld [vmem:[%s6837_s0 + $0xc0] sm:$0xff]  ;;  %v5385_v23 = vpack.c.bf16 %v135_v14, %v135_v14  ;;  %4756 = vmatpush3.bf16.msra.mxu0 %v5091_v59 }
  0x14   :  { %v5373_v20 = vpack.c.bf16 %v3951_v18, %v3951_v18  ;;  %v3953_v22 = vld [vmem:[%s6837_s0 + $0xb0] sm:$0xff]  ;;  %123 = vst.msk [vmem:[#allocation2 + $0x78] sm:$0xf] %vm116_vm0, %v5359_v15  ;;  %v5387_v24 = vpack.c.bf16 %v3954_v21, %v3954_v21  ;;  %v3956_v26 = vld [vmem:[%s6837_s0 + $0xe0] sm:$0xff]  ;;  %v5095_v6 = vld [vmem:[#allocation4 + $0x28] sm:$0xff]  }
  0x15   :  { %425 = vrot.lane.b32.xlu1 %v4516_v5, %s5287_s21  ;;  %199 = vrot.lane.b32.xlu0 %v4484_v9, %s5287_s21  ;;  %v5389_v25 = vpack.c.bf16 %v3953_v22, %v3953_v22  ;;  %122 = vst.msk [vmem:[#allocation2 + $0x64] sm:$0xf] %vm116_vm0, %v5364_v17  ;;  %v3955_v27 = vld [vmem:[%s6837_s0 + $0xd0] sm:$0xff]  ;;  %v5401_v28 = vpack.c.bf16 %v3956_v26, %v3956_v26  ;;  %v3958_v30 = vld [vmem:[%s6837_s0 + $0x100] sm:$0xff]  ;;  %v5116_v59 = vld [vmem:[#allocation4 + $0xf8] sm:$0xff]  }
  0x16   :  { %124 = vst.msk [vmem:[#allocation2 + $0x8c] sm:$0xf] %vm116_vm0, %v5373_v20  ;;  %v5403_v29 = vpack.c.bf16 %v3955_v27, %v3955_v27  ;;  %v3957_v31 = vld [vmem:[%s6837_s0 + $0xf0] sm:$0xff]  ;;  %127 = vst.msk [vmem:[#allocation2 + $0xc8] sm:$0xf] %vm116_vm0, %v5387_v24  ;;  %v137_v33 = vld [vmem:[%s6837_s0 + $0x41] sm:$0xff]  ;;  %v5421_v34 = vpack.c.bf16 %v3958_v30, %v3958_v30  ;;  %4819 = vmatprep.subr.bf16.mxu1 %v5116_v59 }
  0x17   :  { %126 = vst.msk [vmem:[#allocation2 + $0xb4] sm:$0xf] %vm116_vm0, %v5389_v25  ;;  %v138_v32 = vld [vmem:[%s6837_s0 + $0x51] sm:$0xff]  ;;  %v5423_v35 = vpack.c.bf16 %v3957_v31, %v3957_v31  ;;  %v4010_v37 = vld [vmem:[%s6837_s0 + $0x22] sm:$0xff]  ;;  %129 = vst.msk [vmem:[#allocation2 + $0xf0] sm:$0xf] %vm116_vm0, %v5401_v28  ;;  %v5483_v53 = vpack.c.bf16 %v137_v33, %v137_v33 }
  0x18   :  { %v3959_v36 = vld [vmem:[%s6837_s0 + $0x110] sm:$0xff]  ;;  %128 = vst.msk [vmem:[#allocation2 + $0xdc] sm:$0xf] %vm116_vm0, %v5403_v29  ;;  %v5441_v40 = vpack.c.bf16 %v4010_v37, %v4010_v37  ;;  %v4012_v42 = vld [vmem:[%s6837_s0 + $0x42] sm:$0xff]  ;;  %131 = vst.msk [vmem:[#allocation2 + $0x118] sm:$0xf] %vm116_vm0, %v5421_v34  ;;  %v5481_v52 = vpack.c.bf16 %v138_v32, %v138_v32 }
  0x19   :  { %203 = vrot.lane.b32.xlu1 %v5371_v19, %s5287_s21  ;;  %201 = vrot.lane.b32.xlu0 %v5385_v23, %s5287_s21  ;;  %v5439_v39 = vpack.c.bf16 %v3959_v36, %v3959_v36  ;;  %v4009_v41 = vld [vmem:[%s6837_s0 + $0x12] sm:$0xff]  ;;  %130 = vst.msk [vmem:[#allocation2 + $0x104] sm:$0xf] %vm116_vm0, %v5423_v35  ;;  %v5458_v45 = vpack.c.bf16 %v4012_v42, %v4012_v42  ;;  %v4014_v47 = vld [vmem:[%s6837_s0 + $0x62] sm:$0xff]  ;;  %v5289_v30 = vmov 0.0  }
  0x1a   :  { %v4011_v43 = vld [vmem:[%s6837_s0 + $0x32] sm:$0xff]  ;;  %v5456_v44 = vpack.c.bf16 %v4009_v41, %v4009_v41  ;;  %v5468_v49 = vpack.c.bf16 %v4014_v47, %v4014_v47  ;;  %344 = vst.msk [vmem:[#allocation2 + $0x2c] sm:$0xf] %vm116_vm0, %v5441_v40  ;;  %v4018_v55 = vld [vmem:[%s6837_s0 + $0xc2] sm:$0xff] }
  0x1b   :  { %v5460_v46 = vpack.c.bf16 %v4011_v43, %v4011_v43  ;;  %v4013_v48 = vld [vmem:[%s6837_s0 + $0x52] sm:$0xff]  ;;  %132 = vst.msk [vmem:[#allocation2 + $0x12c] sm:$0xf] %vm116_vm0, %v5439_v39  ;;  %346 = vst.msk [vmem:[#allocation2 + $0x54] sm:$0xf] %vm116_vm0, %v5458_v45  ;;  %v5499_v57 = vpack.c.bf16 %v4018_v55, %v4018_v55  ;;  %v139_v62 = vld [vmem:[%s6837_s0 + $0x61] sm:$0xff] }
  0x1c   :  { %v5470_v50 = vpack.c.bf16 %v4013_v48, %v4013_v48  ;;  %v4015_v51 = vld [vmem:[%s6837_s0 + $0x72] sm:$0xff]  ;;  %343 = vst.msk [vmem:[#allocation2 + $0x18] sm:$0xf] %vm116_vm0, %v5456_v44  ;;  %348 = vst.msk [vmem:[#allocation2 + $0x7c] sm:$0xf] %vm116_vm0, %v5468_v49  ;;  %v4020_v0 = vld [vmem:[%s6837_s0 + $0xe2] sm:$0xff]  ;;  %v5548_v8 = vpack.c.bf16 %v139_v62, %v139_v62 }
  0x1d   :  { %429 = vrot.lane.b32.xlu1 %v4518_v11, %s5287_s21  ;;  %427 = vrot.lane.b32.xlu0 %v4517_v12, %s5287_s21  ;;  %v5485_v54 = vpack.c.bf16 %v4015_v51, %v4015_v51  ;;  %v4017_v56 = vld [vmem:[%s6837_s0 + $0xb2] sm:$0xff]  ;;  %345 = vst.msk [vmem:[#allocation2 + $0x40] sm:$0xf] %vm116_vm0, %v5460_v46  ;;  %352 = vst.msk [vmem:[#allocation2 + $0xcc] sm:$0xf] %vm116_vm0, %v5499_v57  ;;  %v5526_v1 = vpack.c.bf16 %v4020_v0, %v4020_v0  ;;  %v5538_v5 = vld [vmem:[%s6837_s0 + $0x80] sm:$0xff] }
  0x1e   :  { %v5501_v58 = vpack.c.bf16 %v4017_v56, %v4017_v56  ;;  %347 = vst.msk [vmem:[#allocation2 + $0x68] sm:$0xf] %vm116_vm0, %v5470_v50  ;;  %v5092_v60 = vld [vmem:[#allocation4 + $0x70] sm:$0xff]   ;;  %v4022_v9 = vld [vmem:[%s6837_s0 + $0x102] sm:$0xff]  ;;  %v4522_v22 = vpack.c.bf16 %v5538_v5, %v5538_v5  ;;  %v5098_v27 = vld [vmem:[#allocation4 + $0x58] sm:$0xff]  }
  0x1f   :  { %349 = vst.msk [vmem:[#allocation2 + $0x90] sm:$0xf] %vm116_vm0, %v5485_v54  ;;  %v140_v61 = vld [vmem:[%s6837_s0 + $0x71] sm:$0xff]  ;;  %4757 = vmatprep.subr.bf16.mxu0 %v5092_v60  ;;  %354 = vst.msk [vmem:[#allocation2 + $0xf4] sm:$0xf] %vm116_vm0, %v5526_v1  ;;  %v5096_v11 = vld [vmem:[#allocation4 + $0x60] sm:$0xff]   ;;  %v5556_v12 = vpack.c.bf16 %v4022_v9, %v4022_v9 }
  0x20   :  { %v5093_v63 = vld [vmem:[#allocation4 + $0x30] sm:$0xff]   ;;  %351 = vst.msk [vmem:[#allocation2 + $0xb8] sm:$0xf] %vm116_vm0, %v5501_v58  ;;  %v5546_v7 = vpack.c.bf16 %v140_v61, %v140_v61  ;;  %v262_v14 = vld [vmem:[%s6837_s0 + $0x2] sm:$0xff]  ;;  %v5099_v32 = vld [vmem:[#allocation4 + $0x18] sm:$0xff]  }
  0x21   :  { %207 = vrot.lane.b32.xlu1 %v5481_v52, %s5287_s21  ;;  %205 = vrot.lane.b32.xlu0 %v5483_v53, %s5287_s21  ;;  %v4019_v2 = vld [vmem:[%s6837_s0 + $0xd2] sm:$0xff]  ;;  %v4499_v18 = vpack.c.bf16 %v262_v14, %v262_v14  ;;  %356 = vst.msk [vmem:[#allocation2 + $0x11c] sm:$0xf] %vm116_vm0, %v5556_v12  ;;  %v5584_v26 = vld [vmem:[%s6837_s0 + $0xa1] sm:$0xff] }
  0x22   :  { %v5531_v3 = vpack.c.bf16 %v4019_v2, %v4019_v2  ;;  %4758 = vmatpush3.bf16.msra.mxu0 %v5093_v63  ;;  %v4021_v10 = vld [vmem:[%s6837_s0 + $0xf2] sm:$0xff]  ;;  %1928 = vst.msk [vmem:[#allocation3 + $0xa0] sm:$0xff] %vm1575_vm1, %v5289_v30  ;;  %1907 = vst.msk [vmem:[#allocation3] sm:$0xff] %vm1575_vm1, %v5289_v30  ;;  %v4491_v37 = vpack.c.bf16 %v5584_v26, %v5584_v26  ;;  %v143_v42 = vld [vmem:[%s6837_s0 + $0xc1] sm:$0xff] }
  0x23   :  { %4759 = vmatprep.subr.bf16.mxu0 %v5094_v4  ;;  %v5558_v13 = vpack.c.bf16 %v4021_v10, %v4021_v10  ;;  %v5569_v16 = vld [vmem:[%s6837_s0 + $0xb1] sm:$0xff]  ;;  %342 = vst.msk [vmem:[#allocation2 + $0x4] sm:$0xf] %vm116_vm0, %v4499_v18  ;;  %v44_v43 = vld [vmem:[%s6837_s0 + $0xa0] sm:$0xff]  ;;  %v5102_v48 = vld [vmem:[#allocation4 + $0x48] sm:$0xff]   ;;  %v5664_v63 = vpack.c.bf16 %v143_v42, %v143_v42 }
  0x24   :  { %353 = vst.msk [vmem:[#allocation2 + $0xe0] sm:$0xf] %vm116_vm0, %v5531_v3  ;;  %v4023_v31 = vld [vmem:[%s6837_s0 + $0x112] sm:$0xff]  ;;  %v4492_v36 = vpack.c.bf16 %v5569_v16, %v5569_v16  ;;  %v270_v47 = vld [vmem:[%s6837_s0 + $0xa2] sm:$0xff]  ;;  %v4475_v55 = vpack.c.bf16 %v44_v43, %v44_v43 }
  0x25   :  { %433 = vrot.lane.b32.xlu1 %v5359_v15, %s5287_s21  ;;  %431 = vrot.lane.b32.xlu0 %v5364_v17, %s5287_s21  ;;  %v36_v15 = vld [vmem:[%s6837_s0] sm:$0xff]  ;;  %355 = vst.msk [vmem:[#allocation2 + $0x108] sm:$0xf] %vm116_vm0, %v5558_v13  ;;  %v5631_v33 = vpack.c.bf16 %v4023_v31, %v4023_v31  ;;  %v5100_v38 = vld [vmem:[#allocation4 + $0x50] sm:$0xff]   ;;  %v5103_v51 = vld [vmem:[#allocation4 + $0x8] sm:$0xff]   ;;  %v4507_v56 = vpack.c.bf16 %v270_v47, %v270_v47 }
  0x26   :  { %4760 = vmatpush3.bf16.msra.mxu0 %v5095_v6  ;;  %v5097_v17 = vld [vmem:[#allocation4 + $0x20] sm:$0xff]   ;;  %v4467_v21 = vpack.c.bf16 %v36_v15, %v36_v15  ;;  %1910 = vst.msk [vmem:[#allocation3 + $0x10] sm:$0xff] %vm1575_vm1, %v5289_v30  ;;  %1912 = vst.msk [vmem:[#allocation3 + $0x20] sm:$0xff] %vm1575_vm1, %v5289_v30  ;;  %v144_v41 = vld [vmem:[%s6837_s0 + $0xd1] sm:$0xff] }
  0x27   :  { %4761 = vmatprep.subr.bf16.mxu0 %v5096_v11  ;;  %1914 = vst.msk [vmem:[#allocation3 + $0x30] sm:$0xff] %vm1575_vm1, %v5289_v30  ;;  %1916 = vst.msk [vmem:[#allocation3 + $0x40] sm:$0xff] %vm1575_vm1, %v5289_v30  ;;  %v5104_v60 = vld [vmem:[#allocation4 + $0x40] sm:$0xff]   ;;  %v5117_v61 = vld [vmem:[#allocation4 + $0xb8] sm:$0xff]   ;;  %v5662_v62 = vpack.c.bf16 %v144_v41, %v144_v41 }
  0x28   :  { %117 = vst.msk [vmem:[#allocation2] sm:$0xf] %vm116_vm0, %v4467_v21  ;;  %357 = vst.msk [vmem:[#allocation2 + $0x130] sm:$0xf] %vm116_vm0, %v5631_v33  ;;  %v5118_v0 = vld [vmem:[#allocation4 + $0xf0] sm:$0xff]   ;;  %v5105_v2 = vld [vmem:[#allocation4] sm:$0xff]   ;;  %4820 = vmatpush3.bf16.msra.mxu1 %v5117_v61 }
  0x29   :  { %211 = vrot.lane.b32.xlu1 %v5546_v7, %s5287_s21  ;;  %209 = vrot.lane.b32.xlu0 %v5548_v8, %s5287_s21  ;;  %1918 = vst.msk [vmem:[#allocation3 + $0x50] sm:$0xff] %vm1575_vm1, %v5289_v30  ;;  %1920 = vst.msk [vmem:[#allocation3 + $0x60] sm:$0xff] %vm1575_vm1, %v5289_v30  ;;  %v5119_v4 = vld [vmem:[#allocation4 + $0xb0] sm:$0xff]   ;;  %v5122_v6 = vld [vmem:[#allocation4 + $0xe8] sm:$0xff]  }
  0x2a   :  { %1922 = vst.msk [vmem:[#allocation3 + $0x70] sm:$0xff] %vm1575_vm1, %v5289_v30  ;;  %1924 = vst.msk [vmem:[#allocation3 + $0x80] sm:$0xff] %vm1575_vm1, %v5289_v30  ;;  %4762 = vmatpush3.bf16.msra.mxu0 %v5097_v17  ;;  %v146_v5 = vld [vmem:[%s6837_s0 + $0xf1] sm:$0xff]  ;;  %4821 = vmatprep.subr.bf16.mxu1 %v5118_v0  ;;  %v5123_v9 = vld [vmem:[#allocation4 + $0xa8] sm:$0xff]  }
  0x2b   :  { %1926 = vst.msk [vmem:[#allocation3 + $0x90] sm:$0xff] %vm1575_vm1, %v5289_v30  ;;  %1930 = vst.msk [vmem:[#allocation3 + $0xb0] sm:$0xff] %vm1575_vm1, %v5289_v30  ;;  %4763 = vmatprep.subr.bf16.mxu0 %v5098_v27  ;;  %v5124_v10 = vld [vmem:[#allocation4 + $0xe0] sm:$0xff]   ;;  %v5682_v11 = vpack.c.bf16 %v146_v5, %v146_v5  ;;  %v148_v16 = vld [vmem:[%s6837_s0 + $0x111] sm:$0xff] }
  0x2c   :  { %1932 = vst.msk [vmem:[#allocation3 + $0xc0] sm:$0xff] %vm1575_vm1, %v5289_v30  ;;  %1934 = vst.msk [vmem:[#allocation3 + $0xd0] sm:$0xff] %vm1575_vm1, %v5289_v30  ;;  %4822 = vmatpush3.bf16.msra.mxu1 %v5119_v4  ;;  %v5125_v15 = vld [vmem:[#allocation4 + $0xa0] sm:$0xff]   ;;  %v3977_v21 = vld [vmem:[%s6837_s0 + $0x11] sm:$0xff]  ;;  %v5704_v27 = vpack.c.bf16 %v148_v16, %v148_v16 }
  0x2d   :  { %1936 = vst.msk [vmem:[#allocation3 + $0xe0] sm:$0xff] %vm1575_vm1, %v5289_v30  ;;  %1938 = vst.msk [vmem:[#allocation3 + $0xf0] sm:$0xff] %vm1575_vm1, %v5289_v30  ;;  %437 = vrot.lane.b32.xlu1 %v4522_v22, %s5287_s21  ;;  %435 = vrot.lane.b32.xlu0 %v5373_v20, %s5287_s21  ;;  %v5101_v20 = vld [vmem:[#allocation4 + $0x10] sm:$0xff]   ;;  %v147_v17 = vld [vmem:[%s6837_s0 + $0x101] sm:$0xff]  ;;  %v4531_v26 = vpack.c.bf16 %v3977_v21, %v3977_v21 }
  0x2e   :  { %1940 = vst.msk [vmem:[#allocation3 + $0x100] sm:$0xff] %vm1575_vm1, %v5289_v30  ;;  %1942 = vst.msk [vmem:[#allocation3 + $0x110] sm:$0xff] %vm1575_vm1, %v5289_v30  ;;  %4764 = vmatpush3.bf16.msra.mxu0 %v5099_v32  ;;  %4823 = vmatprep.subr.bf16.mxu1 %v5122_v6  ;;  %v5130_v22 = vld [vmem:[#allocation4 + $0x98] sm:$0xff]   ;;  %v5131_v31 = vld [vmem:[#allocation4 + $0xd0] sm:$0xff]  }
  0x2f   :  { %1944 = vst.msk [vmem:[#allocation3 + $0x120] sm:$0xff] %vm1575_vm1, %v5289_v30  ;;  %1946 = vst.msk [vmem:[#allocation3 + $0x130] sm:$0xff] %vm1575_vm1, %v5289_v30  ;;  %4765 = vmatprep.subr.bf16.mxu0 %v5100_v38  ;;  %v4042_v32 = vld [vmem:[%s6837_s0 + $0x30] sm:$0xff]  ;;  %v3980_v43 = vld [vmem:[%s6837_s0 + $0x41] sm:$0xff] }
  0x30   :  { %1929 = vst.msk [vmem:[#allocation3 + $0xa8] sm:$0x3] %vm1908_vm2, %v5289_v30  ;;  %1909 = vst.msk [vmem:[#allocation3 + $0x8] sm:$0x3] %vm1908_vm2, %v5289_v30  ;;  %4824 = vmatpush3.bf16.msra.mxu1 %v5123_v9  ;;  %v4564_v38 = vpack.c.bf16 %v4042_v32, %v4042_v32  ;;  %v5132_v42 = vld [vmem:[#allocation4 + $0x90] sm:$0xff]   ;;  %v4534_v47 = vpack.c.bf16 %v3980_v43, %v3980_v43  ;;  %v4107_v61 = vld [vmem:[%s6837_s0 + $0x42] sm:$0xff] }
  0x31   :  { %1911 = vst.msk [vmem:[#allocation3 + $0x18] sm:$0x3] %vm1908_vm2, %v5289_v30  ;;  %1913 = vst.msk [vmem:[#allocation3 + $0x28] sm:$0x3] %vm1908_vm2, %v5289_v30  ;;  %215 = vrot.lane.b32.xlu1 %v4492_v36, %s5287_s21  ;;  %213 = vrot.lane.b32.xlu0 %v4491_v37, %s5287_s21  ;;  %v4041_v36 = vld [vmem:[%s6837_s0 + $0x20] sm:$0xff]  ;;  %v5720_v37 = vpack.c.bf16 %v147_v17, %v147_v17  ;;  %v4108_v0 = vld [vmem:[%s6837_s0 + $0x52] sm:$0xff] }
  0x32   :  { %1915 = vst.msk [vmem:[#allocation3 + $0x38] sm:$0x3] %vm1908_vm2, %v5289_v30  ;;  %1917 = vst.msk [vmem:[#allocation3 + $0x48] sm:$0x3] %vm1908_vm2, %v5289_v30  ;;  %4766 = vmatpush3.bf16.msra.mxu0 %v5101_v20  ;;  %4825 = vmatprep.subr.bf16.mxu1 %v5124_v10  ;;  %v4563_v41 = vpack.c.bf16 %v4041_v36, %v4041_v36  ;;  %v5135_v20 = vld [vmem:[#allocation4 + $0xc8] sm:$0xff]   ;;  %v4598_v4 = vpack.c.bf16 %v4108_v0, %v4108_v0  ;;  %v5137_v5 = vld [vmem:[#allocation4 + $0xc0] sm:$0xff]  }
  0x33   :  { %1919 = vst.msk [vmem:[#allocation3 + $0x58] sm:$0x3] %vm1908_vm2, %v5289_v30  ;;  %1921 = vst.msk [vmem:[#allocation3 + $0x68] sm:$0x3] %vm1908_vm2, %v5289_v30  ;;  %4767 = vmatprep.subr.bf16.mxu0 %v5102_v48  ;;  %v4043_v6 = vld [vmem:[%s6837_s0 + $0x40] sm:$0xff]  ;;  %v3981_v17 = vld [vmem:[%s6837_s0 + $0x51] sm:$0xff] }
  0x34   :  { %1923 = vst.msk [vmem:[#allocation3 + $0x78] sm:$0x3] %vm1908_vm2, %v5289_v30  ;;  %1925 = vst.msk [vmem:[#allocation3 + $0x88] sm:$0x3] %vm1908_vm2, %v5289_v30  ;;  %4826 = vmatpush3.bf16.msra.mxu1 %v5125_v15  ;;  %v4565_v10 = vpack.c.bf16 %v4043_v6, %v4043_v6  ;;  %v5138_v15 = vld [vmem:[#allocation4 + $0x80] sm:$0xff]   ;;  %v3983_v36 = vld [vmem:[%s6837_s0 + $0x71] sm:$0xff] }
  0x35   :  { %1927 = vst.msk [vmem:[#allocation3 + $0x98] sm:$0x3] %vm1908_vm2, %v5289_v30  ;;  %1931 = vst.msk [vmem:[#allocation3 + $0xb8] sm:$0x3] %vm1908_vm2, %v5289_v30  ;;  %441 = vrot.lane.b32.xlu1 %v5387_v24, %s5287_s21  ;;  %439 = vrot.lane.b32.xlu0 %v5389_v25, %s5287_s21  ;;  %v145_v24 = vld [vmem:[%s6837_s0 + $0xe1] sm:$0xff]  ;;  %v5672_v25 = vld [vmem:[#allocation4 + $0x118] sm:$0xff]  }
  0x36   :  { %1933 = vst.msk [vmem:[#allocation3 + $0xc8] sm:$0x3] %vm1908_vm2, %v5289_v30  ;;  %1935 = vst.msk [vmem:[#allocation3 + $0xd8] sm:$0x3] %vm1908_vm2, %v5289_v30  ;;  %4768 = vmatpush3.bf16.msra.mxu0 %v5103_v51  ;;  %v5684_v14 = vpack.c.bf16 %v145_v24, %v145_v24  ;;  %v5136_v51 = vld [vmem:[#allocation4 + $0x88] sm:$0xff]   ;;  %v4044_v24 = vld [vmem:[%s6837_s0 + $0x50] sm:$0xff] }
  0x37   :  { %1937 = vst.msk [vmem:[#allocation3 + $0xe8] sm:$0x3] %vm1908_vm2, %v5289_v30  ;;  %1939 = vst.msk [vmem:[#allocation3 + $0xf8] sm:$0x3] %vm1908_vm2, %v5289_v30  ;;  %4769 = vmatprep.subr.bf16.mxu0 %v5104_v60  ;;  %v4566_v9 = vpack.c.bf16 %v4044_v24, %v4044_v24 }
  0x38   :  { %1941 = vst.msk [vmem:[#allocation3 + $0x108] sm:$0x3] %vm1908_vm2, %v5289_v30  ;;  %1943 = vst.msk [vmem:[#allocation3 + $0x118] sm:$0x3] %vm1908_vm2, %v5289_v30 }
  0x39   :  { %1945 = vst.msk [vmem:[#allocation3 + $0x128] sm:$0x3] %vm1908_vm2, %v5289_v30  ;;  %1947 = vst.msk [vmem:[#allocation3 + $0x138] sm:$0x3] %vm1908_vm2, %v5289_v30  ;;  %219 = vrot.lane.b32.xlu1 %v5662_v62, %s5287_s21  ;;  %217 = vrot.lane.b32.xlu0 %v5664_v63, %s5287_s21  ;;  %v3960_v30 = vld [vmem:[%s6837_s0 + $0x120] sm:$0xff] }
  0x3a   :  { %125 = vst.msk [vmem:[#allocation2 + $0xa0] sm:$0xf] %vm116_vm0, %v4475_v55  ;;  %350 = vst.msk [vmem:[#allocation2 + $0xa4] sm:$0xf] %vm116_vm0, %v4507_v56  ;;  %4770 = vmatpush3.bf16.msra.mxu0 %v5105_v2  ;;  %v4105_v55 = vld [vmem:[%s6837_s0 + $0x22] sm:$0xff]  ;;  %v4106_v56 = vld [vmem:[%s6837_s0 + $0x32] sm:$0xff]  ;;  %v4597_v2 = vpack.c.bf16 %v4107_v61, %v4107_v61 }
  0x3b   :  { %5035 = vmatprep.subr.bf16.mxu0 %v5672_v25  ;;  %567 = vst.msk [vmem:[#allocation2 + $0x8] sm:$0xf] %vm116_vm0, %v4531_v26  ;;  %793 = vst.msk [vmem:[#allocation2 + $0x20] sm:$0xf] %vm116_vm0, %v4564_v38  ;;  %v4595_v59 = vpack.c.bf16 %v4105_v55, %v4105_v55  ;;  %v4596_v60 = vpack.c.bf16 %v4106_v56, %v4106_v56  ;;  %v4048_v38 = vld [vmem:[%s6837_s0 + $0x90] sm:$0xff] }
  0x3c   :  { %792 = vst.msk [vmem:[#allocation2 + $0xc] sm:$0xf] %vm116_vm0, %v4563_v41  ;;  %570 = vst.msk [vmem:[#allocation2 + $0x44] sm:$0xf] %vm116_vm0, %v4534_v47  ;;  %v4537_v41 = vpack.c.bf16 %v3983_v36, %v3983_v36  ;;  %v2869_v56 = vld [vmem:[#allocation3 + $0x92] sm:$0xff] }
  0x3d   :  { %445 = vrot.lane.b32.xlu1 %v5401_v28, %s5287_s21  ;;  %443 = vrot.lane.b32.xlu0 %v5403_v29, %s5287_s21  ;;  %v5129_v28 = vld [vmem:[#allocation4 + $0xd8] sm:$0xff]   ;;  %v3978_v29 = vld [vmem:[%s6837_s0 + $0x21] sm:$0xff]  ;;  %1016 = vst.msk [vmem:[#allocation2 + $0x10] sm:$0xf] %vm116_vm0, %v4595_v59  ;;  %1017 = vst.msk [vmem:[#allocation2 + $0x24] sm:$0xf] %vm116_vm0, %v4596_v60  ;;  %v4746_v0 = vpack.c.bf16 %v2869_v56, %v2869_v56 }
  0x3e   :  { %v4532_v18 = vpack.c.bf16 %v3978_v29, %v3978_v29  ;;  %4827 = vmatprep.subr.bf16.mxu1 %v5129_v28  ;;  %1018 = vst.msk [vmem:[#allocation2 + $0x38] sm:$0xf] %vm116_vm0, %v4597_v2  ;;  %1019 = vst.msk [vmem:[#allocation2 + $0x4c] sm:$0xf] %vm116_vm0, %v4598_v4  ;;  %v4046_v28 = vld [vmem:[%s6837_s0 + $0x70] sm:$0xff]  ;;  %v3988_v2 = vld [vmem:[%s6837_s0 + $0xe1] sm:$0xff] }
  0x3f   :  { %4828 = vmatpush3.bf16.msra.mxu1 %v5130_v22  ;;  %795 = vst.msk [vmem:[#allocation2 + $0x48] sm:$0xf] %vm116_vm0, %v4566_v9  ;;  %794 = vst.msk [vmem:[#allocation2 + $0x34] sm:$0xf] %vm116_vm0, %v4565_v10  ;;  %v4568_v29 = vpack.c.bf16 %v4046_v28, %v4046_v28  ;;  %v4110_v22 = vld [vmem:[%s6837_s0 + $0x72] sm:$0xff]  ;;  %v4113_v4 = vld [vmem:[%s6837_s0 + $0xc2] sm:$0xff] }
  0x40   :  { %568 = vst.msk [vmem:[#allocation2 + $0x1c] sm:$0xf] %vm116_vm0, %v4532_v18  ;;  %4829 = vmatprep.subr.bf16.mxu1 %v5131_v31  ;;  %573 = vst.msk [vmem:[#allocation2 + $0x80] sm:$0xf] %vm116_vm0, %v4537_v41  ;;  %v4603_v24 = vpack.c.bf16 %v4113_v4, %v4113_v4  ;;  %v4115_v9 = vld [vmem:[%s6837_s0 + $0xe2] sm:$0xff]  ;;  %v4116_v10 = vld [vmem:[%s6837_s0 + $0xf2] sm:$0xff] }
  0x41   :  { %223 = vrot.lane.b32.xlu1 %v5682_v11, %s5287_s21  ;;  %221 = vrot.lane.b32.xlu0 %v5684_v14, %s5287_s21  ;;  %797 = vst.msk [vmem:[#allocation2 + $0x70] sm:$0xf] %vm116_vm0, %v4568_v29  ;;  %v4056_v36 = vld [vmem:[%s6837_s0 + $0x130] sm:$0xff] }
  0x42   :  { %1024 = vst.msk [vmem:[#allocation2 + $0xb0] sm:$0xf] %vm116_vm0, %v4603_v24 }
  0x43   :  { %4830 = vmatpush3.bf16.msra.mxu1 %v5132_v42  ;;  %v4570_v42 = vpack.c.bf16 %v4048_v38, %v4048_v38 }
  0x44   :  { %4831 = vmatprep.subr.bf16.mxu1 %v5135_v20  ;;  %v4047_v20 = vld [vmem:[%s6837_s0 + $0x80] sm:$0xff] }
  0x45   :  { %449 = vrot.lane.b32.xlu1 %v5421_v34, %s5287_s21  ;;  %447 = vrot.lane.b32.xlu0 %v5423_v35, %s5287_s21  ;;  %v3979_v34 = vld [vmem:[%s6837_s0 + $0x31] sm:$0xff]  ;;  %v4530_v35 = vpack.c.bf16 %v3960_v30, %v3960_v30  ;;  %v4600_v30 = vpack.c.bf16 %v4110_v22, %v4110_v22  ;;  %v4569_v43 = vpack.c.bf16 %v4047_v20, %v4047_v20 }
  0x46   :  { %v4533_v48 = vpack.c.bf16 %v3979_v34, %v3979_v34  ;;  %799 = vst.msk [vmem:[#allocation2 + $0x98] sm:$0xf] %vm116_vm0, %v4570_v42  ;;  %v4578_v20 = vpack.c.bf16 %v4056_v36, %v4056_v36 }
  0x47   :  { %4832 = vmatpush3.bf16.msra.mxu1 %v5136_v51  ;;  %1021 = vst.msk [vmem:[#allocation2 + $0x74] sm:$0xf] %vm116_vm0, %v4600_v30  ;;  %798 = vst.msk [vmem:[#allocation2 + $0x84] sm:$0xf] %vm116_vm0, %v4569_v43  ;;  %v4055_v43 = vld [vmem:[%s6837_s0 + $0x120] sm:$0xff] }
  0x48   :  { %569 = vst.msk [vmem:[#allocation2 + $0x30] sm:$0xf] %vm116_vm0, %v4533_v48  ;;  %4833 = vmatprep.subr.bf16.mxu1 %v5137_v5  ;;  %v4542_v5 = vpack.c.bf16 %v3988_v2, %v3988_v2  ;;  %807 = vst.msk [vmem:[#allocation2 + $0x138] sm:$0xf] %vm116_vm0, %v4578_v20 }
  0x49   :  { %227 = vrot.lane.b32.xlu1 %v5704_v27, %s5287_s21  ;;  %225 = vrot.lane.b32.xlu0 %v5720_v37, %s5287_s21 }
  0x4a   :  { %578 = vst.msk [vmem:[#allocation2 + $0xe4] sm:$0xf] %vm116_vm0, %v4542_v5 }
  0x4b   :  { %4834 = vmatpush3.bf16.msra.mxu1 %v5138_v15  ;;  %v3987_v15 = vld [vmem:[%s6837_s0 + $0xd1] sm:$0xff] }
  0x4c   :  { %v4541_v28 = vpack.c.bf16 %v3987_v15, %v3987_v15 }
  0x4d   :  { %453 = vrot.lane.b32.xlu1 %v4530_v35, %s5287_s21  ;;  %451 = vrot.lane.b32.xlu0 %v5439_v39, %s5287_s21  ;;  %v3982_v39 = vld [vmem:[%s6837_s0 + $0x61] sm:$0xff] }
  0x4e   :  { %v4536_v16 = vpack.c.bf16 %v3982_v39, %v3982_v39  ;;  %v3986_v35 = vld [vmem:[%s6837_s0 + $0xc1] sm:$0xff]  ;;  %v4052_v39 = vld [vmem:[%s6837_s0 + $0xf0] sm:$0xff]  ;;  %577 = vst.msk [vmem:[#allocation2 + $0xd0] sm:$0xf] %vm116_vm0, %v4541_v28 }
  0x4f   :  { %v4540_v47 = vpack.c.bf16 %v3986_v35, %v3986_v35 }
  0x50   :  { %572 = vst.msk [vmem:[#allocation2 + $0x6c] sm:$0xf] %vm116_vm0, %v4536_v16  ;;  %v4605_v16 = vpack.c.bf16 %v4115_v9, %v4115_v9 }
  0x51   :  { %649 = vrot.lane.b32.xlu1 %v5441_v40, %s5287_s21  ;;  %647 = vrot.lane.b32.xlu0 %v5456_v44, %s5287_s21  ;;  %v4045_v40 = vld [vmem:[%s6837_s0 + $0x60] sm:$0xff]  ;;  %v4535_v44 = vpack.c.bf16 %v3981_v17, %v3981_v17  ;;  %576 = vst.msk [vmem:[#allocation2 + $0xbc] sm:$0xf] %vm116_vm0, %v4540_v47  ;;  %v4606_v17 = vpack.c.bf16 %v4116_v10, %v4116_v10 }
  0x52   :  { %v4567_v18 = vpack.c.bf16 %v4045_v40, %v4045_v40  ;;  %v4574_v40 = vpack.c.bf16 %v4052_v39, %v4052_v39  ;;  %1026 = vst.msk [vmem:[#allocation2 + $0xd8] sm:$0xf] %vm116_vm0, %v4605_v16  ;;  %v5139_v39 = vld [vmem:[#allocation4 + $0x100] sm:$0xff]  }
  0x53   :  { %571 = vst.msk [vmem:[#allocation2 + $0x58] sm:$0xf] %vm116_vm0, %v4535_v44  ;;  %v4051_v44 = vld [vmem:[%s6837_s0 + $0xe0] sm:$0xff]  ;;  %1027 = vst.msk [vmem:[#allocation2 + $0xec] sm:$0xf] %vm116_vm0, %v4606_v17 }
  0x54   :  { %796 = vst.msk [vmem:[#allocation2 + $0x5c] sm:$0xf] %vm116_vm0, %v4567_v18  ;;  %v4573_v29 = vpack.c.bf16 %v4051_v44, %v4051_v44  ;;  %803 = vst.msk [vmem:[#allocation2 + $0xe8] sm:$0xf] %vm116_vm0, %v4574_v40  ;;  %v3990_v18 = vld [vmem:[%s6837_s0 + $0x101] sm:$0xff] }
  0x55   :  { %874 = vrot.lane.b32.xlu1 %v5371_v19, %s5287_s21  ;;  %872 = vrot.lane.b32.xlu0 %v5385_v23, %s5287_s21  ;;  %v3984_v19 = vld [vmem:[%s6837_s0 + $0x81] sm:$0xff] }
  0x56   :  { %v4109_v23 = vld [vmem:[%s6837_s0 + $0x62] sm:$0xff]  ;;  %v4538_v21 = vpack.c.bf16 %v3984_v19, %v3984_v19  ;;  %802 = vst.msk [vmem:[#allocation2 + $0xd4] sm:$0xf] %vm116_vm0, %v4573_v29  ;;  %v4544_v19 = vpack.c.bf16 %v3990_v18, %v3990_v18 }
  0x57   :  { %v4599_v26 = vpack.c.bf16 %v4109_v23, %v4109_v23  ;;  %v3989_v23 = vld [vmem:[%s6837_s0 + $0xf1] sm:$0xff] }
  0x58   :  { %574 = vst.msk [vmem:[#allocation2 + $0x94] sm:$0xf] %vm116_vm0, %v4538_v21  ;;  %580 = vst.msk [vmem:[#allocation2 + $0x10c] sm:$0xf] %vm116_vm0, %v4544_v19  ;;  %v4053_v21 = vld [vmem:[%s6837_s0 + $0x100] sm:$0xff] }
  0x59   :  { %653 = vrot.lane.b32.xlu1 %v5458_v45, %s5287_s21  ;;  %651 = vrot.lane.b32.xlu0 %v5460_v46, %s5287_s21  ;;  %v4111_v45 = vld [vmem:[%s6837_s0 + $0x82] sm:$0xff]  ;;  %v4112_v46 = vld [vmem:[%s6837_s0 + $0x92] sm:$0xff]  ;;  %1020 = vst.msk [vmem:[#allocation2 + $0x60] sm:$0xf] %vm116_vm0, %v4599_v26  ;;  %v4575_v26 = vpack.c.bf16 %v4053_v21, %v4053_v21 }
  0x5a   :  { %v4601_v31 = vpack.c.bf16 %v4111_v45, %v4111_v45  ;;  %v4602_v32 = vpack.c.bf16 %v4112_v46, %v4112_v46  ;;  %v4117_v45 = vld [vmem:[%s6837_s0 + $0x102] sm:$0xff]  ;;  %v4118_v46 = vld [vmem:[%s6837_s0 + $0x112] sm:$0xff] }
  0x5b   :  { %804 = vst.msk [vmem:[#allocation2 + $0xfc] sm:$0xf] %vm116_vm0, %v4575_v26  ;;  %v4607_v30 = vpack.c.bf16 %v4117_v45, %v4117_v45 }
  0x5c   :  { %1022 = vst.msk [vmem:[#allocation2 + $0x88] sm:$0xf] %vm116_vm0, %v4601_v31  ;;  %1023 = vst.msk [vmem:[#allocation2 + $0x9c] sm:$0xf] %vm116_vm0, %v4602_v32  ;;  %v4608_v31 = vpack.c.bf16 %v4118_v46, %v4118_v46  ;;  %v3991_v32 = vld [vmem:[%s6837_s0 + $0x111] sm:$0xff] }
  0x5d   :  { %878 = vrot.lane.b32.xlu1 %v5481_v52, %s5287_s21  ;;  %876 = vrot.lane.b32.xlu0 %v5483_v53, %s5287_s21  ;;  %v4016_v52 = vld [vmem:[%s6837_s0 + $0x82] sm:$0xff]  ;;  %v4080_v53 = vld [vmem:[%s6837_s0 + $0x91] sm:$0xff]  ;;  %v4545_v42 = vpack.c.bf16 %v3991_v32, %v3991_v32  ;;  %1028 = vst.msk [vmem:[#allocation2 + $0x100] sm:$0xf] %vm116_vm0, %v4607_v30 }
  0x5e   :  { %v4554_v34 = vpack.c.bf16 %v4016_v52, %v4016_v52  ;;  %v4586_v59 = vpack.c.bf16 %v4080_v53, %v4080_v53  ;;  %1029 = vst.msk [vmem:[#allocation2 + $0x114] sm:$0xf] %vm116_vm0, %v4608_v31  ;;  %v4577_v52 = vpack.c.bf16 %v4055_v43, %v4055_v43 }
  0x5f   :  { %581 = vst.msk [vmem:[#allocation2 + $0x120] sm:$0xf] %vm116_vm0, %v4545_v42 }
  0x60   :  { %806 = vst.msk [vmem:[#allocation2 + $0x124] sm:$0xf] %vm116_vm0, %v4577_v52 }
  0x61   :  { %657 = vrot.lane.b32.xlu1 %v5468_v49, %s5287_s21  ;;  %655 = vrot.lane.b32.xlu0 %v5470_v50, %s5287_s21  ;;  %v3985_v49 = vld [vmem:[%s6837_s0 + $0xb1] sm:$0xff]  ;;  %v4079_v50 = vld [vmem:[%s6837_s0 + $0x81] sm:$0xff] }
  0x62   :  { %v4539_v48 = vpack.c.bf16 %v3985_v49, %v3985_v49  ;;  %v4585_v60 = vpack.c.bf16 %v4079_v50, %v4079_v50  ;;  %v2877_v50 = vld [vmem:[#allocation3 + $0x132] sm:$0xff] }
  0x63   :  { %v5863_v61 = vld [vmem:[#allocation2 + $0x88] ss:$20 sps:$4 sm:$0xff]   ;;  %v4754_v47 = vpack.c.bf16 %v2877_v50, %v2877_v50 }
  0x64   :  { %575 = vst.msk [vmem:[#allocation2 + $0xa8] sm:$0xf] %vm116_vm0, %v4539_v48  ;;  %2949 = vst.msk [vmem:[#allocation2 + $0x9c] sm:$0xf] %vm116_vm0, %v4746_v0  ;;  %v5115_v0 = vld [vmem:[#allocation4 + $0x110] sm:$0xff]  }
  0x65   :  { %882 = vrot.lane.b32.xlu1 %v5546_v7, %s5287_s21  ;;  %880 = vrot.lane.b32.xlu0 %v5548_v8, %s5287_s21  ;;  %v4050_v7 = vld [vmem:[%s6837_s0 + $0xd0] sm:$0xff]  ;;  %v4049_v8 = vld [vmem:[%s6837_s0 + $0xc0] sm:$0xff] }
  0x66   :  { %v4572_v51 = vpack.c.bf16 %v4050_v7, %v4050_v7  ;;  %v4571_v55 = vpack.c.bf16 %v4049_v8, %v4049_v8 }
  0x68   :  { %801 = vst.msk [vmem:[#allocation2 + $0xc0] sm:$0xf] %vm116_vm0, %v4572_v51  ;;  %800 = vst.msk [vmem:[#allocation2 + $0xac] sm:$0xf] %vm116_vm0, %v4571_v55 }
  0x69   :  { %661 = vrot.lane.b32.xlu1 %v4554_v34, %s5287_s21  ;;  %659 = vrot.lane.b32.xlu0 %v5485_v54, %s5287_s21  ;;  %v4114_v54 = vld [vmem:[%s6837_s0 + $0xd2] sm:$0xff]  ;;  %v4087_v34 = vld [vmem:[%s6837_s0 + $0x121] sm:$0xff] }
  0x6a   :  { %v4604_v6 = vpack.c.bf16 %v4114_v54, %v4114_v54  ;;  %v5126_v54 = vld [vmem:[#allocation4 + $0x108] sm:$0xff]  }
  0x6c   :  { %1025 = vst.msk [vmem:[#allocation2 + $0xc4] sm:$0xf] %vm116_vm0, %v4604_v6 }
  0x6d   :  { %886 = vrot.lane.b32.xlu1 %v4586_v59, %s5287_s21  ;;  %884 = vrot.lane.b32.xlu0 %v4585_v60, %s5287_s21 }
  0x71   :  { %665 = vrot.lane.b32.xlu1 %v5499_v57, %s5287_s21  ;;  %663 = vrot.lane.b32.xlu0 %v5501_v58, %s5287_s21  ;;  %v4543_v57 = vpack.c.bf16 %v3989_v23, %v3989_v23  ;;  %v4054_v58 = vld [vmem:[%s6837_s0 + $0x110] sm:$0xff] }
  0x72   :  { %v4576_v22 = vpack.c.bf16 %v4054_v58, %v4054_v58 }
  0x73   :  { %579 = vst.msk [vmem:[#allocation2 + $0xf8] sm:$0xf] %vm116_vm0, %v4543_v57 }
  0x74   :  { %805 = vst.msk [vmem:[#allocation2 + $0x110] sm:$0xf] %vm116_vm0, %v4576_v22 }
  0x75   :  { %890 = vrot.lane.b32.xlu1 %v5662_v62, %s5287_s21  ;;  %888 = vrot.lane.b32.xlu0 %v5664_v63, %s5287_s21  ;;  %v3992_v62 = vld [vmem:[%s6837_s0 + $0x121] sm:$0xff] }
  0x76   :  { %v4546_v63 = vpack.c.bf16 %v3992_v62, %v3992_v62 }
  0x78   :  { %582 = vst.msk [vmem:[#allocation2 + $0x134] sm:$0xf] %vm116_vm0, %v4546_v63  ;;  %v2197_v63 = vld [vmem:[#allocation3 + $0xa2] sm:$0xff] }
  0x79   :  { %669 = vrot.lane.b32.xlu1 %v5526_v1, %s5287_s21  ;;  %667 = vrot.lane.b32.xlu0 %v5531_v3, %s5287_s21  ;;  %v4119_v1 = vld [vmem:[%s6837_s0 + $0x122] sm:$0xff]  ;;  %v4120_v3 = vld [vmem:[%s6837_s0 + $0x132] sm:$0xff]  ;;  %v4651_v30 = vpack.c.bf16 %v2197_v63, %v2197_v63 }
  0x7a   :  { %v4609_v38 = vpack.c.bf16 %v4119_v1, %v4119_v1  ;;  %v4610_v41 = vpack.c.bf16 %v4120_v3, %v4120_v3 }
  0x7c   :  { %1030 = vst.msk [vmem:[#allocation2 + $0x128] sm:$0xf] %vm116_vm0, %v4609_v38  ;;  %1031 = vst.msk [vmem:[#allocation2 + $0x13c] sm:$0xf] %vm116_vm0, %v4610_v41 }
  0x7d   :  { %894 = vrot.lane.b32.xlu1 %v5682_v11, %s5287_s21  ;;  %892 = vrot.lane.b32.xlu0 %v5684_v14, %s5287_s21  ;;  %v4024_v11 = vld [vmem:[%s6837_s0 + $0x122] sm:$0xff] }
  0x81   :  { %673 = vrot.lane.b32.xlu1 %v5556_v12, %s5287_s21  ;;  %671 = vrot.lane.b32.xlu0 %v5558_v13, %s5287_s21  ;;  %v4562_v12 = vpack.c.bf16 %v4024_v11, %v4024_v11  ;;  %v4088_v13 = vld [vmem:[%s6837_s0 + $0x131] sm:$0xff] }
  0x83   :  { %v424_v14 = vpop.permute.xlu1 %423  ;;  %v198_v53 = vpop.permute.xlu0 %197  ;;  %v5988_v48 = vld [vmem:[#allocation2 + $0x128] ss:$20 sps:$4 sm:$0xff]  }
  0x84   :  { %471 = vst.msk [vmem:[#allocation2 + $0x4] sm:$0xf] %vm245_vm3, %v424_v14  ;;  %246 = vst.msk [vmem:[#allocation2] sm:$0xf] %vm245_vm3, %v198_v53 }
  0x85   :  { %898 = vrot.lane.b32.xlu1 %v5704_v27, %s5287_s21  ;;  %896 = vrot.lane.b32.xlu0 %v5720_v37, %s5287_s21  ;;  %v4594_v27 = vpack.c.bf16 %v4088_v13, %v4088_v13  ;;  %v4593_v37 = vpack.c.bf16 %v4087_v34, %v4087_v34  ;;  %2957 = vst.msk [vmem:[#allocation2 + $0x13c] sm:$0xf] %vm116_vm0, %v4754_v47 }
  0x87   :  { %v426_v35 = vpop.permute.xlu1 %425  ;;  %v200_v49 = vpop.permute.xlu0 %199 }
  0x88   :  { %472 = vst.msk [vmem:[#allocation2 + $0x18] sm:$0xf] %vm245_vm3, %v426_v35  ;;  %247 = vst.msk [vmem:[#allocation2 + $0x14] sm:$0xf] %vm245_vm3, %v200_v49 }
  0x89   :  { %677 = vrot.lane.b32.xlu1 %v4562_v12, %s5287_s21  ;;  %675 = vrot.lane.b32.xlu0 %v5631_v33, %s5287_s21 }
  0x8b   :  { %v204_v7 = vpop.permute.xlu1 %203  ;;  %v202_v8 = vpop.permute.xlu0 %201  ;;  %v1032_v33 = vld [vmem:[#allocation2] sm:$0xff] }
  0x8c   :  { %249 = vst.msk [vmem:[#allocation2 + $0x3c] sm:$0xf] %vm245_vm3, %v204_v7  ;;  %248 = vst.msk [vmem:[#allocation2 + $0x28] sm:$0xf] %vm245_vm3, %v202_v8 }
  0x8d   :  { %902 = vrot.lane.b32.xlu1 %v4594_v27, %s5287_s21  ;;  %900 = vrot.lane.b32.xlu0 %v4593_v37, %s5287_s21 }
  0x8f   :  { %v430_v51 = vpop.permute.xlu1 %429  ;;  %v428_v55 = vpop.permute.xlu0 %427  ;;  %v1035_v56 = vld [vmem:[#allocation2 + $0x14] sm:$0xff] }
  0x90   :  { %v5106_v59 = vld [vmem:[#allocation2 + $0x4] ss:$20 sps:$4 sm:$0xff]   ;;  %474 = vst.msk [vmem:[#allocation2 + $0x40] sm:$0xf] %vm245_vm3, %v430_v51  ;;  %473 = vst.msk [vmem:[#allocation2 + $0x2c] sm:$0xf] %vm245_vm3, %v428_v55  ;;  %v4138_v60 = vcombine.low %v1032_v33, %v1035_v56 }
  0x91   :  { %1632 = vmatprep.mubr.bf16.mxu0 %v5106_v59 }
  0x92   :  { %1633 = vmatmul.mubr.bf16.vlgmr.msra.gmra.mxu0 %v4138_v60  ;;  %v5142_v60 = vld [vmem:[#allocation2 + $0x10] ss:$20 sps:$4 sm:$0xff]  }
  0x93   :  { %v208_v2 = vpop.permute.xlu1 %207  ;;  %v206_v4 = vpop.permute.xlu0 %205  ;;  %5036 = vmatpush3.bf16.msra.mxu0 %v5672_v25 }
  0x94   :  { %251 = vst.msk [vmem:[#allocation2 + $0x64] sm:$0xf] %vm245_vm3, %v208_v2  ;;  %250 = vst.msk [vmem:[#allocation2 + $0x50] sm:$0xf] %vm245_vm3, %v206_v4  ;;  %5037 = vmatprep.subr.bf16.mxu0 %v5115_v0  ;;  %v5143_v4 = vld [vmem:[#allocation2 + $0x38] ss:$20 sps:$4 sm:$0xff]  }
  0x97   :  { %v434_v5 = vpop.permute.xlu1 %433  ;;  %v432_v24 = vpop.permute.xlu0 %431  ;;  %v1038_v6 = vld [vmem:[#allocation2 + $0x28] sm:$0xff]  ;;  %v1041_v9 = vld [vmem:[#allocation2 + $0x3c] sm:$0xff]  ;;  %5038 = vmatpush3.bf16.msra.mxu0 %v5115_v0 }
  0x98   :  { %v5108_v10 = vld [vmem:[#allocation2 + $0x2c] ss:$20 sps:$4 sm:$0xff]   ;;  %476 = vst.msk [vmem:[#allocation2 + $0x68] sm:$0xf] %vm245_vm3, %v434_v5  ;;  %475 = vst.msk [vmem:[#allocation2 + $0x54] sm:$0xf] %vm245_vm3, %v432_v24  ;;  %v4143_v15 = vcombine.low %v1038_v6, %v1041_v9  ;;  %5039 = vmatprep.subr.bf16.mxu0 %v5126_v54 }
  0x99   :  { %1640 = vmatprep.mubr.bf16.mxu0 %v5108_v10 }
  0x9a   :  { %1641 = vmatmul.mubr.bf16.gmra.mxu0 %v4143_v15  ;;  %v5148_v15 = vld [vmem:[#allocation2 + $0x60] ss:$20 sps:$4 sm:$0xff]  }
  0x9b   :  { %v212_v25 = vpop.permute.xlu1 %211  ;;  %v210_v16 = vpop.permute.xlu0 %209  ;;  %5040 = vmatpush3.bf16.msra.mxu0 %v5126_v54 }
  0x9c   :  { %253 = vst.msk [vmem:[#allocation2 + $0x8c] sm:$0xf] %vm245_vm3, %v212_v25  ;;  %252 = vst.msk [vmem:[#allocation2 + $0x78] sm:$0xf] %vm245_vm3, %v210_v16  ;;  %5041 = vmatprep.subr.bf16.mxu0 %v5139_v39 }
  0x9f   :  { %v438_v17 = vpop.permute.xlu1 %437  ;;  %v436_v28 = vpop.permute.xlu0 %435  ;;  %v1044_v40 = vld [vmem:[#allocation2 + $0x50] sm:$0xff]  ;;  %v1047_v44 = vld [vmem:[#allocation2 + $0x64] sm:$0xff]  ;;  %5042 = vmatpush3.bf16.msra.mxu0 %v5139_v39 }
  0xa0   :  { %v5111_v29 = vld [vmem:[#allocation2 + $0x54] ss:$20 sps:$4 sm:$0xff]   ;;  %478 = vst.msk [vmem:[#allocation2 + $0x90] sm:$0xf] %vm245_vm3, %v438_v17  ;;  %477 = vst.msk [vmem:[#allocation2 + $0x7c] sm:$0xf] %vm245_vm3, %v436_v28  ;;  %v4148_v18 = vcombine.low %v1044_v40, %v1047_v44 }
  0xa1   :  { %1648 = vmatprep.mubr.bf16.mxu0 %v5111_v29 }
  0xa2   :  { %1649 = vmatmul.mubr.bf16.gmra.mxu0 %v4148_v18  ;;  %v5152_v18 = vld [vmem:[#allocation2 + $0xb0] ss:$20 sps:$4 sm:$0xff]  }
  0xa3   :  { %v216_v19 = vpop.permute.xlu1 %215  ;;  %v214_v23 = vpop.permute.xlu0 %213 }
  0xa4   :  { %255 = vst.msk [vmem:[#allocation2 + $0xb4] sm:$0xf] %vm245_vm3, %v216_v19  ;;  %254 = vst.msk [vmem:[#allocation2 + $0xa0] sm:$0xf] %vm245_vm3, %v214_v23 }
  0xa7   :  { %v442_v57 = vpop.permute.xlu1 %441  ;;  %v440_v58 = vpop.permute.xlu0 %439  ;;  %v1050_v21 = vld [vmem:[#allocation2 + $0x78] sm:$0xff]  ;;  %v1053_v22 = vld [vmem:[#allocation2 + $0x8c] sm:$0xff] }
  0xa8   :  { %v5113_v26 = vld [vmem:[#allocation2 + $0x7c] ss:$20 sps:$4 sm:$0xff]   ;;  %480 = vst.msk [vmem:[#allocation2 + $0xb8] sm:$0xf] %vm245_vm3, %v442_v57  ;;  %479 = vst.msk [vmem:[#allocation2 + $0xa4] sm:$0xf] %vm245_vm3, %v440_v58  ;;  %v4153_v62 = vcombine.low %v1050_v21, %v1053_v22 }
  0xa9   :  { %1656 = vmatprep.mubr.bf16.mxu0 %v5113_v26  ;;  %v5153_v57 = vld [vmem:[#allocation2 + $0xd8] ss:$20 sps:$4 sm:$0xff]  }
  0xaa   :  { %1657 = vmatmul.mubr.bf16.gmra.mxu0 %v4153_v62 }
  0xab   :  { %v220_v45 = vpop.permute.xlu1 %219  ;;  %v218_v46 = vpop.permute.xlu0 %217 }
  0xac   :  { %257 = vst.msk [vmem:[#allocation2 + $0xdc] sm:$0xf] %vm245_vm3, %v220_v45  ;;  %256 = vst.msk [vmem:[#allocation2 + $0xc8] sm:$0xf] %vm245_vm3, %v218_v46  ;;  %v5159_v45 = vld [vmem:[#allocation2 + $0x100] ss:$20 sps:$4 sm:$0xff]  }
  0xad   :  { %v2645_v46 = vld [vmem:[#allocation3 + $0x90] sm:$0xff] }
  0xaf   :  { %v1056_v31 = vld [vmem:[#allocation2 + $0xa0] sm:$0xff]  ;;  %v446_v1 = vpop.permute.xlu1 %445  ;;  %v444_v3 = vpop.permute.xlu0 %443  ;;  %v1059_v32 = vld [vmem:[#allocation2 + $0xb4] sm:$0xff] }
  0xb0   :  { %2277 = vst.msk [vmem:[#allocation2 + $0xa4] sm:$0xf] %vm116_vm0, %v4651_v30  ;;  %v4159_v36 = vcombine.high %v1056_v31, %v1059_v32  ;;  %v4158_v38 = vcombine.low %v1056_v31, %v1059_v32  ;;  %v4714_v31 = vpack.c.bf16 %v2645_v46, %v2645_v46 }
  0xb1   :  { %482 = vst.msk [vmem:[#allocation2 + $0xe0] sm:$0xf] %vm245_vm3, %v446_v1  ;;  %481 = vst.msk [vmem:[#allocation2 + $0xcc] sm:$0xf] %vm245_vm3, %v444_v3 }
  0xb2   :  { %1664 = vmatprep.mubr.bf16.mxu0 %v4159_v36 }
  0xb3   :  { %v224_v41 = vpop.permute.xlu1 %223  ;;  %v222_v42 = vpop.permute.xlu0 %221  ;;  %1665 = vmatmul.mubr.bf16.gmra.mxu0 %v4158_v38 }
  0xb4   :  { %259 = vst.msk [vmem:[#allocation2 + $0x104] sm:$0xf] %vm245_vm3, %v224_v41  ;;  %258 = vst.msk [vmem:[#allocation2 + $0xf0] sm:$0xf] %vm245_vm3, %v222_v42 }
  0xb7   :  { %v450_v20 = vpop.permute.xlu1 %449  ;;  %v448_v43 = vpop.permute.xlu0 %447 }
  0xb8   :  { %v1062_v52 = vld [vmem:[#allocation2 + $0xc8] sm:$0xff]  ;;  %v1065_v11 = vld [vmem:[#allocation2 + $0xdc] sm:$0xff]  ;;  %484 = vst.msk [vmem:[#allocation2 + $0x108] sm:$0xf] %vm245_vm3, %v450_v20  ;;  %483 = vst.msk [vmem:[#allocation2 + $0xf4] sm:$0xf] %vm245_vm3, %v448_v43 }
  0xb9   :  { %v5120_v14 = vld [vmem:[#allocation2 + $0xcc] ss:$20 sps:$4 sm:$0xff]   ;;  %v4163_v53 = vcombine.low %v1062_v52, %v1065_v11 }
  0xba   :  { %1672 = vmatprep.mubr.bf16.mxu0 %v5120_v14 }
  0xbb   :  { %v228_v12 = vpop.permute.xlu1 %227  ;;  %v226_v13 = vpop.permute.xlu0 %225  ;;  %1673 = vmatmul.mubr.bf16.gmra.mxu0 %v4163_v53 }
  0xbc   :  { %261 = vst.msk [vmem:[#allocation2 + $0x12c] sm:$0xf] %vm245_vm3, %v228_v12  ;;  %260 = vst.msk [vmem:[#allocation2 + $0x118] sm:$0xf] %vm245_vm3, %v226_v13 }
  0xbf   :  { %v454_v34 = vpop.permute.xlu1 %453  ;;  %v452_v35 = vpop.permute.xlu0 %451  ;;  %v1068_v49 = vld [vmem:[#allocation2 + $0xf0] sm:$0xff]  ;;  %v1071_v50 = vld [vmem:[#allocation2 + $0x104] sm:$0xff] }
  0xc0   :  { %v5127_v27 = vld [vmem:[#allocation2 + $0xf4] ss:$20 sps:$4 sm:$0xff]   ;;  %486 = vst.msk [vmem:[#allocation2 + $0x130] sm:$0xf] %vm245_vm3, %v454_v34  ;;  %485 = vst.msk [vmem:[#allocation2 + $0x11c] sm:$0xf] %vm245_vm3, %v452_v35  ;;  %v4168_v37 = vcombine.low %v1068_v49, %v1071_v50 }
  0xc1   :  { %1680 = vmatprep.mubr.bf16.mxu0 %v5127_v27 }
  0xc3   :  { %v650_v47 = vpop.permute.xlu1 %649  ;;  %v648_v7 = vpop.permute.xlu0 %647  ;;  %1681 = vmatmul.mubr.bf16.gmra.mxu0 %v4168_v37 }
  0xc4   :  { %696 = vst.msk [vmem:[#allocation2 + $0x1c] sm:$0xf] %vm245_vm3, %v650_v47  ;;  %695 = vst.msk [vmem:[#allocation2 + $0x8] sm:$0xf] %vm245_vm3, %v648_v7 }
  0xc7   :  { %v875_v8 = vpop.permute.xlu1 %874  ;;  %v873_v51 = vpop.permute.xlu0 %872  ;;  %v1074_v55 = vld [vmem:[#allocation2 + $0x118] sm:$0xff]  ;;  %v1077_v33 = vld [vmem:[#allocation2 + $0x12c] sm:$0xff] }
  0xc8   :  { %v5133_v56 = vld [vmem:[#allocation2 + $0x11c] ss:$20 sps:$4 sm:$0xff]   ;;  %921 = vst.msk [vmem:[#allocation2 + $0x20] sm:$0xf] %vm245_vm3, %v875_v8  ;;  %920 = vst.msk [vmem:[#allocation2 + $0xc] sm:$0xf] %vm245_vm3, %v873_v51  ;;  %v4173_v59 = vcombine.low %v1074_v55, %v1077_v33 }
  0xc9   :  { %1688 = vmatprep.mubr.bf16.mxu0 %v5133_v56  ;;  %v2653_v56 = vld [vmem:[#allocation3 + $0x130] sm:$0xff] }
  0xcb   :  { %v654_v0 = vpop.permute.xlu1 %653  ;;  %v652_v2 = vpop.permute.xlu0 %651  ;;  %1689 = vmatmul.mubr.bf16.gmra.mxu0 %v4173_v59  ;;  %v4722_v59 = vpack.c.bf16 %v2653_v56, %v2653_v56 }
  0xcc   :  { %698 = vst.msk [vmem:[#allocation2 + $0x44] sm:$0xf] %vm245_vm3, %v654_v0  ;;  %697 = vst.msk [vmem:[#allocation2 + $0x30] sm:$0xf] %vm245_vm3, %v652_v2  ;;  %5043 = vmatprep.mubr.msk.bf16.mxu0 %vm1575_vm1, %v5142_v60 }
  0xcf   :  { %v879_v54 = vpop.permute.xlu1 %878  ;;  %v877_v5 = vpop.permute.xlu0 %876  ;;  %v1033_v24 = vld [vmem:[#allocation2 + $0x8] sm:$0xff]  ;;  %v1036_v6 = vld [vmem:[#allocation2 + $0x1c] sm:$0xff] }
  0xd0   :  { %v5140_v9 = vld [vmem:[#allocation2 + $0xc] ss:$20 sps:$4 sm:$0xff]   ;;  %923 = vst.msk [vmem:[#allocation2 + $0x48] sm:$0xf] %vm245_vm3, %v879_v54  ;;  %922 = vst.msk [vmem:[#allocation2 + $0x34] sm:$0xf] %vm245_vm3, %v877_v5  ;;  %v4140_v10 = vcombine.low %v1033_v24, %v1036_v6 }
  0xd1   :  { %1729 = vmatprep.mubr.bf16.mxu1 %v5140_v9  ;;  %v2061_v54 = vld [vmem:[#allocation3 + $0x1] sm:$0xff] }
  0xd2   :  { %1730 = vmatmul.mubr.bf16.vlgmr.msra.gmra.mxu1 %v4140_v10  ;;  %v4627_v5 = vpack.c.bf16 %v2061_v54, %v2061_v54  ;;  %v2069_v24 = vld [vmem:[#allocation3 + $0xa1] sm:$0xff] }
  0xd3   :  { %v658_v39 = vpop.permute.xlu1 %657  ;;  %v656_v25 = vpop.permute.xlu0 %655  ;;  %5044 = vmatmul.mubr.msk.bf16.vlgmr.msra.gmra.mxu0 %vm1575_vm1, %v5143_v4  ;;  %v4635_v6 = vpack.c.bf16 %v2069_v24, %v2069_v24  ;;  %v1973_v54 = vld [vmem:[#allocation3 + $0xa0] sm:$0xff] }
  0xd4   :  { %700 = vst.msk [vmem:[#allocation2 + $0x6c] sm:$0xf] %vm245_vm3, %v658_v39  ;;  %699 = vst.msk [vmem:[#allocation2 + $0x58] sm:$0xf] %vm245_vm3, %v656_v25  ;;  %5047 = vmatprep.mubr.msk.bf16.mxu0 %vm1575_vm1, %v5148_v15  ;;  %2125 = vrot.lane.b32.xlu0 %v4627_v5, %s5287_s21  ;;  %v4619_v24 = vpack.c.bf16 %v1973_v54, %v1973_v54 }
  0xd6   :  { %2053 = vst.msk [vmem:[#allocation2 + $0xa0] sm:$0xf] %vm116_vm0, %v4619_v24 }
  0xd7   :  { %v883_v16 = vpop.permute.xlu1 %882  ;;  %v881_v17 = vpop.permute.xlu0 %880  ;;  %v1039_v28 = vld [vmem:[#allocation2 + $0x30] sm:$0xff]  ;;  %v1042_v40 = vld [vmem:[#allocation2 + $0x44] sm:$0xff] }
  0xd8   :  { %v5144_v44 = vld [vmem:[#allocation2 + $0x34] ss:$20 sps:$4 sm:$0xff]   ;;  %925 = vst.msk [vmem:[#allocation2 + $0x70] sm:$0xf] %vm245_vm3, %v883_v16  ;;  %924 = vst.msk [vmem:[#allocation2 + $0x5c] sm:$0xf] %vm245_vm3, %v881_v17  ;;  %v4145_v29 = vcombine.low %v1039_v28, %v1042_v40  ;;  %2141 = vrot.lane.b32.xlu0 %v4635_v6, %s5287_s21 }
  0xd9   :  { %1737 = vmatprep.mubr.bf16.mxu1 %v5144_v44 }
  0xda   :  { %1738 = vmatmul.mubr.bf16.gmra.mxu1 %v4145_v29 }
  0xdb   :  { %v662_v19 = vpop.permute.xlu1 %661  ;;  %v660_v23 = vpop.permute.xlu0 %659  ;;  %5048 = vmatmul.mubr.msk.bf16.gmra.mxu0 %vm1575_vm1, %v5863_v61 }
  0xdc   :  { %702 = vst.msk [vmem:[#allocation2 + $0x94] sm:$0xf] %vm245_vm3, %v662_v19  ;;  %701 = vst.msk [vmem:[#allocation2 + $0x80] sm:$0xf] %vm245_vm3, %v660_v23  ;;  %5051 = vmatprep.mubr.msk.bf16.mxu0 %vm1575_vm1, %v5152_v18 }
  0xdf   :  { %v887_v58 = vpop.permute.xlu1 %886  ;;  %v885_v21 = vpop.permute.xlu0 %884  ;;  %v1045_v22 = vld [vmem:[#allocation2 + $0x58] sm:$0xff]  ;;  %v1048_v26 = vld [vmem:[#allocation2 + $0x6c] sm:$0xff] }
  0xe0   :  { %v5146_v62 = vld [vmem:[#allocation2 + $0x5c] ss:$20 sps:$4 sm:$0xff]   ;;  %927 = vst.msk [vmem:[#allocation2 + $0x98] sm:$0xf] %vm245_vm3, %v887_v58  ;;  %926 = vst.msk [vmem:[#allocation2 + $0x84] sm:$0xf] %vm245_vm3, %v885_v21  ;;  %v4150_v63 = vcombine.low %v1045_v22, %v1048_v26 }
  0xe1   :  { %1745 = vmatprep.mubr.bf16.mxu1 %v5146_v62 }
  0xe2   :  { %1746 = vmatmul.mubr.bf16.gmra.mxu1 %v4150_v63 }
  0xe3   :  { %v666_v61 = vpop.permute.xlu1 %665  ;;  %v664_v30 = vpop.permute.xlu0 %663  ;;  %5052 = vmatmul.mubr.msk.bf16.gmra.mxu0 %vm1575_vm1, %v5153_v57 }
  0xe4   :  { %704 = vst.msk [vmem:[#allocation2 + $0xbc] sm:$0xf] %vm245_vm3, %v666_v61  ;;  %703 = vst.msk [vmem:[#allocation2 + $0xa8] sm:$0xf] %vm245_vm3, %v664_v30  ;;  %5055 = vmatprep.mubr.msk.bf16.mxu0 %vm1575_vm1, %v5159_v45 }
  0xe7   :  { %v1054_v1 = vld [vmem:[#allocation2 + $0x94] sm:$0xff]  ;;  %v891_v3 = vpop.permute.xlu1 %890  ;;  %v889_v32 = vpop.permute.xlu0 %888  ;;  %v1051_v36 = vld [vmem:[#allocation2 + $0x80] sm:$0xff] }
  0xe8   :  { %2725 = vst.msk [vmem:[#allocation2 + $0x98] sm:$0xf] %vm116_vm0, %v4714_v31  ;;  %v4156_v38 = vcombine.high %v1051_v36, %v1054_v1  ;;  %v4155_v41 = vcombine.low %v1051_v36, %v1054_v1 }
  0xe9   :  { %929 = vst.msk [vmem:[#allocation2 + $0xc0] sm:$0xf] %vm245_vm3, %v891_v3  ;;  %928 = vst.msk [vmem:[#allocation2 + $0xac] sm:$0xf] %vm245_vm3, %v889_v32 }
  0xea   :  { %1753 = vmatprep.mubr.bf16.mxu1 %v4156_v38 }
  0xeb   :  { %v670_v42 = vpop.permute.xlu1 %669  ;;  %1754 = vmatmul.mubr.bf16.gmra.mxu1 %v4155_v41  ;;  %v668_v20 = vpop.permute.xlu0 %667  ;;  %5056 = vmatmul.mubr.msk.bf16.gmra.mxu0 %vm1575_vm1, %v5988_v48 }
  0xec   :  { %706 = vst.msk [vmem:[#allocation2 + $0xe4] sm:$0xf] %vm245_vm3, %v670_v42  ;;  %705 = vst.msk [vmem:[#allocation2 + $0xd0] sm:$0xf] %vm245_vm3, %v668_v20  ;;  %v6120_v20 = vld [vmem:[%s6839_s2] ss:$0 sm:$0xff] }
  0xef   :  { %v895_v43 = vpop.permute.xlu1 %894  ;;  %v893_v52 = vpop.permute.xlu0 %892 }
  0xf0   :  { %v1057_v11 = vld [vmem:[#allocation2 + $0xa8] sm:$0xff]  ;;  %v1060_v14 = vld [vmem:[#allocation2 + $0xbc] sm:$0xff]  ;;  %931 = vst.msk [vmem:[#allocation2 + $0xe8] sm:$0xf] %vm245_vm3, %v895_v43  ;;  %930 = vst.msk [vmem:[#allocation2 + $0xd4] sm:$0xf] %vm245_vm3, %v893_v52 }
  0xf1   :  { %v5150_v53 = vld [vmem:[#allocation2 + $0xac] ss:$20 sps:$4 sm:$0xff]   ;;  %v4160_v12 = vcombine.low %v1057_v11, %v1060_v14  ;;  %v5161_v11 = vld [vmem:[%s6840_s3 + $0x78] sm:$0xff]  }
  0xf2   :  { %1761 = vmatprep.mubr.bf16.mxu1 %v5150_v53  ;;  %v5162_v14 = vld [vmem:[%s6840_s3 + $0x38] sm:$0xff]   ;;  %4895 = vmatprep.subr.bf16.mxu1 %v5161_v11 }
  0xf3   :  { %v674_v13 = vpop.permute.xlu1 %673  ;;  %1762 = vmatmul.mubr.bf16.gmra.mxu1 %v4160_v12  ;;  %v672_v34 = vpop.permute.xlu0 %671 }
  0xf4   :  { %708 = vst.msk [vmem:[#allocation2 + $0x10c] sm:$0xf] %vm245_vm3, %v674_v13  ;;  %707 = vst.msk [vmem:[#allocation2 + $0xf8] sm:$0xf] %vm245_vm3, %v672_v34  ;;  %4896 = vmatpush3.bf16.msra.mxu1 %v5162_v14 }
  0xf7   :  { %v899_v48 = vpop.permute.xlu1 %898  ;;  %v897_v35 = vpop.permute.xlu0 %896  ;;  %v1063_v49 = vld [vmem:[#allocation2 + $0xd0] sm:$0xff]  ;;  %v1066_v50 = vld [vmem:[#allocation2 + $0xe4] sm:$0xff] }
  0xf8   :  { %v5154_v27 = vld [vmem:[#allocation2 + $0xd4] ss:$20 sps:$4 sm:$0xff]   ;;  %933 = vst.msk [vmem:[#allocation2 + $0x110] sm:$0xf] %vm245_vm3, %v899_v48  ;;  %932 = vst.msk [vmem:[#allocation2 + $0xfc] sm:$0xf] %vm245_vm3, %v897_v35  ;;  %v4165_v37 = vcombine.low %v1063_v49, %v1066_v50 }
  0xf9   :  { %1769 = vmatprep.mubr.bf16.mxu1 %v5154_v27  ;;  %v1965_v27 = vld [vmem:[#allocation3] sm:$0xff] }
  0xfb   :  { %v678_v47 = vpop.permute.xlu1 %677  ;;  %1770 = vmatmul.mubr.bf16.gmra.mxu1 %v4165_v37  ;;  %v676_v7 = vpop.permute.xlu0 %675  ;;  %v5158_v33 = vld [vmem:[#allocation2 + $0xf8] ss:$20 sps:$4 sm:$0xff]  }
  0xfc   :  { %710 = vst.msk [vmem:[#allocation2 + $0x134] sm:$0xf] %vm245_vm3, %v678_v47  ;;  %709 = vst.msk [vmem:[#allocation2 + $0x120] sm:$0xf] %vm245_vm3, %v676_v7  ;;  %v4611_v47 = vpack.c.bf16 %v1965_v27, %v1965_v27 }
  0xfe   :  { %2045 = vst.msk [vmem:[#allocation2] sm:$0xf] %vm116_vm0, %v4611_v47 }
  0xff   :  { %v903_v8 = vpop.permute.xlu1 %902  ;;  %v901_v51 = vpop.permute.xlu0 %900  ;;  %v5156_v55 = vld [vmem:[#allocation2 + $0xfc] ss:$20 sps:$4 sm:$0xff]  }
 0x100   :  { %935 = vst.msk [vmem:[#allocation2 + $0x138] sm:$0xf] %vm245_vm3, %v903_v8  ;;  %934 = vst.msk [vmem:[#allocation2 + $0x124] sm:$0xf] %vm245_vm3, %v901_v51  ;;  %1777 = vmatprep.mubr.bf16.mxu1 %v5156_v55 }
 0x103   :  { %1778 = vmatmul.mubr.bf16.gmra.mxu1 %v5158_v33 }
 0x107   :  { %v1078_v60 = vld [vmem:[#allocation2 + $0x134] sm:$0xff]  ;;  %v1075_v0 = vld [vmem:[#allocation2 + $0x120] sm:$0xff] }
 0x108   :  { %2733 = vst.msk [vmem:[#allocation2 + $0x138] sm:$0xf] %vm116_vm0, %v4722_v59  ;;  %v4176_v2 = vcombine.high %v1075_v0, %v1078_v60  ;;  %v4175_v4 = vcombine.low %v1075_v0, %v1078_v60 }
 0x10a   :  { %1785 = vmatprep.mubr.bf16.mxu1 %v4176_v2  ;;  %v5163_v2 = vld [vmem:[%s6840_s3 + $0x70] sm:$0xff]  }
 0x10b   :  { %1786 = vmatmul.mubr.bf16.gmra.mxu1 %v4175_v4  ;;  %v5164_v4 = vld [vmem:[%s6840_s3 + $0x30] sm:$0xff]   ;;  %4897 = vmatprep.subr.bf16.mxu1 %v5163_v2 }
 0x10c   :  { %4898 = vmatpush3.bf16.msra.mxu1 %v5164_v4 }
 0x146   :  { %v2126_v33 = vpop.permute.xlu0 %2125 }
 0x147   :  { %2173 = vst.msk [vmem:[#allocation2] sm:$0xf] %vm245_vm3, %v2126_v33 }
 0x152   :  { %v4771_v9 = vpop.f32.mrf.mxu0 }
 0x154   :  { %v4772_v10 = vpop.f32.mrf.mxu0 }
 0x155   :  { %v4773_v41 = vadd.f32 %v4772_v10, %v4771_v9 }
 0x156   :  { %v4774_v15 = vpop.f32.mrf.mxu0 }
 0x157   :  { %v1635_v12 = vadd.f32 %v4773_v41, %v6120_v20 }
 0x158   :  { %v4775_v39 = vpop.f32.mrf.mxu0 }
 0x159   :  { %v4776_v13 = vadd.f32 %v4775_v39, %v4774_v15 }
 0x15a   :  { %v4777_v25 = vpop.f32.mrf.mxu0 }
 0x15b   :  { %v1638_v7 = vadd.f32 %v4776_v13, %v6120_v20 }
 0x15c   :  { %v4778_v16 = vpop.f32.mrf.mxu0 }
 0x15d   :  { %v4779_v8 = vadd.f32 %v4778_v16, %v4777_v25  ;;  %v2142_v16 = vpop.permute.xlu0 %2141 }
 0x15e   :  { %v4780_v17 = vpop.f32.mrf.mxu0  ;;  %2181 = vst.msk [vmem:[#allocation2 + $0xa0] sm:$0xf] %vm245_vm3, %v2142_v16 }
 0x15f   :  { %v1643_v6 = vadd.f32 %v4779_v8, %v6120_v20 }
 0x160   :  { %v4781_v28 = vpop.f32.mrf.mxu0 }
 0x161   :  { %v4782_v9 = vadd.f32 %v4781_v28, %v4780_v17 }
 0x162   :  { %v6069_v40 = vpop.f32.mrf.mxu0 }
 0x163   :  { %v1646_v28 = vadd.f32 %v4782_v9, %v6120_v20 }
 0x164   :  { %v6071_v44 = vpop.f32.mrf.mxu0 }
 0x165   :  { %v4785_v11 = vadd.f32 %v6071_v44, %v6069_v40 }
 0x166   :  { %v6073_v29 = vpop.f32.mrf.mxu0 }
 0x167   :  { %v1651_v40 = vadd.f32 %v4785_v11, %v6120_v20 }
 0x168   :  { %v6075_v18 = vpop.f32.mrf.mxu0 }
 0x169   :  { %v4788_v44 = vadd.f32 %v6075_v18, %v6073_v29 }
 0x16a   :  { %v6077_v19 = vpop.f32.mrf.mxu0 }
 0x16c   :  { %v6079_v23 = vpop.f32.mrf.mxu0 }
 0x16d   :  { %v4791_v16 = vadd.f32 %v6079_v23, %v6077_v19  ;;  %v5170_v19 = vld [vmem:[%s6840_s3 + $0x20] sm:$0xff]   ;;  %v5171_v23 = vld [vmem:[%s6840_s3 + $0xf0] sm:$0xff]  }
 0x16e   :  { %v6081_v57 = vpop.f32.mrf.mxu0 }
 0x170   :  { %v6083_v58 = vpop.f32.mrf.mxu0 }
 0x173   :  { %v6085_v21 = vpop.f32.mrf.mxu0 }
 0x175   :  { %v6087_v22 = vpop.f32.mrf.mxu0 }
 0x177   :  { %v6089_v26 = vpop.f32.mrf.mxu0 }
 0x179   :  { %v6091_v62 = vpop.f32.mrf.mxu0 }
 0x17b   :  { %v6093_v63 = vpop.f32.mrf.mxu0 }
 0x17d   :  { %v6095_v45 = vpop.f32.mrf.mxu0 }
 0x17f   :  { %v6097_v46 = vpop.f32.mrf.mxu0 }
 0x181   :  { %v6099_v61 = vpop.f32.mrf.mxu0 }
 0x183   :  { %v6101_v30 = vpop.f32.mrf.mxu0 }
 0x185   :  { %v6103_v31 = vpop.f32.mrf.mxu0 }
 0x187   :  { %v6105_v1 = vpop.f32.mrf.mxu0 }
 0x189   :  { %v6107_v3 = vpop.f32.mrf.mxu0 }
 0x18b   :  { %v6109_v32 = vpop.f32.mrf.mxu0 }
 0x18d   :  { %v6111_v36 = vpop.f32.mrf.mxu0 }
 0x18f   :  { %v6113_v38 = vpop.f32.mrf.mxu0 }
 0x191   :  { %v6115_v42 = vpop.f32.mrf.mxu0 }
 0x192   :  { %v4835_v43 = vpop.f32.mrf.mxu1 }
 0x193   :  { %v5045_v52 = vpop.f32.mrf.mxu0 }
 0x194   :  { %v4836_v53 = vpop.f32.mrf.mxu1 }
 0x195   :  { %v4837_v34 = vadd.f32 %v4836_v53, %v4835_v43  ;;  %v1828_v48 = vpop.f32.mrf.mxu0 }
 0x196   :  { %v4838_v35 = vpop.f32.mrf.mxu1 }
 0x197   :  { %v1732_v49 = vadd.f32 %v4837_v34, %v1635_v12  ;;  %v5046_v50 = vpop.f32.mrf.mxu0 }
 0x198   :  { %v4839_v37 = vpop.f32.mrf.mxu1 }
 0x199   :  { %v4840_v51 = vadd.f32 %v4839_v37, %v4838_v35  ;;  %v1829_v55 = vadd.f32 %v1828_v48, %v1732_v49  ;;  %v1831_v59 = vpop.f32.mrf.mxu0  ;;  %v5165_v35 = vld [vmem:[%s6840_s3 + $0x68] sm:$0xff]  }
 0x19a   :  { %v4841_v56 = vpop.f32.mrf.mxu1  ;;  %v5166_v49 = vld [vmem:[%s6840_s3 + $0x28] sm:$0xff]   ;;  %4899 = vmatprep.subr.bf16.mxu1 %v5165_v35 }
 0x19b   :  { %v1891_v60 = vmax.f32 %v1829_v55, 0.0  ;;  %v1735_v0 = vadd.f32 %v4840_v51, %v1638_v7  ;;  %v6140_v39 = vpop.f32.mrf.mxu0  ;;  %4900 = vmatpush3.bf16.msra.mxu1 %v5166_v49 }
 0x19c   :  { %v4842_v5 = vpop.f32.mrf.mxu1 }
 0x19d   :  { %1949 = vst.msk [vmem:[#allocation3 + $0x11] sm:$0xff] %vm1575_vm1, %v1891_v60  ;;  %v4843_v10 = vadd.f32 %v4842_v5, %v4841_v56  ;;  %v1832_v15 = vadd.f32 %v1831_v59, %v1735_v0  ;;  %v1844_v13 = vpop.f32.mrf.mxu0  ;;  %v5167_v60 = vld [vmem:[%s6840_s3 + $0xf8] sm:$0xff]   ;;  %v2189_v0 = vld [vmem:[#allocation3 + $0x2] sm:$0xff] }
 0x19e   :  { %v4844_v25 = vpop.f32.mrf.mxu1  ;;  %v4643_v24 = vpack.c.bf16 %v2189_v0, %v2189_v0  ;;  %4959 = vmatprep.subr.bf16.mxu0 %v5167_v60 }
 0x19f   :  { %v1740_v41 = vadd.f32 %v4843_v10, %v1643_v6  ;;  %v1892_v43 = vmax.f32 %v1832_v15, 0.0  ;;  %v6162_v56 = vpop.f32.mrf.mxu0 }
 0x1a0   :  { %v4845_v17 = vpop.f32.mrf.mxu1  ;;  %2269 = vst.msk [vmem:[#allocation2 + $0x4] sm:$0xf] %vm116_vm0, %v4643_v24 }
 0x1a1   :  { %v1837_v14 = vadd.f32 %v5045_v52, %v1740_v41  ;;  %1950 = vst.msk [vmem:[#allocation3 + $0x21] sm:$0xff] %vm1575_vm1, %v1892_v43  ;;  %v4846_v53 = vadd.f32 %v4845_v17, %v4844_v25  ;;  %v5168_v25 = vld [vmem:[%s6840_s3 + $0xb8] sm:$0xff]   ;;  %v1847_v41 = vpop.f32.mrf.mxu0 }
 0x1a2   :  { %v4847_v12 = vpop.f32.mrf.mxu1  ;;  %4960 = vmatpush3.bf16.msra.mxu0 %v5168_v25  ;;  %v5177_v25 = vld [vmem:[%s6840_s3 + $0x50] sm:$0xff]  }
 0x1a3   :  { %v1893_v34 = vmax.f32 %v1837_v14, 0.0  ;;  %v1743_v48 = vadd.f32 %v4846_v53, %v1646_v28  ;;  %v5169_v14 = vld [vmem:[%s6840_s3 + $0x60] sm:$0xff]   ;;  %4961 = vmatprep.subr.bf16.mxu0 %v5171_v23 }
 0x1a4   :  { %v4848_v52 = vpop.f32.mrf.mxu1  ;;  %v2285_v27 = vld [vmem:[#allocation3 + $0x10] sm:$0xff]  ;;  %4901 = vmatprep.subr.bf16.mxu1 %v5169_v14 }
 0x1a5   :  { %v2062_v37 = vld [vmem:[#allocation3 + $0x11] sm:$0xff]  ;;  %1951 = vst.msk [vmem:[#allocation3 + $0x31] sm:$0xff] %vm1575_vm1, %v1893_v34  ;;  %v1840_v7 = vadd.f32 %v5046_v50, %v1743_v48  ;;  %v4849_v8 = vadd.f32 %v4848_v52, %v4847_v12  ;;  %v6158_v51 = vpack.c.bf16 %v2285_v27, %v2285_v27  ;;  %v1654_v50 = vadd.f32 %v4788_v44, %v6120_v20 }
 0x1a6   :  { %v2509_v47 = vld [vmem:[#allocation3 + $0x12] sm:$0xff]  ;;  %v6160_v55 = vpack.c.bf16 %v2062_v37, %v2062_v37  ;;  %v4850_v33 = vpop.f32.mrf.mxu1  ;;  %v1659_v52 = vadd.f32 %v4791_v16, %v6120_v20  ;;  %v4794_v27 = vadd.f32 %v6083_v58, %v6081_v57  ;;  %4902 = vmatpush3.bf16.msra.mxu1 %v5170_v19  ;;  %v6224_v57 = vpop.f32.mrf.mxu0  ;;  %v4797_v58 = vadd.f32 %v6087_v22, %v6085_v21  ;;  %v5176_v22 = vld [vmem:[%s6840_s3 + $0xa8] sm:$0xff]   ;;  %v5178_v16 = vld [vmem:[%s6840_s3 + $0xe0] sm:$0xff]  }
 0x1a7   :  { %v6164_v59 = vpack.c.bf16 %v2509_v47, %v2509_v47  ;;  %v1894_v29 = vmax.f32 %v1840_v7, 0.0  ;;  %v1748_v18 = vadd.f32 %v4849_v8, %v1651_v40  ;;  %2046 = vst.msk [vmem:[#allocation2 + $0x14] sm:$0xf] %vm116_vm0, %v6158_v51  ;;  %v5172_v44 = vld [vmem:[%s6840_s3 + $0xb0] sm:$0xff]   ;;  %v5173_v47 = vld [vmem:[%s6840_s3 + $0x58] sm:$0xff]   ;;  %v5174_v7 = vld [vmem:[%s6840_s3 + $0xe8] sm:$0xff]  }
 0x1a8   :  { %2493 = vst.msk [vmem:[#allocation2 + $0x8] sm:$0xf] %vm116_vm0, %v6160_v55  ;;  %v2862_v2 = vld [vmem:[#allocation3 + $0x22] sm:$0xff]  ;;  %v4851_v4 = vpop.f32.mrf.mxu1  ;;  %4962 = vmatpush3.bf16.msra.mxu0 %v5172_v44  ;;  %4903 = vmatprep.subr.bf16.mxu1 %v5173_v47  ;;  %v5175_v21 = vld [vmem:[%s6840_s3 + $0x18] sm:$0xff]   ;;  %v1662_v24 = vadd.f32 %v4794_v27, %v6120_v20  ;;  %v4800_v44 = vadd.f32 %v6091_v62, %v6089_v26 }
 0x1a9   :  { %v2286_v54 = vld [vmem:[#allocation3 + $0x20] sm:$0xff]  ;;  %2270 = vst.msk [vmem:[#allocation2 + $0x18] sm:$0xf] %vm116_vm0, %v6164_v59  ;;  %v6176_v6 = vpack.c.bf16 %v2862_v2, %v2862_v2  ;;  %v4852_v9 = vadd.f32 %v4851_v4, %v4850_v33  ;;  %v1845_v10 = vadd.f32 %v1844_v13, %v1748_v18  ;;  %4963 = vmatprep.subr.bf16.mxu0 %v5174_v7  ;;  %v5182_v47 = vld [vmem:[%s6840_s3 + $0xd8] sm:$0xff]  }
 0x1aa   :  { %v2063_v5 = vld [vmem:[#allocation3 + $0x21] sm:$0xff]  ;;  %1952 = vst.msk [vmem:[#allocation3 + $0x41] sm:$0xff] %vm1575_vm1, %v1894_v29  ;;  %v6179_v15 = vpack.c.bf16 %v2286_v54, %v2286_v54  ;;  %4904 = vmatpush3.bf16.msra.mxu1 %v5175_v21  ;;  %v4803_v62 = vadd.f32 %v6095_v45, %v6093_v63  ;;  %v5184_v45 = vld [vmem:[%s6840_s3 + $0x98] sm:$0xff]  }
 0x1ab   :  { %v6186_v43 = vpack.c.bf16 %v2063_v5, %v2063_v5  ;;  %2942 = vst.msk [vmem:[#allocation2 + $0x10] sm:$0xf] %vm116_vm0, %v6176_v6  ;;  %v1895_v11 = vmax.f32 %v1845_v10, 0.0  ;;  %v4853_v17 = vpop.f32.mrf.mxu1  ;;  %v1751_v28 = vadd.f32 %v4852_v9, %v1654_v50  ;;  %2271 = vst.msk [vmem:[#allocation2 + $0x2c] sm:$0xf] %vm116_vm0, %v6176_v6  ;;  %4905 = vmatprep.subr.bf16.mxu1 %v5177_v25  ;;  %v5183_v63 = vld [vmem:[%s6840_s3 + $0x8] sm:$0xff]  }
 0x1ac   :  { %2047 = vst.msk [vmem:[#allocation2 + $0x28] sm:$0xf] %vm116_vm0, %v6179_v15  ;;  %2718 = vst.msk [vmem:[#allocation2 + $0xc] sm:$0xf] %vm116_vm0, %v6179_v15  ;;  %v2863_v53 = vld [vmem:[#allocation3 + $0x32] sm:$0xff]  ;;  %4964 = vmatpush3.bf16.msra.mxu0 %v5176_v22 }
 0x1ad   :  { %v2287_v12 = vld [vmem:[#allocation3 + $0x30] sm:$0xff]  ;;  %2494 = vst.msk [vmem:[#allocation2 + $0x1c] sm:$0xf] %vm116_vm0, %v6186_v43  ;;  %v4740_v34 = vpack.c.bf16 %v2863_v53, %v2863_v53  ;;  %v4854_v48 = vpop.f32.mrf.mxu1  ;;  %v1848_v35 = vadd.f32 %v1847_v41, %v1751_v28  ;;  %4965 = vmatprep.subr.bf16.mxu0 %v5178_v16 }
 0x1ae   :  { %v2064_v13 = vld [vmem:[#allocation3 + $0x31] sm:$0xff]  ;;  %1953 = vst.msk [vmem:[#allocation3 + $0x51] sm:$0xff] %vm1575_vm1, %v1895_v11  ;;  %v4661_v49 = vpack.c.bf16 %v2287_v12, %v2287_v12  ;;  %v4855_v37 = vadd.f32 %v4854_v48, %v4853_v17  ;;  %v1860_v17 = vpop.f32.mrf.mxu0 }
 0x1af   :  { %v4630_v40 = vpack.c.bf16 %v2064_v13, %v2064_v13  ;;  %2943 = vst.msk [vmem:[#allocation2 + $0x24] sm:$0xf] %vm116_vm0, %v4740_v34  ;;  %v1896_v8 = vmax.f32 %v1848_v35, 0.0  ;;  %v4856_v33 = vpop.f32.mrf.mxu1  ;;  %2272 = vst.msk [vmem:[#allocation2 + $0x40] sm:$0xf] %vm116_vm0, %v4740_v34  ;;  %v5179_v35 = vld [vmem:[%s6840_s3 + $0x10] sm:$0xff]  }
 0x1b0   :  { %2353 = vrot.lane.b32.xlu0 %v4661_v49, %s5287_s21  ;;  %2048 = vst.msk [vmem:[#allocation2 + $0x3c] sm:$0xf] %vm116_vm0, %v4661_v49  ;;  %2719 = vst.msk [vmem:[#allocation2 + $0x20] sm:$0xf] %vm116_vm0, %v4661_v49  ;;  %v1756_v18 = vadd.f32 %v4855_v37, %v1659_v52  ;;  %v5180_v49 = vld [vmem:[%s6840_s3 + $0xa0] sm:$0xff]   ;;  %v5181_v37 = vld [vmem:[%s6840_s3 + $0x48] sm:$0xff]   ;;  %v6293_v26 = vpop.f32.mrf.mxu0  ;;  %4906 = vmatpush3.bf16.msra.mxu1 %v5179_v35 }
 0x1b1   :  { %2131 = vrot.lane.b32.xlu1 %v4630_v40, %s5287_s21  ;;  %2495 = vst.msk [vmem:[#allocation2 + $0x30] sm:$0xf] %vm116_vm0, %v4630_v40  ;;  %v2864_v29 = vld [vmem:[#allocation3 + $0x42] sm:$0xff]  ;;  %v4857_v2 = vpop.f32.mrf.mxu1  ;;  %4966 = vmatpush3.bf16.msra.mxu0 %v5180_v49 }
 0x1b2   :  { %v2288_v60 = vld [vmem:[#allocation3 + $0x40] sm:$0xff]  ;;  %v6232_v50 = vpack.c.bf16 %v2864_v29, %v2864_v29  ;;  %1954 = vst.msk [vmem:[#allocation3 + $0x61] sm:$0xff] %vm1575_vm1, %v1896_v8  ;;  %v1853_v9 = vadd.f32 %v6140_v39, %v1756_v18  ;;  %v4858_v10 = vadd.f32 %v4857_v2, %v4856_v33  ;;  %v1667_v39 = vadd.f32 %v4797_v58, %v6120_v20 }
 0x1b3   :  { %v2065_v0 = vld [vmem:[#allocation3 + $0x41] sm:$0xff]  ;;  %v6235_v4 = vpack.c.bf16 %v2288_v60, %v2288_v60  ;;  %v4859_v11 = vpop.f32.mrf.mxu1  ;;  %4907 = vmatprep.subr.bf16.mxu1 %v5181_v37  ;;  %4967 = vmatprep.subr.bf16.mxu0 %v5182_v47  ;;  %v1670_v2 = vadd.f32 %v4800_v44, %v6120_v20  ;;  %v4809_v47 = vadd.f32 %v6103_v31, %v6101_v30 }
 0x1b4   :  { %v6237_v54 = vpack.c.bf16 %v2065_v0, %v2065_v0  ;;  %v2193_v5 = vld [vmem:[#allocation3 + $0x42] sm:$0xff]  ;;  %2944 = vst.msk [vmem:[#allocation2 + $0x38] sm:$0xf] %vm116_vm0, %v6232_v50  ;;  %2577 = vrot.lane.b32.xlu0 %v4740_v34, %s5287_s21  ;;  %v1897_v14 = vmax.f32 %v1853_v9, 0.0  ;;  %v1759_v19 = vadd.f32 %v4858_v10, %v1662_v24  ;;  %v5186_v24 = vld [vmem:[%s6840_s3 + $0xd0] sm:$0xff]   ;;  %v1863_v10 = vpop.f32.mrf.mxu0  ;;  %4908 = vmatpush3.bf16.msra.mxu1 %v5183_v63 }
 0x1b5   :  { %v4647_v41 = vpack.c.bf16 %v2193_v5, %v2193_v5  ;;  %2800 = vrot.lane.b32.xlu1 %v4630_v40, %s5287_s21  ;;  %2049 = vst.msk [vmem:[#allocation2 + $0x50] sm:$0xf] %vm116_vm0, %v6235_v4  ;;  %2720 = vst.msk [vmem:[#allocation2 + $0x34] sm:$0xf] %vm116_vm0, %v6235_v4  ;;  %v2865_v28 = vld [vmem:[#allocation3 + $0x52] sm:$0xff]  ;;  %v4860_v13 = vpop.f32.mrf.mxu1  ;;  %v5185_v5 = vld [vmem:[%s6840_s3 + $0x40] sm:$0xff]   ;;  %4968 = vmatpush3.bf16.msra.mxu0 %v5184_v45 }
 0x1b6   :  { %2496 = vst.msk [vmem:[#allocation2 + $0x44] sm:$0xf] %vm116_vm0, %v6237_v54  ;;  %v2066_v23 = vld [vmem:[#allocation3 + $0x51] sm:$0xff]  ;;  %v6265_v12 = vpack.c.bf16 %v2865_v28, %v2865_v28  ;;  %v1856_v52 = vadd.f32 %v6162_v56, %v1759_v19  ;;  %v4861_v27 = vadd.f32 %v4860_v13, %v4859_v11  ;;  %v4806_v11 = vadd.f32 %v6099_v61, %v6097_v46  ;;  %v6356_v46 = vpop.f32.mrf.mxu0  ;;  %v5196_v63 = vld [vmem:[%s6840_s3 + $0xc0] sm:$0xff]  }
 0x1b7   :  { %v2289_v53 = vld [vmem:[#allocation3 + $0x50] sm:$0xff]  ;;  %2273 = vst.msk [vmem:[#allocation2 + $0x54] sm:$0xf] %vm116_vm0, %v4647_v41  ;;  %v6267_v34 = vpack.c.bf16 %v2066_v23, %v2066_v23  ;;  %v4862_v8 = vpop.f32.mrf.mxu1  ;;  %v1675_v41 = vadd.f32 %v4803_v62, %v6120_v20  ;;  %4909 = vmatprep.subr.bf16.mxu1 %v5185_v5  ;;  %4969 = vmatprep.subr.bf16.mxu0 %v5186_v24 }
 0x1b8   :  { %v6269_v48 = vpack.c.bf16 %v2289_v53, %v2289_v53  ;;  %v2194_v40 = vld [vmem:[#allocation3 + $0x52] sm:$0xff]  ;;  %1955 = vst.msk [vmem:[#allocation3 + $0x71] sm:$0xff] %vm1575_vm1, %v1897_v14  ;;  %2349 = vrot.lane.b32.xlu0 %v6158_v51, %s5287_s21  ;;  %v1898_v33 = vmax.f32 %v1856_v52, 0.0  ;;  %v1764_v51 = vadd.f32 %v4861_v27, %v1667_v39  ;;  %v1678_v37 = vadd.f32 %v4806_v11, %v6120_v20 }
 0x1b9   :  { %v4648_v7 = vpack.c.bf16 %v2194_v40, %v2194_v40  ;;  %2945 = vst.msk [vmem:[#allocation2 + $0x4c] sm:$0xf] %vm116_vm0, %v6265_v12  ;;  %2127 = vrot.lane.b32.xlu1 %v6160_v55, %s5287_s21  ;;  %2497 = vst.msk [vmem:[#allocation2 + $0x58] sm:$0xf] %vm116_vm0, %v6267_v34  ;;  %v2866_v56 = vld [vmem:[#allocation3 + $0x62] sm:$0xff]  ;;  %v4863_v18 = vpop.f32.mrf.mxu1 }
 0x1ba   :  { %2050 = vst.msk [vmem:[#allocation2 + $0x64] sm:$0xf] %vm116_vm0, %v6269_v48  ;;  %2721 = vst.msk [vmem:[#allocation2 + $0x48] sm:$0xf] %vm116_vm0, %v6269_v48  ;;  %v2067_v58 = vld [vmem:[#allocation3 + $0x61] sm:$0xff]  ;;  %v6304_v55 = vpack.c.bf16 %v2866_v56, %v2866_v56  ;;  %v4864_v21 = vadd.f32 %v4863_v18, %v4862_v8  ;;  %v1861_v22 = vadd.f32 %v1860_v17, %v1764_v51 }
 0x1bb   :  { %v2290_v29 = vld [vmem:[#allocation3 + $0x60] sm:$0xff]  ;;  %2274 = vst.msk [vmem:[#allocation2 + $0x68] sm:$0xf] %vm116_vm0, %v4648_v7  ;;  %v6306_v60 = vpack.c.bf16 %v2067_v58, %v2067_v58  ;;  %v4865_v9 = vpop.f32.mrf.mxu1  ;;  %v5192_v40 = vld [vmem:[%s6840_s3 + $0xc8] sm:$0xff]  }
 0x1bc   :  { %v6308_v0 = vpack.c.bf16 %v2290_v29, %v2290_v29  ;;  %1956 = vst.msk [vmem:[#allocation3 + $0x81] sm:$0xff] %vm1575_vm1, %v1898_v33  ;;  %2573 = vrot.lane.b32.xlu0 %v6164_v59, %s5287_s21  ;;  %v1899_v25 = vmax.f32 %v1861_v22, 0.0  ;;  %v1767_v16 = vadd.f32 %v4864_v21, %v1670_v2  ;;  %v5187_v59 = vld [vmem:[%s6840_s3] sm:$0xff]   ;;  %v1876_v29 = vpop.f32.mrf.mxu0  ;;  %v4812_v2 = vadd.f32 %v6107_v3, %v6105_v1 }
 0x1bd   :  { %2946 = vst.msk [vmem:[#allocation2 + $0x60] sm:$0xf] %vm116_vm0, %v6304_v55  ;;  %2355 = vrot.lane.b32.xlu1 %v6235_v4, %s5287_s21  ;;  %2275 = vst.msk [vmem:[#allocation2 + $0x7c] sm:$0xf] %vm116_vm0, %v6304_v55  ;;  %v5188_v4 = vld [vmem:[%s6840_s3 + $0x90] sm:$0xff]   ;;  %v4866_v39 = vpop.f32.mrf.mxu1  ;;  %4910 = vmatpush3.bf16.msra.mxu1 %v5187_v59 }
 0x1be   :  { %2051 = vst.msk [vmem:[#allocation2 + $0x78] sm:$0xf] %vm116_vm0, %v6308_v0  ;;  %2722 = vst.msk [vmem:[#allocation2 + $0x5c] sm:$0xf] %vm116_vm0, %v6308_v0  ;;  %v4867_v23 = vadd.f32 %v4866_v39, %v4865_v9  ;;  %v1864_v53 = vadd.f32 %v1863_v10, %v1767_v16  ;;  %4970 = vmatpush3.bf16.msra.mxu0 %v5188_v4  ;;  %v6415_v1 = vpop.f32.mrf.mxu0 }
 0x1bf   :  { %2498 = vst.msk [vmem:[#allocation2 + $0x6c] sm:$0xf] %vm116_vm0, %v6306_v60  ;;  %v2867_v17 = vld [vmem:[#allocation3 + $0x72] sm:$0xff]  ;;  %v4868_v49 = vpop.f32.mrf.mxu1  ;;  %4971 = vmatprep.subr.bf16.mxu0 %v5192_v40 }
 0x1c0   :  { %v2068_v28 = vld [vmem:[#allocation3 + $0x71] sm:$0xff]  ;;  %v6347_v19 = vpack.c.bf16 %v2867_v17, %v2867_v17  ;;  %1957 = vst.msk [vmem:[#allocation3 + $0xb1] sm:$0xff] %vm1575_vm1, %v1899_v25  ;;  %2133 = vrot.lane.b32.xlu0 %v6237_v54, %s5287_s21  ;;  %v1772_v52 = vadd.f32 %v4867_v23, %v1675_v41  ;;  %v1900_v27 = vmax.f32 %v1864_v53, 0.0 }
 0x1c1   :  { %v2291_v14 = vld [vmem:[#allocation3 + $0x70] sm:$0xff]  ;;  %v6350_v13 = vpack.c.bf16 %v2068_v28, %v2068_v28  ;;  %2579 = vrot.lane.b32.xlu1 %v6232_v50, %s5287_s21  ;;  %v5193_v50 = vld [vmem:[%s6840_s3 + $0x88] sm:$0xff]   ;;  %v4869_v8 = vpop.f32.mrf.mxu1 }
 0x1c2   :  { %v2196_v35 = vld [vmem:[#allocation3 + $0x72] sm:$0xff]  ;;  %v6358_v61 = vpack.c.bf16 %v2291_v14, %v2291_v14  ;;  %2947 = vst.msk [vmem:[#allocation2 + $0x74] sm:$0xf] %vm116_vm0, %v6347_v19  ;;  %v1869_v51 = vadd.f32 %v6224_v57, %v1772_v52  ;;  %v4870_v30 = vadd.f32 %v4869_v8, %v4868_v49  ;;  %4972 = vmatpush3.bf16.msra.mxu0 %v5193_v50 }
 0x1c3   :  { %v4650_v44 = vpack.c.bf16 %v2196_v35, %v2196_v35  ;;  %2499 = vst.msk [vmem:[#allocation2 + $0x80] sm:$0xf] %vm116_vm0, %v6350_v13  ;;  %v2868_v7 = vld [vmem:[#allocation3 + $0x82] sm:$0xff]  ;;  %v4871_v58 = vpop.f32.mrf.mxu1  ;;  %4973 = vmatprep.subr.bf16.mxu0 %v5196_v63 }
 0x1c4   :  { %v2292_v62 = vld [vmem:[#allocation3 + $0x80] sm:$0xff]  ;;  %2052 = vst.msk [vmem:[#allocation2 + $0x8c] sm:$0xf] %vm116_vm0, %v6358_v61  ;;  %2723 = vst.msk [vmem:[#allocation2 + $0x70] sm:$0xf] %vm116_vm0, %v6358_v61  ;;  %v6378_v33 = vpack.c.bf16 %v2868_v7, %v2868_v7  ;;  %2802 = vrot.lane.b32.xlu0 %v6237_v54, %s5287_s21  ;;  %v1901_v57 = vmax.f32 %v1869_v51, 0.0  ;;  %v1775_v45 = vadd.f32 %v4870_v30, %v1678_v37 }
 0x1c5   :  { %v2740_v56 = vld [vmem:[#allocation3 + $0x81] sm:$0xff]  ;;  %2276 = vst.msk [vmem:[#allocation2 + $0x90] sm:$0xf] %vm116_vm0, %v4650_v44  ;;  %v6382_v31 = vpack.c.bf16 %v2292_v62, %v2292_v62  ;;  %2351 = vrot.lane.b32.xlu1 %v6179_v15, %s5287_s21  ;;  %v1683_v15 = vadd.f32 %v4809_v47, %v6120_v20  ;;  %v4872_v21 = vpop.f32.mrf.mxu1  ;;  %v4818_v37 = vadd.f32 %v6115_v42, %v6113_v38 }
 0x1c6   :  { %1958 = vst.msk [vmem:[#allocation3 + $0xc1] sm:$0xff] %vm1575_vm1, %v1900_v27  ;;  %v6388_v18 = vpack.c.bf16 %v2740_v56, %v2740_v56  ;;  %v5197_v54 = vld [vmem:[%s6840_s3 + $0x80] sm:$0xff]   ;;  %1959 = vst.msk [vmem:[#allocation3 + $0xd1] sm:$0xff] %vm1575_vm1, %v1901_v57  ;;  %v1872_v9 = vadd.f32 %v6293_v26, %v1775_v45  ;;  %v4873_v10 = vadd.f32 %v4872_v21, %v4871_v58 }
 0x1c7   :  { %2948 = vst.msk [vmem:[#allocation2 + $0x88] sm:$0xf] %vm116_vm0, %v6378_v33  ;;  %2724 = vst.msk [vmem:[#allocation2 + $0x84] sm:$0xf] %vm116_vm0, %v6382_v31  ;;  %v2293_v22 = vld [vmem:[#allocation3 + $0xb0] sm:$0xff]  ;;  %v4874_v59 = vpop.f32.mrf.mxu1  ;;  %4974 = vmatpush3.bf16.msra.mxu0 %v5197_v54  ;;  %v4815_v26 = vadd.f32 %v6111_v36, %v6109_v32  ;;  %v1879_v32 = vpop.f32.mrf.mxu0 }
 0x1c8   :  { %v2070_v5 = vld [vmem:[#allocation3 + $0xb1] sm:$0xff]  ;;  %2500 = vst.msk [vmem:[#allocation2 + $0x94] sm:$0xf] %vm116_vm0, %v6388_v18  ;;  %v6407_v25 = vpack.c.bf16 %v2293_v22, %v2293_v22  ;;  %2129 = vrot.lane.b32.xlu0 %v6186_v43, %s5287_s21  ;;  %v1902_v4 = vmax.f32 %v1872_v9, 0.0  ;;  %v1780_v41 = vadd.f32 %v4873_v10, %v1683_v15 }
 0x1c9   :  { %v2517_v24 = vld [vmem:[#allocation3 + $0xb2] sm:$0xff]  ;;  %v6409_v16 = vpack.c.bf16 %v2070_v5, %v2070_v5  ;;  %2575 = vrot.lane.b32.xlu1 %v6176_v6, %s5287_s21  ;;  %v4875_v17 = vpop.f32.mrf.mxu1  ;;  %v1686_v6 = vadd.f32 %v4812_v2, %v6120_v20  ;;  %v1691_v50 = vadd.f32 %v4815_v26, %v6120_v20 }
 0x1ca   :  { %v6417_v3 = vpack.c.bf16 %v2517_v24, %v2517_v24  ;;  %2054 = vst.msk [vmem:[#allocation2 + $0xb4] sm:$0xf] %vm116_vm0, %v6407_v25  ;;  %v4876_v14 = vadd.f32 %v4875_v17, %v4874_v59  ;;  %v1877_v23 = vadd.f32 %v1876_v29, %v1780_v41 }
 0x1cb   :  { %2501 = vst.msk [vmem:[#allocation2 + $0xa8] sm:$0xf] %vm116_vm0, %v6409_v16  ;;  %v4877_v49 = vpop.f32.mrf.mxu1 }
 0x1cc   :  { %2278 = vst.msk [vmem:[#allocation2 + $0xb8] sm:$0xf] %vm116_vm0, %v6417_v3  ;;  %2798 = vrot.lane.b32.xlu0 %v6186_v43, %s5287_s21  ;;  %v1903_v52 = vmax.f32 %v1877_v23, 0.0  ;;  %v1783_v27 = vadd.f32 %v4876_v14, %v1686_v6 }
 0x1cd   :  { %v2870_v11 = vld [vmem:[#allocation3 + $0xc2] sm:$0xff]  ;;  %1960 = vst.msk [vmem:[#allocation3 + $0xe1] sm:$0xff] %vm1575_vm1, %v1902_v4  ;;  %2139 = vrot.lane.b32.xlu1 %v6350_v13, %s5287_s21  ;;  %v2871_v47 = vld [vmem:[#allocation3 + $0xd2] sm:$0xff]  ;;  %v4878_v43 = vpop.f32.mrf.mxu1 }
 0x1ce   :  { %v2294_v39 = vld [vmem:[#allocation3 + $0xc0] sm:$0xff]  ;;  %v6428_v28 = vpack.c.bf16 %v2870_v11, %v2870_v11  ;;  %v2295_v7 = vld [vmem:[#allocation3 + $0xd0] sm:$0xff]  ;;  %v6448_v8 = vpack.c.bf16 %v2871_v47, %v2871_v47  ;;  %1961 = vst.msk [vmem:[#allocation3 + $0xf1] sm:$0xff] %vm1575_vm1, %v1903_v52  ;;  %v4879_v62 = vadd.f32 %v4878_v43, %v4877_v49  ;;  %v1880_v56 = vadd.f32 %v1879_v32, %v1783_v27 }
 0x1cf   :  { %v2199_v53 = vld [vmem:[#allocation3 + $0xc2] sm:$0xff]  ;;  %v6435_v36 = vpack.c.bf16 %v2294_v39, %v2294_v39  ;;  %v6451_v38 = vpack.c.bf16 %v2295_v7, %v2295_v7  ;;  %v2200_v42 = vld [vmem:[#allocation3 + $0xd2] sm:$0xff]  ;;  %v4880_v58 = vpop.f32.mrf.mxu1 }
 0x1d0   :  { %v2422_v35 = vld [vmem:[#allocation3 + $0xc1] sm:$0xff]  ;;  %v4653_v40 = vpack.c.bf16 %v2199_v53, %v2199_v53  ;;  %2950 = vst.msk [vmem:[#allocation2 + $0xb0] sm:$0xf] %vm116_vm0, %v6428_v28  ;;  %v2423_v51 = vld [vmem:[#allocation3 + $0xd1] sm:$0xff]  ;;  %2361 = vrot.lane.b32.xlu0 %v6358_v61, %s5287_s21  ;;  %v4654_v29 = vpack.c.bf16 %v2200_v42, %v2200_v42  ;;  %2951 = vst.msk [vmem:[#allocation2 + $0xc4] sm:$0xf] %vm116_vm0, %v6448_v8  ;;  %v1788_v57 = vadd.f32 %v4879_v62, %v1691_v50 }
 0x1d1   :  { %v4684_v44 = vpack.c.bf16 %v2422_v35, %v2422_v35  ;;  %2055 = vst.msk [vmem:[#allocation2 + $0xc8] sm:$0xf] %vm116_vm0, %v6435_v36  ;;  %2726 = vst.msk [vmem:[#allocation2 + $0xac] sm:$0xf] %vm116_vm0, %v6435_v36  ;;  %v2647_v30 = vld [vmem:[#allocation3 + $0xd0] sm:$0xff]  ;;  %2808 = vrot.lane.b32.xlu1 %v6350_v13, %s5287_s21  ;;  %v4685_v63 = vpack.c.bf16 %v2423_v51, %v2423_v51  ;;  %v1904_v45 = vmax.f32 %v1880_v56, 0.0  ;;  %v4881_v2 = vpop.f32.mrf.mxu1 }
 0x1d2   :  { %2279 = vst.msk [vmem:[#allocation2 + $0xcc] sm:$0xf] %vm116_vm0, %v4653_v40  ;;  %2056 = vst.msk [vmem:[#allocation2 + $0xdc] sm:$0xf] %vm116_vm0, %v6451_v38  ;;  %v4716_v54 = vpack.c.bf16 %v2647_v30, %v2647_v30  ;;  %v1694_v13 = vadd.f32 %v4818_v37, %v6120_v20  ;;  %v1885_v22 = vadd.f32 %v6356_v46, %v1788_v57  ;;  %v6478_v20 = vld [vmem:[%s6840_s3 + $0x118] sm:$0xff]  }
 0x1d3   :  { %2502 = vst.msk [vmem:[#allocation2 + $0xbc] sm:$0xf] %vm116_vm0, %v4684_v44  ;;  %2280 = vst.msk [vmem:[#allocation2 + $0xe0] sm:$0xf] %vm116_vm0, %v4654_v29  ;;  %v4882_v5 = vadd.f32 %v4881_v2, %v4880_v58  ;;  %5059 = vmatprep.subr.bf16.mxu1 %v6478_v20  ;;  %v2072_v2 = vld [vmem:[#allocation3 + $0xd1] sm:$0xff] }
 0x1d4   :  { %v2872_v15 = vld [vmem:[#allocation3 + $0xe2] sm:$0xff]  ;;  %2503 = vst.msk [vmem:[#allocation2 + $0xd0] sm:$0xf] %vm116_vm0, %v4685_v63  ;;  %2727 = vst.msk [vmem:[#allocation2 + $0xc0] sm:$0xf] %vm116_vm0, %v4716_v54  ;;  %2585 = vrot.lane.b32.xlu0 %v6347_v19, %s5287_s21  ;;  %v1905_v41 = vmax.f32 %v1885_v22, 0.0 }
 0x1d5   :  { %v2296_v21 = vld [vmem:[#allocation3 + $0xe0] sm:$0xff]  ;;  %v6464_v61 = vpack.c.bf16 %v2872_v15, %v2872_v15  ;;  %1962 = vst.msk [vmem:[#allocation3 + $0x101] sm:$0xff] %vm1575_vm1, %v1904_v45  ;;  %2135 = vrot.lane.b32.xlu1 %v6267_v34, %s5287_s21  ;;  %v1791_v26 = vadd.f32 %v4882_v5, %v1694_v13  ;;  %v2873_v17 = vld [vmem:[#allocation3 + $0xf2] sm:$0xff] }
 0x1d6   :  { %v2201_v24 = vld [vmem:[#allocation3 + $0xe2] sm:$0xff]  ;;  %v6473_v59 = vpack.c.bf16 %v2296_v21, %v2296_v21  ;;  %v2297_v19 = vld [vmem:[#allocation3 + $0xf0] sm:$0xff]  ;;  %v6487_v39 = vpack.c.bf16 %v2873_v17, %v2873_v17  ;;  %1963 = vst.msk [vmem:[#allocation3 + $0x111] sm:$0xff] %vm1575_vm1, %v1905_v41  ;;  %v4638_v21 = vpack.c.bf16 %v2072_v2, %v2072_v2 }
 0x1d7   :  { %v2648_v9 = vld [vmem:[#allocation3 + $0xe0] sm:$0xff]  ;;  %v4655_v46 = vpack.c.bf16 %v2201_v24, %v2201_v24  ;;  %2952 = vst.msk [vmem:[#allocation2 + $0xd8] sm:$0xf] %vm116_vm0, %v6464_v61  ;;  %v1888_v6 = vadd.f32 %v6415_v1, %v1791_v26  ;;  %v6491_v14 = vpack.c.bf16 %v2297_v19, %v2297_v19  ;;  %v2202_v23 = vld [vmem:[#allocation3 + $0xf2] sm:$0xff] }
 0x1d8   :  { %v2424_v10 = vld [vmem:[#allocation3 + $0xe1] sm:$0xff]  ;;  %v4717_v4 = vpack.c.bf16 %v2648_v9, %v2648_v9  ;;  %2057 = vst.msk [vmem:[#allocation2 + $0xf0] sm:$0xf] %vm116_vm0, %v6473_v59  ;;  %v2425_v53 = vld [vmem:[#allocation3 + $0xf1] sm:$0xff]  ;;  %2357 = vrot.lane.b32.xlu0 %v6269_v48, %s5287_s21  ;;  %v4656_v49 = vpack.c.bf16 %v2202_v23, %v2202_v23  ;;  %2953 = vst.msk [vmem:[#allocation2 + $0xec] sm:$0xf] %vm116_vm0, %v6487_v39 }
 0x1d9   :  { %v4686_v11 = vpack.c.bf16 %v2424_v10, %v2424_v10  ;;  %2281 = vst.msk [vmem:[#allocation2 + $0xf4] sm:$0xf] %vm116_vm0, %v4655_v46  ;;  %v2649_v35 = vld [vmem:[#allocation3 + $0xf0] sm:$0xff]  ;;  %2804 = vrot.lane.b32.xlu1 %v6267_v34, %s5287_s21  ;;  %v4687_v32 = vpack.c.bf16 %v2425_v53, %v2425_v53  ;;  %v1906_v1 = vmax.f32 %v1888_v6, 0.0  ;;  %2058 = vst.msk [vmem:[#allocation2 + $0x104] sm:$0xf] %vm116_vm0, %v6491_v14 }
 0x1da   :  { %2728 = vst.msk [vmem:[#allocation2 + $0xd4] sm:$0xf] %vm116_vm0, %v4717_v4  ;;  %v4718_v40 = vpack.c.bf16 %v2649_v35, %v2649_v35  ;;  %2282 = vst.msk [vmem:[#allocation2 + $0x108] sm:$0xf] %vm116_vm0, %v4656_v49  ;;  %v2071_v22 = vld [vmem:[#allocation3 + $0xc1] sm:$0xff] }
 0x1db   :  { %2504 = vst.msk [vmem:[#allocation2 + $0xe4] sm:$0xf] %vm116_vm0, %v4686_v11  ;;  %2505 = vst.msk [vmem:[#allocation2 + $0xf8] sm:$0xf] %vm116_vm0, %v4687_v32 }
 0x1dc   :  { %v2874_v44 = vld [vmem:[#allocation3 + $0x102] sm:$0xff]  ;;  %2729 = vst.msk [vmem:[#allocation2 + $0xe8] sm:$0xf] %vm116_vm0, %v4718_v40  ;;  %2581 = vrot.lane.b32.xlu0 %v6265_v12, %s5287_s21 }
 0x1dd   :  { %v2298_v52 = vld [vmem:[#allocation3 + $0x100] sm:$0xff]  ;;  %v6505_v48 = vpack.c.bf16 %v2874_v44, %v2874_v44  ;;  %1964 = vst.msk [vmem:[#allocation3 + $0x121] sm:$0xff] %vm1575_vm1, %v1906_v1  ;;  %2363 = vrot.lane.b32.xlu1 %v6382_v31, %s5287_s21  ;;  %v2875_v62 = vld [vmem:[#allocation3 + $0x112] sm:$0xff] }
 0x1de   :  { %v6508_v34 = vpack.c.bf16 %v2298_v52, %v2298_v52  ;;  %v2203_v27 = vld [vmem:[#allocation3 + $0x102] sm:$0xff]  ;;  %v2299_v56 = vld [vmem:[#allocation3 + $0x110] sm:$0xff]  ;;  %v6521_v12 = vpack.c.bf16 %v2875_v62, %v2875_v62 }
 0x1df   :  { %v2650_v50 = vld [vmem:[#allocation3 + $0x100] sm:$0xff]  ;;  %v4657_v47 = vpack.c.bf16 %v2203_v27, %v2203_v27  ;;  %2954 = vst.msk [vmem:[#allocation2 + $0x100] sm:$0xf] %vm116_vm0, %v6505_v48  ;;  %v4673_v31 = vpack.c.bf16 %v2299_v56, %v2299_v56  ;;  %v2204_v42 = vld [vmem:[#allocation3 + $0x112] sm:$0xff] }
 0x1e0   :  { %v2426_v37 = vld [vmem:[#allocation3 + $0x101] sm:$0xff]  ;;  %v4719_v43 = vpack.c.bf16 %v2650_v50, %v2650_v50  ;;  %2059 = vst.msk [vmem:[#allocation2 + $0x118] sm:$0xf] %vm116_vm0, %v6508_v34  ;;  %v2427_v51 = vld [vmem:[#allocation3 + $0x111] sm:$0xff]  ;;  %2810 = vrot.lane.b32.xlu0 %v6388_v18, %s5287_s21  ;;  %v4658_v58 = vpack.c.bf16 %v2204_v42, %v2204_v42  ;;  %2955 = vst.msk [vmem:[#allocation2 + $0x114] sm:$0xf] %vm116_vm0, %v6521_v12 }
 0x1e1   :  { %v4688_v7 = vpack.c.bf16 %v2426_v37, %v2426_v37  ;;  %2283 = vst.msk [vmem:[#allocation2 + $0x11c] sm:$0xf] %vm116_vm0, %v4657_v47  ;;  %v2651_v30 = vld [vmem:[#allocation3 + $0x110] sm:$0xff]  ;;  %2587 = vrot.lane.b32.xlu1 %v6378_v33, %s5287_s21  ;;  %v4689_v29 = vpack.c.bf16 %v2427_v51, %v2427_v51  ;;  %2060 = vst.msk [vmem:[#allocation2 + $0x12c] sm:$0xf] %vm116_vm0, %v4673_v31  ;;  %v2075_v9 = vld [vmem:[#allocation3 + $0x101] sm:$0xff] }
 0x1e2   :  { %2730 = vst.msk [vmem:[#allocation2 + $0xfc] sm:$0xf] %vm116_vm0, %v4719_v43  ;;  %v4720_v63 = vpack.c.bf16 %v2651_v30, %v2651_v30  ;;  %2284 = vst.msk [vmem:[#allocation2 + $0x130] sm:$0xf] %vm116_vm0, %v4658_v58  ;;  %v2076_v5 = vld [vmem:[#allocation3 + $0x111] sm:$0xff]  ;;  %v5213_v50 = vld [vmem:[%s6840_s3 + $0x108] sm:$0xff]  }
 0x1e3   :  { %2506 = vst.msk [vmem:[#allocation2 + $0x10c] sm:$0xf] %vm116_vm0, %v4688_v7  ;;  %2507 = vst.msk [vmem:[#allocation2 + $0x120] sm:$0xf] %vm116_vm0, %v4689_v29  ;;  %v5210_v52 = vld [vmem:[%s6840_s3 + $0x110] sm:$0xff]  }
 0x1e4   :  { %v2876_v57 = vld [vmem:[#allocation3 + $0x122] sm:$0xff]  ;;  %2731 = vst.msk [vmem:[#allocation2 + $0x110] sm:$0xf] %vm116_vm0, %v4720_v63  ;;  %2137 = vrot.lane.b32.xlu0 %v6306_v60, %s5287_s21 }
 0x1e5   :  { %v6533_v45 = vpack.c.bf16 %v2876_v57, %v2876_v57  ;;  %v2652_v18 = vld [vmem:[#allocation3 + $0x120] sm:$0xff]  ;;  %2359 = vrot.lane.b32.xlu1 %v6308_v0, %s5287_s21 }
 0x1e6   :  { %v2428_v54 = vld [vmem:[#allocation3 + $0x121] sm:$0xff]  ;;  %v4721_v33 = vpack.c.bf16 %v2652_v18, %v2652_v18 }
 0x1e7   :  { %v4690_v15 = vpack.c.bf16 %v2428_v54, %v2428_v54  ;;  %2956 = vst.msk [vmem:[#allocation2 + $0x128] sm:$0xf] %vm116_vm0, %v6533_v45  ;;  %v2073_v0 = vld [vmem:[#allocation3 + $0xe1] sm:$0xff] }
 0x1e8   :  { %2732 = vst.msk [vmem:[#allocation2 + $0x124] sm:$0xf] %vm116_vm0, %v4721_v33  ;;  %2806 = vrot.lane.b32.xlu0 %v6306_v60, %s5287_s21  ;;  %v4639_v13 = vpack.c.bf16 %v2073_v0, %v2073_v0  ;;  %v4637_v60 = vpack.c.bf16 %v2071_v22, %v2071_v22  ;;  %v2300_v10 = vld [vmem:[#allocation3 + $0x120] sm:$0xff] }
 0x1e9   :  { %2508 = vst.msk [vmem:[#allocation2 + $0x134] sm:$0xf] %vm116_vm0, %v4690_v15  ;;  %2583 = vrot.lane.b32.xlu1 %v6304_v55, %s5287_s21  ;;  %v2741_v55 = vld [vmem:[#allocation3 + $0x91] sm:$0xff] }
 0x1ec   :  { %2369 = vrot.lane.b32.xlu0 %v6451_v38, %s5287_s21  ;;  %v4730_v38 = vpack.c.bf16 %v2741_v55, %v2741_v55 }
 0x1ed   :  { %2147 = vrot.lane.b32.xlu1 %v4638_v21, %s5287_s21 }
 0x1f0   :  { %2365 = vrot.lane.b32.xlu0 %v6407_v25, %s5287_s21  ;;  %v4642_v25 = vpack.c.bf16 %v2076_v5, %v2076_v5 }
 0x1f1   :  { %2143 = vrot.lane.b32.xlu1 %v6409_v16, %s5287_s21  ;;  %v2074_v16 = vld [vmem:[#allocation3 + $0xf1] sm:$0xff] }
 0x1f2   :  { %v4640_v24 = vpack.c.bf16 %v2074_v16, %v2074_v16 }
 0x1f4   :  { %2149 = vrot.lane.b32.xlu0 %v4639_v13, %s5287_s21 }
 0x1f5   :  { %2371 = vrot.lane.b32.xlu1 %v6473_v59, %s5287_s21  ;;  %v4674_v59 = vpack.c.bf16 %v2300_v10, %v2300_v10 }
 0x1f8   :  { %2145 = vrot.lane.b32.xlu0 %v4637_v60, %s5287_s21 }
 0x1f9   :  { %2367 = vrot.lane.b32.xlu1 %v6435_v36, %s5287_s21  ;;  %v4641_v36 = vpack.c.bf16 %v2075_v9, %v2075_v9 }
 0x1fc   :  { %2377 = vrot.lane.b32.xlu0 %v4673_v31, %s5287_s21 }
 0x1fd   :  { %2812 = vrot.lane.b32.xlu1 %v4730_v38, %s5287_s21 }
 0x200   :  { %2373 = vrot.lane.b32.xlu0 %v6491_v14, %s5287_s21 }
 0x201   :  { %2155 = vrot.lane.b32.xlu1 %v4642_v25, %s5287_s21 }
 0x204   :  { %2589 = vrot.lane.b32.xlu0 %v6417_v3, %s5287_s21  ;;  %v2748_v3 = vld [vmem:[#allocation3 + $0x121] sm:$0xff] }
 0x205   :  { %2151 = vrot.lane.b32.xlu1 %v4640_v24, %s5287_s21  ;;  %v4737_v46 = vpack.c.bf16 %v2748_v3, %v2748_v3 }
 0x208   :  { %2153 = vrot.lane.b32.xlu0 %v4641_v36, %s5287_s21 }
 0x209   :  { %2375 = vrot.lane.b32.xlu1 %v6508_v34, %s5287_s21 }
 0x20c   :  { %2814 = vrot.lane.b32.xlu0 %v4637_v60, %s5287_s21 }
 0x20d   :  { %2379 = vrot.lane.b32.xlu1 %v4674_v59, %s5287_s21 }
 0x210   :  { %2593 = vrot.lane.b32.xlu0 %v6448_v8, %s5287_s21 }
 0x211   :  { %2591 = vrot.lane.b32.xlu1 %v6428_v28, %s5287_s21 }
 0x214   :  { %2818 = vrot.lane.b32.xlu0 %v4639_v13, %s5287_s21 }
 0x215   :  { %2816 = vrot.lane.b32.xlu1 %v4638_v21, %s5287_s21 }
 0x218   :  { %2597 = vrot.lane.b32.xlu0 %v6487_v39, %s5287_s21 }
 0x219   :  { %2595 = vrot.lane.b32.xlu1 %v6464_v61, %s5287_s21  ;;  %v2749_v61 = vld [vmem:[#allocation3 + $0x131] sm:$0xff] }
 0x21a   :  { %v4738_v26 = vpack.c.bf16 %v2749_v61, %v2749_v61 }
 0x21c   :  { %2822 = vrot.lane.b32.xlu0 %v4641_v36, %s5287_s21 }
 0x21d   :  { %2820 = vrot.lane.b32.xlu1 %v4640_v24, %s5287_s21 }
 0x220   :  { %2601 = vrot.lane.b32.xlu0 %v6521_v12, %s5287_s21  ;;  %v5220_v12 = vld [vmem:[%s6840_s3 + $0x100] sm:$0xff]  }
 0x221   :  { %2824 = vrot.lane.b32.xlu1 %v4642_v25, %s5287_s21 }
 0x222   :  { %v2354_v28 = vpop.permute.xlu0 %2353 }
 0x223   :  { %v2132_v8 = vpop.permute.xlu1 %2131  ;;  %2399 = vst.msk [vmem:[#allocation2 + $0x2c] sm:$0xf] %vm245_vm3, %v2354_v28 }
 0x224   :  { %2176 = vst.msk [vmem:[#allocation2 + $0x3c] sm:$0xf] %vm245_vm3, %v2132_v8  ;;  %2826 = vrot.lane.b32.xlu0 %v4737_v46, %s5287_s21 }
 0x225   :  { %2599 = vrot.lane.b32.xlu1 %v6505_v48, %s5287_s21 }
 0x226   :  { %v2578_v4 = vpop.permute.xlu0 %2577 }
 0x227   :  { %v2801_v41 = vpop.permute.xlu1 %2800  ;;  %2623 = vst.msk [vmem:[#allocation2 + $0x30] sm:$0xf] %vm245_vm3, %v2578_v4 }
 0x228   :  { %2847 = vst.msk [vmem:[#allocation2 + $0x20] sm:$0xf] %vm245_vm3, %v2801_v41 }
 0x229   :  { %2603 = vrot.lane.b32.xlu1 %v6533_v45, %s5287_s21 }
 0x22a   :  { %v2350_v11 = vpop.permute.xlu0 %2349 }
 0x22b   :  { %v2128_v17 = vpop.permute.xlu1 %2127  ;;  %2397 = vst.msk [vmem:[#allocation2 + $0x4] sm:$0xf] %vm245_vm3, %v2350_v11 }
 0x22c   :  { %2174 = vst.msk [vmem:[#allocation2 + $0x14] sm:$0xf] %vm245_vm3, %v2128_v17 }
 0x22d   :  { %2828 = vrot.lane.b32.xlu1 %v4738_v26, %s5287_s21 }
 0x22e   :  { %v2574_v19 = vpop.permute.xlu0 %2573 }
 0x22f   :  { %v2356_v39 = vpop.permute.xlu1 %2355  ;;  %2621 = vst.msk [vmem:[#allocation2 + $0x8] sm:$0xf] %vm245_vm3, %v2574_v19 }
 0x230   :  { %2400 = vst.msk [vmem:[#allocation2 + $0x40] sm:$0xf] %vm245_vm3, %v2356_v39 }
 0x232   :  { %v2134_v6 = vpop.permute.xlu0 %2133 }
 0x233   :  { %v2580_v14 = vpop.permute.xlu1 %2579  ;;  %2177 = vst.msk [vmem:[#allocation2 + $0x50] sm:$0xf] %vm245_vm3, %v2134_v6  ;;  %v5189_v1 = vld [vmem:[#allocation2] ss:$20 sps:$4 sm:$0xff]  }
 0x234   :  { %2624 = vst.msk [vmem:[#allocation2 + $0x44] sm:$0xf] %vm245_vm3, %v2580_v14 }
 0x236   :  { %v2803_v23 = vpop.permute.xlu0 %2802 }
 0x237   :  { %v2352_v53 = vpop.permute.xlu1 %2351  ;;  %2848 = vst.msk [vmem:[#allocation2 + $0x34] sm:$0xf] %vm245_vm3, %v2803_v23  ;;  %v5194_v27 = vld [vmem:[#allocation2 + $0x2c] ss:$20 sps:$4 sm:$0xff]  }
 0x238   :  { %2398 = vst.msk [vmem:[#allocation2 + $0x18] sm:$0xf] %vm245_vm3, %v2352_v53  ;;  %v2967_v47 = vld [vmem:[#allocation2 + $0x3c] sm:$0xff] }
 0x23a   :  { %v2130_v35 = vpop.permute.xlu0 %2129 }
 0x23b   :  { %v2576_v49 = vpop.permute.xlu1 %2575  ;;  %2175 = vst.msk [vmem:[#allocation2 + $0x28] sm:$0xf] %vm245_vm3, %v2130_v35 }
 0x23c   :  { %2622 = vst.msk [vmem:[#allocation2 + $0x1c] sm:$0xf] %vm245_vm3, %v2576_v49 }
 0x23e   :  { %v2799_v32 = vpop.permute.xlu0 %2798  ;;  %v2965_v63 = vld [vmem:[#allocation2 + $0x30] sm:$0xff] }
 0x23f   :  { %v2140_v40 = vpop.permute.xlu1 %2139  ;;  %v5191_v44 = vld [vmem:[#allocation2 + $0x4] ss:$20 sps:$4 sm:$0xff]   ;;  %2846 = vst.msk [vmem:[#allocation2 + $0xc] sm:$0xf] %vm245_vm3, %v2799_v32 }
 0x240   :  { %2180 = vst.msk [vmem:[#allocation2 + $0x8c] sm:$0xf] %vm245_vm3, %v2140_v40  ;;  %3573 = vmatprep.mubr.bf16.mxu1 %v5191_v44 }
 0x241   :  { %3574 = vmatmul.mubr.bf16.vlgmr.msra.gmra.mxu1 %v5189_v1 }
 0x242   :  { %v2362_v48 = vpop.permute.xlu0 %2361  ;;  %5060 = vmatpush3.bf16.msra.mxu1 %v6478_v20  ;;  %v2964_v37 = vld [vmem:[#allocation2 + $0x28] sm:$0xff]  ;;  %3581 = vmatprep.mubr.bf16.mxu1 %v5194_v27 }
 0x243   :  { %v2809_v34 = vpop.permute.xlu1 %2808  ;;  %2403 = vst.msk [vmem:[#allocation2 + $0x7c] sm:$0xf] %vm245_vm3, %v2362_v48  ;;  %5061 = vmatprep.subr.bf16.mxu1 %v5210_v52  ;;  %v5198_v62 = vld [vmem:[#allocation2 + $0x8] ss:$20 sps:$4 sm:$0xff]   ;;  %v4388_v20 = vcombine.low %v2964_v37, %v2967_v47 }
 0x244   :  { %2851 = vst.msk [vmem:[#allocation2 + $0x70] sm:$0xf] %vm245_vm3, %v2809_v34 }
 0x246   :  { %v2586_v43 = vpop.permute.xlu0 %2585  ;;  %v5200_v56 = vld [vmem:[#allocation2 + $0xc] ss:$20 sps:$4 sm:$0xff]   ;;  %5062 = vmatpush3.bf16.msra.mxu1 %v5210_v52 }
 0x247   :  { %v2136_v7 = vpop.permute.xlu1 %2135  ;;  %2627 = vst.msk [vmem:[#allocation2 + $0x80] sm:$0xf] %vm245_vm3, %v2586_v43  ;;  %5063 = vmatprep.subr.bf16.mxu1 %v5213_v50  ;;  %3670 = vmatprep.mubr.bf16.mxu0 %v5200_v56 }
 0x248   :  { %2178 = vst.msk [vmem:[#allocation2 + $0x64] sm:$0xf] %vm245_vm3, %v2136_v7  ;;  %3671 = vmatmul.mubr.bf16.vlgmr.msra.gmra.mxu0 %v5198_v62 }
 0x249   :  { %3582 = vmatmul.mubr.bf16.gmra.mxu1 %v4388_v20 }
 0x24a   :  { %v2358_v31 = vpop.permute.xlu0 %2357  ;;  %5064 = vmatpush3.bf16.msra.mxu1 %v5213_v50 }
 0x24b   :  { %v2805_v42 = vpop.permute.xlu1 %2804  ;;  %2401 = vst.msk [vmem:[#allocation2 + $0x54] sm:$0xf] %vm245_vm3, %v2358_v31  ;;  %5065 = vmatprep.subr.bf16.mxu1 %v5220_v12 }
 0x24c   :  { %2849 = vst.msk [vmem:[#allocation2 + $0x48] sm:$0xf] %vm245_vm3, %v2805_v42 }
 0x24e   :  { %v2582_v51 = vpop.permute.xlu0 %2581  ;;  %5066 = vmatpush3.bf16.msra.mxu1 %v5220_v12 }
 0x24f   :  { %v2364_v30 = vpop.permute.xlu1 %2363  ;;  %2625 = vst.msk [vmem:[#allocation2 + $0x58] sm:$0xf] %vm245_vm3, %v2582_v51 }
 0x250   :  { %2404 = vst.msk [vmem:[#allocation2 + $0x90] sm:$0xf] %vm245_vm3, %v2364_v30 }
 0x252   :  { %v2811_v58 = vpop.permute.xlu0 %2810  ;;  %v2970_v13 = vld [vmem:[#allocation2 + $0x50] sm:$0xff] }
 0x253   :  { %v2588_v29 = vpop.permute.xlu1 %2587  ;;  %v2968_v57 = vld [vmem:[#allocation2 + $0x44] sm:$0xff]  ;;  %2852 = vst.msk [vmem:[#allocation2 + $0x84] sm:$0xf] %vm245_vm3, %v2811_v58 }
 0x254   :  { %v5201_v45 = vld [vmem:[#allocation2 + $0x34] ss:$20 sps:$4 sm:$0xff]   ;;  %2628 = vst.msk [vmem:[#allocation2 + $0x94] sm:$0xf] %vm245_vm3, %v2588_v29  ;;  %v4390_v18 = vcombine.low %v2965_v63, %v2968_v57  ;;  %v5223_v63 = vld [vmem:[#allocation2 + $0x10] ss:$20 sps:$4 sm:$0xff]  }
 0x255   :  { %3678 = vmatprep.mubr.bf16.mxu0 %v5201_v45 }
 0x256   :  { %3679 = vmatmul.mubr.bf16.gmra.mxu0 %v4390_v18  ;;  %v2138_v54 = vpop.permute.xlu0 %2137 }
 0x257   :  { %v2360_v33 = vpop.permute.xlu1 %2359  ;;  %2179 = vst.msk [vmem:[#allocation2 + $0x78] sm:$0xf] %vm245_vm3, %v2138_v54  ;;  %v5206_v38 = vld [vmem:[#allocation2 + $0x7c] ss:$20 sps:$4 sm:$0xff]  }
 0x258   :  { %2402 = vst.msk [vmem:[#allocation2 + $0x68] sm:$0xf] %vm245_vm3, %v2360_v33  ;;  %v2979_v59 = vld [vmem:[#allocation2 + $0x8c] sm:$0xff] }
 0x25a   :  { %v2807_v15 = vpop.permute.xlu0 %2806  ;;  %v2977_v35 = vld [vmem:[#allocation2 + $0x80] sm:$0xff] }
 0x25b   :  { %v2584_v2 = vpop.permute.xlu1 %2583  ;;  %2850 = vst.msk [vmem:[#allocation2 + $0x5c] sm:$0xf] %vm245_vm3, %v2807_v15 }
 0x25c   :  { %2626 = vst.msk [vmem:[#allocation2 + $0x6c] sm:$0xf] %vm245_vm3, %v2584_v2 }
 0x25e   :  { %v2370_v21 = vpop.permute.xlu0 %2369  ;;  %v2976_v10 = vld [vmem:[#allocation2 + $0x78] sm:$0xff] }
 0x25f   :  { %v2148_v0 = vpop.permute.xlu1 %2147  ;;  %v2973_v22 = vld [vmem:[#allocation2 + $0x64] sm:$0xff]  ;;  %2407 = vst.msk [vmem:[#allocation2 + $0xcc] sm:$0xf] %vm245_vm3, %v2370_v21  ;;  %v4398_v8 = vcombine.low %v2976_v10, %v2979_v59  ;;  %v5236_v10 = vld [vmem:[#allocation2 + $0xd8] ss:$20 sps:$4 sm:$0xff]  }
 0x260   :  { %v5204_v55 = vld [vmem:[#allocation2 + $0x54] ss:$20 sps:$4 sm:$0xff]   ;;  %2184 = vst.msk [vmem:[#allocation2 + $0xdc] sm:$0xf] %vm245_vm3, %v2148_v0  ;;  %v4393_v60 = vcombine.low %v2970_v13, %v2973_v22  ;;  %v5226_v0 = vld [vmem:[#allocation2 + $0x38] ss:$20 sps:$4 sm:$0xff]  }
 0x261   :  { %3589 = vmatprep.mubr.bf16.mxu1 %v5204_v55  ;;  %v5227_v13 = vld [vmem:[#allocation2 + $0x60] ss:$20 sps:$4 sm:$0xff]  }
 0x262   :  { %3590 = vmatmul.mubr.bf16.gmra.mxu1 %v4393_v60  ;;  %v2366_v5 = vpop.permute.xlu0 %2365  ;;  %v2971_v16 = vld [vmem:[#allocation2 + $0x58] sm:$0xff]  ;;  %v5237_v59 = vld [vmem:[#allocation2 + $0x100] ss:$20 sps:$4 sm:$0xff]  }
 0x263   :  { %v2144_v25 = vpop.permute.xlu1 %2143  ;;  %3597 = vmatprep.mubr.bf16.mxu1 %v5206_v38  ;;  %v2974_v24 = vld [vmem:[#allocation2 + $0x6c] sm:$0xff]  ;;  %2405 = vst.msk [vmem:[#allocation2 + $0xa4] sm:$0xf] %vm245_vm3, %v2366_v5 }
 0x264   :  { %v5208_v9 = vld [vmem:[#allocation2 + $0x5c] ss:$20 sps:$4 sm:$0xff]   ;;  %2182 = vst.msk [vmem:[#allocation2 + $0xb4] sm:$0xf] %vm245_vm3, %v2144_v25  ;;  %v4395_v36 = vcombine.low %v2971_v16, %v2974_v24 }
 0x265   :  { %3686 = vmatprep.mubr.bf16.mxu0 %v5208_v9  ;;  %v5231_v25 = vld [vmem:[#allocation2 + $0x88] ss:$20 sps:$4 sm:$0xff]   ;;  %v5232_v16 = vld [vmem:[#allocation2 + $0xb0] ss:$20 sps:$4 sm:$0xff]  }
 0x266   :  { %3687 = vmatmul.mubr.bf16.gmra.mxu0 %v4395_v36  ;;  %v2150_v3 = vpop.permute.xlu0 %2149 }
 0x267   :  { %v2372_v28 = vpop.permute.xlu1 %2371  ;;  %2185 = vst.msk [vmem:[#allocation2 + $0xf0] sm:$0xf] %vm245_vm3, %v2150_v3 }
 0x268   :  { %2408 = vst.msk [vmem:[#allocation2 + $0xe0] sm:$0xf] %vm245_vm3, %v2372_v28 }
 0x26a   :  { %3598 = vmatmul.mubr.bf16.gmra.mxu1 %v4398_v8  ;;  %v2146_v46 = vpop.permute.xlu0 %2145  ;;  %v2982_v17 = vld [vmem:[#allocation2 + $0xa0] sm:$0xff]  ;;  %v5241_v8 = vld [vmem:[#allocation2 + $0x128] ss:$20 sps:$4 sm:$0xff]  }
 0x26b   :  { %v2368_v61 = vpop.permute.xlu1 %2367  ;;  %2183 = vst.msk [vmem:[#allocation2 + $0xc8] sm:$0xf] %vm245_vm3, %v2146_v46 }
 0x26c   :  { %2406 = vst.msk [vmem:[#allocation2 + $0xb8] sm:$0xf] %vm245_vm3, %v2368_v61 }
 0x26e   :  { %v2378_v4 = vpop.permute.xlu0 %2377 }
 0x26f   :  { %v2813_v41 = vpop.permute.xlu1 %2812  ;;  %2411 = vst.msk [vmem:[#allocation2 + $0x11c] sm:$0xf] %vm245_vm3, %v2378_v4  ;;  %v5214_v14 = vld [vmem:[#allocation2 + $0xcc] ss:$20 sps:$4 sm:$0xff]  }
 0x270   :  { %2853 = vst.msk [vmem:[#allocation2 + $0x98] sm:$0xf] %vm245_vm3, %v2813_v41  ;;  %v2991_v44 = vld [vmem:[#allocation2 + $0xdc] sm:$0xff] }
 0x272   :  { %v2374_v26 = vpop.permute.xlu0 %2373  ;;  %v2988_v1 = vld [vmem:[#allocation2 + $0xc8] sm:$0xff] }
 0x273   :  { %v2156_v11 = vpop.permute.xlu1 %2155  ;;  %v2985_v19 = vld [vmem:[#allocation2 + $0xb4] sm:$0xff]  ;;  %2409 = vst.msk [vmem:[#allocation2 + $0xf4] sm:$0xf] %vm245_vm3, %v2374_v26  ;;  %v4408_v34 = vcombine.low %v2988_v1, %v2991_v44 }
 0x274   :  { %v5211_v39 = vld [vmem:[#allocation2 + $0xa4] ss:$20 sps:$4 sm:$0xff]   ;;  %2188 = vst.msk [vmem:[#allocation2 + $0x12c] sm:$0xf] %vm245_vm3, %v2156_v11  ;;  %v4403_v6 = vcombine.low %v2982_v17, %v2985_v19 }
 0x275   :  { %3605 = vmatprep.mubr.bf16.mxu1 %v5211_v39 }
 0x276   :  { %3606 = vmatmul.mubr.bf16.gmra.mxu1 %v4403_v6  ;;  %v2590_v23 = vpop.permute.xlu0 %2589 }
 0x277   :  { %v2152_v53 = vpop.permute.xlu1 %2151  ;;  %3613 = vmatprep.mubr.bf16.mxu1 %v5214_v14  ;;  %v2980_v49 = vld [vmem:[#allocation2 + $0x94] sm:$0xff]  ;;  %2629 = vst.msk [vmem:[#allocation2 + $0xa8] sm:$0xf] %vm245_vm3, %v2590_v23 }
 0x278   :  { %v5216_v32 = vld [vmem:[#allocation2 + $0x84] ss:$20 sps:$4 sm:$0xff]   ;;  %2186 = vst.msk [vmem:[#allocation2 + $0x104] sm:$0xf] %vm245_vm3, %v2152_v53  ;;  %v4400_v40 = vcombine.low %v2977_v35, %v2980_v49 }
 0x279   :  { %3694 = vmatprep.mubr.bf16.mxu0 %v5216_v32 }
 0x27a   :  { %3695 = vmatmul.mubr.bf16.gmra.mxu0 %v4400_v40  ;;  %v2154_v52 = vpop.permute.xlu0 %2153  ;;  %v2994_v43 = vld [vmem:[#allocation2 + $0xf0] sm:$0xff] }
 0x27b   :  { %v2376_v48 = vpop.permute.xlu1 %2375  ;;  %2187 = vst.msk [vmem:[#allocation2 + $0x118] sm:$0xf] %vm245_vm3, %v2154_v52 }
 0x27c   :  { %2410 = vst.msk [vmem:[#allocation2 + $0x108] sm:$0xf] %vm245_vm3, %v2376_v48 }
 0x27e   :  { %3614 = vmatmul.mubr.bf16.gmra.mxu1 %v4408_v34  ;;  %v2815_v27 = vpop.permute.xlu0 %2814 }
 0x27f   :  { %v2380_v50 = vpop.permute.xlu1 %2379  ;;  %2854 = vst.msk [vmem:[#allocation2 + $0xac] sm:$0xf] %vm245_vm3, %v2815_v27 }
 0x280   :  { %2412 = vst.msk [vmem:[#allocation2 + $0x130] sm:$0xf] %vm245_vm3, %v2380_v50 }
 0x282   :  { %v2594_v37 = vpop.permute.xlu0 %2593  ;;  %v3000_v51 = vld [vmem:[#allocation2 + $0x118] sm:$0xff] }
 0x283   :  { %v2592_v47 = vpop.permute.xlu1 %2591  ;;  %v2997_v7 = vld [vmem:[#allocation2 + $0x104] sm:$0xff]  ;;  %2631 = vst.msk [vmem:[#allocation2 + $0xd0] sm:$0xf] %vm245_vm3, %v2594_v37 }
 0x284   :  { %v5218_v62 = vld [vmem:[#allocation2 + $0xf4] ss:$20 sps:$4 sm:$0xff]   ;;  %2630 = vst.msk [vmem:[#allocation2 + $0xbc] sm:$0xf] %vm245_vm3, %v2592_v47  ;;  %v4413_v56 = vcombine.low %v2994_v43, %v2997_v7 }
 0x285   :  { %3621 = vmatprep.mubr.bf16.mxu1 %v5218_v62 }
 0x286   :  { %3622 = vmatmul.mubr.bf16.gmra.mxu1 %v4413_v56  ;;  %v2819_v20 = vpop.permute.xlu0 %2818  ;;  %v2983_v57 = vld [vmem:[#allocation2 + $0xa8] sm:$0xff] }
 0x287   :  { %v2817_v12 = vpop.permute.xlu1 %2816  ;;  %v5221_v31 = vld [vmem:[#allocation2 + $0x11c] ss:$20 sps:$4 sm:$0xff]   ;;  %2856 = vst.msk [vmem:[#allocation2 + $0xd4] sm:$0xf] %vm245_vm3, %v2819_v20 }
 0x288   :  { %2855 = vst.msk [vmem:[#allocation2 + $0xc0] sm:$0xf] %vm245_vm3, %v2817_v12  ;;  %v3003_v42 = vld [vmem:[#allocation2 + $0x12c] sm:$0xff]  ;;  %3629 = vmatprep.mubr.bf16.mxu1 %v5221_v31 }
 0x289   :  { %v4418_v29 = vcombine.low %v3000_v51, %v3003_v42 }
 0x28a   :  { %v2598_v30 = vpop.permute.xlu0 %2597 }
 0x28b   :  { %v2596_v58 = vpop.permute.xlu1 %2595  ;;  %2633 = vst.msk [vmem:[#allocation2 + $0xf8] sm:$0xf] %vm245_vm3, %v2598_v30 }
 0x28c   :  { %2632 = vst.msk [vmem:[#allocation2 + $0xe4] sm:$0xf] %vm245_vm3, %v2596_v58 }
 0x28e   :  { %3630 = vmatmul.mubr.bf16.gmra.mxu1 %v4418_v29  ;;  %v2823_v45 = vpop.permute.xlu0 %2822 }
 0x28f   :  { %v2821_v18 = vpop.permute.xlu1 %2820  ;;  %5067 = vmatprep.mubr.msk.bf16.mxu1 %vm1575_vm1, %v5223_v63  ;;  %v2986_v54 = vld [vmem:[#allocation2 + $0xbc] sm:$0xff]  ;;  %2858 = vst.msk [vmem:[#allocation2 + $0xfc] sm:$0xf] %vm245_vm3, %v2823_v45 }
 0x290   :  { %v5224_v33 = vld [vmem:[#allocation2 + $0xac] ss:$20 sps:$4 sm:$0xff]   ;;  %2857 = vst.msk [vmem:[#allocation2 + $0xe8] sm:$0xf] %vm245_vm3, %v2821_v18  ;;  %v4405_v15 = vcombine.low %v2983_v57, %v2986_v54 }
 0x291   :  { %3702 = vmatprep.mubr.bf16.mxu0 %v5224_v33 }
 0x292   :  { %3703 = vmatmul.mubr.bf16.gmra.mxu0 %v4405_v15  ;;  %v2602_v2 = vpop.permute.xlu0 %2601 }
 0x293   :  { %v2825_v21 = vpop.permute.xlu1 %2824  ;;  %2635 = vst.msk [vmem:[#allocation2 + $0x120] sm:$0xf] %vm245_vm3, %v2602_v2  ;;  %v5230_v38 = vld [vmem:[#allocation2 + $0xd0] ss:$20 sps:$4 sm:$0xff]  }
 0x294   :  { %2859 = vst.msk [vmem:[#allocation2 + $0x110] sm:$0xf] %vm245_vm3, %v2825_v21 }
 0x296   :  { %5068 = vmatmul.mubr.msk.bf16.vlgmr.msra.gmra.mxu1 %vm1575_vm1, %v5226_v0  ;;  %v2827_v22 = vpop.permute.xlu0 %2826 }
 0x297   :  { %v2600_v55 = vpop.permute.xlu1 %2599  ;;  %5071 = vmatprep.mubr.msk.bf16.mxu1 %vm1575_vm1, %v5227_v13  ;;  %v5228_v60 = vld [vmem:[#allocation2 + $0xd4] ss:$20 sps:$4 sm:$0xff]   ;;  %2860 = vst.msk [vmem:[#allocation2 + $0x124] sm:$0xf] %vm245_vm3, %v2827_v22  ;;  %v6715_v22 = vld [vmem:[%s6841_s4] ss:$0 sm:$0xff] }
 0x298   :  { %2634 = vst.msk [vmem:[#allocation2 + $0x10c] sm:$0xf] %vm245_vm3, %v2600_v55  ;;  %3710 = vmatprep.mubr.bf16.mxu0 %v5228_v60 }
 0x29a   :  { %3711 = vmatmul.mubr.bf16.gmra.mxu0 %v5230_v38 }
 0x29b   :  { %v2604_v5 = vpop.permute.xlu1 %2603  ;;  %v5233_v9 = vld [vmem:[#allocation2 + $0xfc] ss:$20 sps:$4 sm:$0xff]  }
 0x29c   :  { %2636 = vst.msk [vmem:[#allocation2 + $0x134] sm:$0xf] %vm245_vm3, %v2604_v5  ;;  %3718 = vmatprep.mubr.bf16.mxu0 %v5233_v9 }
 0x29e   :  { %5072 = vmatmul.mubr.msk.bf16.gmra.mxu1 %vm1575_vm1, %v5231_v25 }
 0x29f   :  { %v2829_v24 = vpop.permute.xlu1 %2828  ;;  %5075 = vmatprep.mubr.msk.bf16.mxu1 %vm1575_vm1, %v5232_v16  ;;  %v5235_v36 = vld [vmem:[#allocation2 + $0xf8] ss:$20 sps:$4 sm:$0xff]  }
 0x2a0   :  { %2861 = vst.msk [vmem:[#allocation2 + $0x138] sm:$0xf] %vm245_vm3, %v2829_v24 }
 0x2a2   :  { %3719 = vmatmul.mubr.bf16.gmra.mxu0 %v5235_v36 }
 0x2a3   :  { %v5240_v28 = vld [vmem:[#allocation2 + $0x120] ss:$20 sps:$4 sm:$0xff]  }
 0x2a6   :  { %5076 = vmatmul.mubr.msk.bf16.gmra.mxu1 %vm1575_vm1, %v5236_v10 }
 0x2a7   :  { %5079 = vmatprep.mubr.msk.bf16.mxu1 %vm1575_vm1, %v5237_v59  ;;  %v5238_v3 = vld [vmem:[#allocation2 + $0x124] ss:$20 sps:$4 sm:$0xff]  }
 0x2a8   :  { %3726 = vmatprep.mubr.bf16.mxu0 %v5238_v3 }
 0x2aa   :  { %3727 = vmatmul.mubr.bf16.gmra.mxu0 %v5240_v28 }
 0x2ae   :  { %5080 = vmatmul.mubr.msk.bf16.gmra.mxu1 %vm1575_vm1, %v5241_v8 }
 0x301   :  { %v4911_v46 = vpop.f32.mrf.mxu1 }
 0x303   :  { %v4912_v61 = vpop.f32.mrf.mxu1 }
 0x304   :  { %v4913_v0 = vadd.f32 %v4912_v61, %v4911_v46  ;;  %v4368_v46 = vld [vmem:[%s6837_s0 + $0x31] sm:$0xff] }
 0x305   :  { %v4914_v4 = vpop.f32.mrf.mxu1 }
 0x306   :  { %v3576_v36 = vadd.f32 %v4913_v0, %v6715_v22 }
 0x307   :  { %v4915_v41 = vpop.f32.mrf.mxu1 }
 0x308   :  { %v4975_v17 = vpop.f32.mrf.mxu0  ;;  %v4916_v16 = vadd.f32 %v4915_v41, %v4914_v4 }
 0x309   :  { %v4917_v26 = vpop.f32.mrf.mxu1 }
 0x30a   :  { %v4976_v39 = vpop.f32.mrf.mxu0 }
 0x30b   :  { %v4918_v11 = vpop.f32.mrf.mxu1  ;;  %v4977_v5 = vadd.f32 %v4976_v39, %v4975_v17 }
 0x30c   :  { %v4978_v14 = vpop.f32.mrf.mxu0  ;;  %v4919_v15 = vadd.f32 %v4918_v11, %v4917_v26  ;;  %v3579_v11 = vadd.f32 %v4916_v16, %v6715_v22 }
 0x30d   :  { %v4920_v19 = vpop.f32.mrf.mxu1  ;;  %v3673_v41 = vadd.f32 %v4977_v5, %v3576_v36 }
 0x30e   :  { %v4979_v35 = vpop.f32.mrf.mxu0  ;;  %v3584_v38 = vadd.f32 %v4919_v15, %v6715_v22 }
 0x30f   :  { %v4921_v6 = vpop.f32.mrf.mxu1  ;;  %v4980_v3 = vadd.f32 %v4979_v35, %v4978_v14 }
 0x310   :  { %v4922_v25 = vadd.f32 %v4921_v6, %v4920_v19  ;;  %v4366_v6 = vld [vmem:[%s6837_s0 + $0x11] sm:$0xff] }
 0x312   :  { %v3587_v26 = vadd.f32 %v4922_v25, %v6715_v22 }
 0x316   :  { %v4981_v32 = vpop.f32.mrf.mxu0 }
 0x318   :  { %v4982_v44 = vpop.f32.mrf.mxu0 }
 0x319   :  { %v4983_v13 = vadd.f32 %v4982_v44, %v4981_v32 }
 0x31a   :  { %v4984_v48 = vpop.f32.mrf.mxu0 }
 0x31b   :  { %v3681_v59 = vadd.f32 %v4983_v13, %v3584_v38 }
 0x31c   :  { %v4985_v27 = vpop.f32.mrf.mxu0 }
 0x31d   :  { %v4986_v10 = vadd.f32 %v4985_v27, %v4984_v48  ;;  %v4369_v27 = vld [vmem:[%s6837_s0 + $0x41] sm:$0xff] }
 0x322   :  { %v4923_v23 = vpop.f32.mrf.mxu1 }
 0x324   :  { %v4924_v53 = vpop.f32.mrf.mxu1 }
 0x325   :  { %v4925_v17 = vadd.f32 %v4924_v53, %v4923_v23  ;;  %v3676_v53 = vadd.f32 %v4980_v3, %v3579_v11 }
 0x326   :  { %v6674_v49 = vpop.f32.mrf.mxu1  ;;  %v4987_v37 = vpop.f32.mrf.mxu0 }
 0x327   :  { %v3592_v13 = vadd.f32 %v4925_v17, %v6715_v22 }
 0x328   :  { %v6676_v40 = vpop.f32.mrf.mxu1  ;;  %v4988_v7 = vpop.f32.mrf.mxu0 }
 0x329   :  { %v4989_v44 = vadd.f32 %v4988_v7, %v4987_v37  ;;  %v4928_v38 = vadd.f32 %v6676_v40, %v6674_v49  ;;  %v4367_v7 = vld [vmem:[%s6837_s0 + $0x21] sm:$0xff]  ;;  %v4372_v40 = vld [vmem:[%s6837_s0 + $0x71] sm:$0xff] }
 0x32a   :  { %v4929_v1 = vpop.f32.mrf.mxu1  ;;  %v6688_v20 = vpop.f32.mrf.mxu0 }
 0x32c   :  { %v4930_v52 = vpop.f32.mrf.mxu1  ;;  %v6694_v42 = vpop.f32.mrf.mxu0 }
 0x32d   :  { %v4931_v28 = vadd.f32 %v4930_v52, %v4929_v1  ;;  %v3684_v1 = vadd.f32 %v4986_v10, %v3587_v26  ;;  %v4992_v10 = vadd.f32 %v6694_v42, %v6688_v20  ;;  %v3595_v26 = vadd.f32 %v4928_v38, %v6715_v22  ;;  %v4370_v42 = vld [vmem:[%s6837_s0 + $0x51] sm:$0xff] }
 0x32e   :  { %v6678_v34 = vpop.f32.mrf.mxu1 }
 0x32f   :  { %v3600_v52 = vadd.f32 %v4931_v28, %v6715_v22  ;;  %v3689_v28 = vadd.f32 %v4989_v44, %v3592_v13 }
 0x330   :  { %v4933_v50 = vpop.f32.mrf.mxu1 }
 0x336   :  { %v6680_v47 = vpop.f32.mrf.mxu1 }
 0x338   :  { %v6682_v43 = vpop.f32.mrf.mxu1 }
 0x339   :  { %v4937_v20 = vadd.f32 %v6682_v43, %v6680_v47 }
 0x33a   :  { %v6684_v62 = vpop.f32.mrf.mxu1  ;;  %v4993_v30 = vpop.f32.mrf.mxu0 }
 0x33c   :  { %v6686_v56 = vpop.f32.mrf.mxu1  ;;  %v4994_v63 = vpop.f32.mrf.mxu0 }
 0x33d   :  { %v4995_v19 = vadd.f32 %v4994_v63, %v4993_v30  ;;  %v4934_v30 = vadd.f32 %v4933_v50, %v6678_v34 }
 0x33e   :  { %v6690_v12 = vpop.f32.mrf.mxu1  ;;  %v4996_v18 = vpop.f32.mrf.mxu0 }
 0x33f   :  { %v3697_v25 = vadd.f32 %v4995_v19, %v3600_v52 }
 0x340   :  { %v6692_v31 = vpop.f32.mrf.mxu1  ;;  %v4997_v2 = vpop.f32.mrf.mxu0 }
 0x341   :  { %v4998_v16 = vadd.f32 %v4997_v2, %v4996_v18  ;;  %v3603_v18 = vadd.f32 %v4934_v30, %v6715_v22 }
 0x342   :  { %v6696_v51 = vpop.f32.mrf.mxu1 }
 0x343   :  { %v3700_v19 = vadd.f32 %v4998_v16, %v3603_v18 }
 0x344   :  { %v6698_v58 = vpop.f32.mrf.mxu1 }
 0x346   :  { %v6700_v29 = vpop.f32.mrf.mxu1 }
 0x348   :  { %v6702_v57 = vpop.f32.mrf.mxu1 }
 0x34a   :  { %v6704_v45 = vpop.f32.mrf.mxu1 }
 0x34c   :  { %v6706_v54 = vpop.f32.mrf.mxu1 }
 0x34e   :  { %v6708_v33 = vpop.f32.mrf.mxu1 }
 0x350   :  { %v6710_v21 = vpop.f32.mrf.mxu1 }
 0x352   :  { %v6717_v55 = vpop.f32.mrf.mxu1  ;;  %v6719_v60 = vpop.f32.mrf.mxu0 }
 0x354   :  { %v6722_v24 = vpop.f32.mrf.mxu1  ;;  %v6724_v9 = vpop.f32.mrf.mxu0 }
 0x355   :  { %v5001_v47 = vadd.f32 %v6724_v9, %v6719_v60  ;;  %v4371_v60 = vld [vmem:[%s6837_s0 + $0x61] sm:$0xff] }
 0x356   :  { %v6727_v8 = vpop.f32.mrf.mxu0  ;;  %v5069_v61 = vpop.f32.mrf.mxu1 }
 0x357   :  { %v3778_v4 = vadd.f32 %v5069_v61, %v3681_v59  ;;  %v4943_v59 = vadd.f32 %v6692_v31, %v6690_v12 }
 0x358   :  { %v6734_v39 = vpop.f32.mrf.mxu0  ;;  %v3769_v14 = vpop.f32.mrf.mxu1 }
 0x359   :  { %v3834_v35 = vadd.f32 %v4368_v46, %v3778_v4  ;;  %v3770_v32 = vadd.f32 %v3769_v14, %v3673_v41  ;;  %v4946_v14 = vadd.f32 %v6698_v58, %v6696_v51  ;;  %v4940_v51 = vadd.f32 %v6686_v56, %v6684_v62  ;;  %v4376_v62 = vld [vmem:[%s6837_s0 + $0xd1] sm:$0xff] }
 0x35a   :  { %v5005_v48 = vpop.f32.mrf.mxu0  ;;  %v5070_v23 = vpop.f32.mrf.mxu1 }
 0x35b   :  { %v3850_v63 = vmax.f32 %v3834_v35, 0.0  ;;  %v3832_v15 = vadd.f32 %v4366_v6, %v3770_v32  ;;  %v3781_v0 = vadd.f32 %v5070_v23, %v3684_v1  ;;  %v3616_v6 = vadd.f32 %v4943_v59, %v6715_v22  ;;  %v4373_v35 = vld [vmem:[%s6837_s0 + $0x81] sm:$0xff] }
 0x35c   :  { %v5006_v37 = vpop.f32.mrf.mxu0  ;;  %v3772_v5 = vpop.f32.mrf.mxu1  ;;  %v3611_v16 = vadd.f32 %v4940_v51, %v6715_v22 }
 0x35d   :  { %3866 = vst.msk [vmem:[#allocation7 + $0x10] sm:$0xff] %vm1575_vm1, %v3850_v63  ;;  %v3848_v36 = vmax.f32 %v3832_v15, 0.0  ;;  %v3835_v34 = vadd.f32 %v4369_v27, %v3781_v0  ;;  %v3773_v50 = vadd.f32 %v3772_v5, %v3676_v53  ;;  %v5007_v12 = vadd.f32 %v5006_v37, %v5005_v48 }
 0x35e   :  { %v5008_v49 = vpop.f32.mrf.mxu0  ;;  %v5073_v3 = vpop.f32.mrf.mxu1  ;;  %v3692_v48 = vadd.f32 %v4992_v10, %v3595_v26  ;;  %v3608_v27 = vadd.f32 %v4937_v20, %v6715_v22  ;;  %v3619_v0 = vadd.f32 %v4946_v14, %v6715_v22  ;;  %v5004_v37 = vadd.f32 %v6734_v39, %v6727_v8  ;;  %v4374_v10 = vld [vmem:[%s6837_s0 + $0xb1] sm:$0xff] }
 0x35f   :  { %3864 = vst.msk [vmem:[#allocation7] sm:$0xff] %vm1575_vm1, %v3848_v36  ;;  %v3851_v2 = vmax.f32 %v3835_v34, 0.0  ;;  %v3833_v46 = vadd.f32 %v4367_v7, %v3773_v50  ;;  %v3794_v61 = vadd.f32 %v5073_v3, %v3697_v25  ;;  %v3713_v23 = vadd.f32 %v5007_v12, %v3616_v6 }
 0x360   :  { %v5009_v31 = vpop.f32.mrf.mxu0  ;;  %v3785_v4 = vpop.f32.mrf.mxu1  ;;  %v3705_v38 = vadd.f32 %v5001_v47, %v3608_v27  ;;  %v4949_v36 = vadd.f32 %v6702_v57, %v6700_v29  ;;  %v4955_v34 = vadd.f32 %v6710_v21, %v6708_v33  ;;  %v4377_v29 = vld [vmem:[%s6837_s0 + $0xe1] sm:$0xff]  ;;  %v4958_v20 = vadd.f32 %v6722_v24, %v6717_v55 }
 0x361   :  { %3867 = vst.msk [vmem:[#allocation7 + $0x18] sm:$0xff] %vm1575_vm1, %v3851_v2  ;;  %v3849_v41 = vmax.f32 %v3833_v46, 0.0  ;;  %v3838_v11 = vadd.f32 %v4372_v40, %v3794_v61  ;;  %v3786_v17 = vadd.f32 %v3785_v4, %v3689_v28  ;;  %v5010_v53 = vadd.f32 %v5009_v31, %v5008_v49  ;;  %v4375_v31 = vld [vmem:[%s6837_s0 + $0xc1] sm:$0xff] }
 0x362   :  { %v5011_v43 = vpop.f32.mrf.mxu0  ;;  %v5074_v32 = vpop.f32.mrf.mxu1  ;;  %v3708_v2 = vadd.f32 %v5004_v37, %v3611_v16  ;;  %v3624_v46 = vadd.f32 %v4949_v36, %v6715_v22  ;;  %v4952_v61 = vadd.f32 %v6706_v54, %v6704_v45  ;;  %v3632_v26 = vadd.f32 %v4955_v34, %v6715_v22 }
 0x363   :  { %3865 = vst.msk [vmem:[#allocation7 + $0x8] sm:$0xff] %vm1575_vm1, %v3849_v41  ;;  %v3854_v1 = vmax.f32 %v3838_v11, 0.0  ;;  %v3836_v44 = vadd.f32 %v4370_v42, %v3786_v17  ;;  %v3797_v52 = vadd.f32 %v5074_v32, %v3700_v19  ;;  %v3716_v40 = vadd.f32 %v5010_v53, %v3619_v0  ;;  %v4381_v53 = vld [vmem:[%s6837_s0 + $0x121] sm:$0xff] }
 0x364   :  { %v5012_v58 = vpop.f32.mrf.mxu0  ;;  %v3788_v9 = vpop.f32.mrf.mxu1  ;;  %v3627_v47 = vadd.f32 %v4952_v61, %v6715_v22 }
 0x365   :  { %3870 = vst.msk [vmem:[#allocation7 + $0x30] sm:$0xff] %vm1575_vm1, %v3854_v1  ;;  %v3852_v30 = vmax.f32 %v3836_v44, 0.0  ;;  %v3839_v63 = vadd.f32 %v4373_v35, %v3797_v52  ;;  %v3789_v15 = vadd.f32 %v3788_v9, %v3692_v48  ;;  %v5013_v3 = vadd.f32 %v5012_v58, %v5011_v43  ;;  %v4380_v35 = vld [vmem:[%s6837_s0 + $0x111] sm:$0xff] }
 0x366   :  { %v5014_v13 = vpop.f32.mrf.mxu0  ;;  %v5077_v56 = vpop.f32.mrf.mxu1  ;;  %v3635_v43 = vadd.f32 %v4958_v20, %v6715_v22  ;;  %v4378_v1 = vld [vmem:[%s6837_s0 + $0xf1] sm:$0xff] }
 0x367   :  { %3868 = vst.msk [vmem:[#allocation7 + $0x20] sm:$0xff] %vm1575_vm1, %v3852_v30  ;;  %v3855_v7 = vmax.f32 %v3839_v63, 0.0  ;;  %v3837_v5 = vadd.f32 %v4371_v60, %v3789_v15  ;;  %v3810_v25 = vadd.f32 %v5077_v56, %v3713_v23  ;;  %v3721_v45 = vadd.f32 %v5013_v3, %v3624_v46  ;;  %v4379_v30 = vld [vmem:[%s6837_s0 + $0x101] sm:$0xff]  ;;  %s5262_s0 = scalar_lea.vmem %s3886_s7, 2048 }
 0x368   :  { %v5015_v50 = vpop.f32.mrf.mxu0  ;;  %v3801_v59 = vpop.f32.mrf.mxu1  ;;  %p5263_p5 = scmp.ne.s32.totalorder %s3886_s7, %s5262_s0  ;;  %p5268_p7 = scmp.lt.s32.totalorder %s5262_s0, %s5262_s0 }
 0x369   :  { %3871 = vst.msk [vmem:[#allocation7 + $0x38] sm:$0xff] %vm1575_vm1, %v3855_v7  ;;  %v3853_v8 = vmax.f32 %v3837_v5, 0.0  ;;  %v3842_v39 = vadd.f32 %v4376_v62, %v3810_v25  ;;  %v3802_v49 = vadd.f32 %v3801_v59, %v3705_v38  ;;  %v5016_v54 = vadd.f32 %v5015_v50, %v5014_v13 }
 0x36a   :  { %v5017_v28 = vpop.f32.mrf.mxu0  ;;  %v5078_v57 = vpop.f32.mrf.mxu1  ;;  %p5269_p8 = por %p5268_p7, %p5267_p6 }
 0x36b   :  { %3869 = vst.msk [vmem:[#allocation7 + $0x28] sm:$0xff] %vm1575_vm1, %v3853_v8  ;;  %v3858_v33 = vmax.f32 %v3842_v39, 0.0  ;;  %v3840_v21 = vadd.f32 %v4374_v10, %v3802_v49  ;;  %v3813_v18 = vadd.f32 %v5078_v57, %v3716_v40  ;;  %v3724_v23 = vadd.f32 %v5016_v54, %v3627_v47 }
 0x36c   :  { %v5018_v12 = vpop.f32.mrf.mxu0  ;;  %v3804_v42 = vpop.f32.mrf.mxu1  ;;  %p5270_p9 = pnand %p5269_p8, %p5263_p5 }
 0x36d   :  { %3874 = vst.msk [vmem:[#allocation7 + $0x50] sm:$0xff] %vm1575_vm1, %v3858_v33  ;;  %v3856_v4 = vmax.f32 %v3840_v21, 0.0  ;;  %v3843_v41 = vadd.f32 %v4377_v29, %v3813_v18  ;;  %v5019_v11 = vadd.f32 %v5018_v12, %v5017_v28  ;;  %v3805_v17 = vadd.f32 %v3804_v42, %v3708_v2 }
 0x36e   :  { %v5020_v19 = vpop.f32.mrf.mxu0  ;;  %v5081_v6 = vpop.f32.mrf.mxu1 }
 0x36f   :  { %3872 = vst.msk [vmem:[#allocation7 + $0x40] sm:$0xff] %vm1575_vm1, %v3856_v4  ;;  %v3859_v14 = vmax.f32 %v3843_v41, 0.0  ;;  %v3841_v55 = vadd.f32 %v4375_v31, %v3805_v17  ;;  %v3729_v24 = vadd.f32 %v5019_v11, %v3632_v26 }
 0x370   :  { %v5021_v32 = vpop.f32.mrf.mxu0  ;;  %v3817_v44 = vpop.f32.mrf.mxu1 }
 0x371   :  { %3875 = vst.msk [vmem:[#allocation7 + $0x58] sm:$0xff] %vm1575_vm1, %v3859_v14  ;;  %v3857_v52 = vmax.f32 %v3841_v55, 0.0  ;;  %v3826_v48 = vadd.f32 %v5081_v6, %v3729_v24  ;;  %v5022_v27 = vadd.f32 %v5021_v32, %v5020_v19  ;;  %v3818_v51 = vadd.f32 %v3817_v44, %v3721_v45 }
 0x372   :  { %v5082_v58 = vpop.f32.mrf.mxu1 }
 0x373   :  { %3873 = vst.msk [vmem:[#allocation7 + $0x48] sm:$0xff] %vm1575_vm1, %v3857_v52  ;;  %v3846_v22 = vadd.f32 %v4380_v35, %v3826_v48  ;;  %v3844_v60 = vadd.f32 %v4378_v1, %v3818_v51  ;;  %v3732_v9 = vadd.f32 %v5022_v27, %v3635_v43 }
 0x374   :  { %v3820_v63 = vpop.f32.mrf.mxu1 }
 0x375   :  { %v3862_v15 = vmax.f32 %v3846_v22, 0.0  ;;  %v3860_v0 = vmax.f32 %v3844_v60, 0.0  ;;  %v3829_v13 = vadd.f32 %v5082_v58, %v3732_v9  ;;  %v3821_v62 = vadd.f32 %v3820_v63, %v3724_v23 }
 0x377   :  { %3878 = vst.msk [vmem:[#allocation7 + $0x70] sm:$0xff] %vm1575_vm1, %v3862_v15  ;;  %3876 = vst.msk [vmem:[#allocation7 + $0x60] sm:$0xff] %vm1575_vm1, %v3860_v0  ;;  %v3847_v56 = vadd.f32 %v4381_v53, %v3829_v13  ;;  %v3845_v38 = vadd.f32 %v4379_v30, %v3821_v62 }
 0x379   :  { %v3863_v37 = vmax.f32 %v3847_v56, 0.0  ;;  %v3861_v7 = vmax.f32 %v3845_v38, 0.0 }
 0x37b   :  { %3879 = vst.msk [vmem:[#allocation7 + $0x78] sm:$0xff] %vm1575_vm1, %v3863_v37  ;;  %3877 = vst.msk [vmem:[#allocation7 + $0x68] sm:$0xff] %vm1575_vm1, %v3861_v7 }
 0x37c   :  { %5273 = shalt.err (!%p5270_p9)
}
 0x37d   :  { %s5291_s1 = smov 128   ;;  %s5292_s8 = smov 8  }
 0x37e   :  { %3891 = dma.vmem_to_hbm [thread:$0]  %s3886_s7, 2048, %s6842_s5, [#allocation6], %s5291_s1, %s5291_s1, %s5292_s8  }
 0x37f   :  { %5284 = dma.done.wait [#allocation6], 2048  }
 0x380   :  { %5285 = vsyncadd [#allocation6], 4294965248 }
 0x381   :  { %3895 = vsyncpa [#allocation5], 1 }
 0x382   :  { %3896 = vsyncpa [#allocation6], 1 }

</bundles_post_ra>
